<compile_context>
chip_gen: v7x
topology: tpu7x:2x2x1
jax: 0.10.0
libtpu: 0.0.40
codegen_flags: <defaults>
</compile_context>

<pallas_src>
import functools

import numpy as np
import jax
import jax.numpy as jnp
from jax.experimental import pallas as pl
from jax.experimental.pallas import tpu as pltpu

MATMUL_DTYPE = jnp.bfloat16   # MXU operand dtype; accumulation is always f32
ACT_DTYPE = jnp.bfloat16      # inter-kernel activation storage dtype


def _round_up(x, m):
    return (x + m - 1) // m * m


def _pick_tm(n, cap=256):
    """Row tile: multiple of 8, <= cap, and >= 2 grid steps when possible."""
    tm = min(cap, _round_up(max(n, 8), 8))
    if n > 8:
        tm = min(tm, max(8, _round_up((n + 1) // 2, 8)))
    return tm


# --------------------------- fused q / kv projection -------------------------

def _qkv_proj_kernel(x_ref, y_ref, wq_ref, wkv_ref, q_ref, kv_ref):
    x = x_ref[...].astype(MATMUL_DTYPE)
    y = y_ref[...].astype(MATMUL_DTYPE)
    q_ref[...] = jnp.dot(x, wq_ref[...],
                         preferred_element_type=jnp.float32).astype(q_ref.dtype)
    kv_ref[...] = jnp.dot(y, wkv_ref[...],
                          preferred_element_type=jnp.float32).astype(kv_ref.dtype)


def qkv_projection(x2, y2, wq, wkv):
    """q = x2 @ wq, kv = y2 @ wkv in one row-tiled kernel (bf16 outputs)."""
    n, din = x2.shape
    dq, dkv = wq.shape[1], wkv.shape[1]
    tm = _pick_tm(n)
    n_pad = _round_up(n, tm)
    if n_pad != n:
        pad = ((0, n_pad - n), (0, 0))
        x2 = jnp.pad(x2, pad)
        y2 = jnp.pad(y2, pad)
    q, kv = pl.pallas_call(
        _qkv_proj_kernel,
        out_shape=(jax.ShapeDtypeStruct((n_pad, dq), ACT_DTYPE),
                   jax.ShapeDtypeStruct((n_pad, dkv), ACT_DTYPE)),
        grid=(n_pad // tm,),
        in_specs=[pl.BlockSpec((tm, din), lambda i: (i, 0)),
                  pl.BlockSpec((tm, din), lambda i: (i, 0)),
                  pl.BlockSpec((din, dq), lambda i: (0, 0)),
                  pl.BlockSpec((din, dkv), lambda i: (0, 0))],
        out_specs=(pl.BlockSpec((tm, dq), lambda i: (i, 0)),
                   pl.BlockSpec((tm, dkv), lambda i: (i, 0))),
        compiler_params=pltpu.CompilerParams(
            dimension_semantics=("parallel",)),
        cost_estimate=pl.CostEstimate(
            flops=2 * n_pad * din * (dq + dkv),
            transcendentals=0,
            bytes_accessed=(8 * n_pad * din
                            + 2 * din * (dq + dkv)
                            + 2 * n_pad * (dq + dkv))),
    )(x2, y2, wq, wkv)
    if n_pad != n:
        q, kv = q[:n], kv[:n]
    return q, kv


# ------------------------------ output projection ----------------------------

def _out_proj_kernel(x_ref, w_ref, b_ref, o_ref):
    x = x_ref[...].astype(MATMUL_DTYPE)
    y = jnp.dot(x, w_ref[...], preferred_element_type=jnp.float32)
    o_ref[...] = (y + b_ref[...]).astype(o_ref.dtype)


def out_projection(x2, w, b):
    n, din = x2.shape
    dout = w.shape[1]
    tm = _pick_tm(n)
    n_pad = _round_up(n, tm)
    if n_pad != n:
        x2 = jnp.pad(x2, ((0, n_pad - n), (0, 0)))
    out = pl.pallas_call(
        _out_proj_kernel,
        out_shape=jax.ShapeDtypeStruct((n_pad, dout), jnp.float32),
        grid=(n_pad // tm,),
        in_specs=[pl.BlockSpec((tm, din), lambda i: (i, 0)),
                  pl.BlockSpec((din, dout), lambda i: (0, 0)),
                  pl.BlockSpec((1, dout), lambda i: (0, 0))],
        out_specs=pl.BlockSpec((tm, dout), lambda i: (i, 0)),
        compiler_params=pltpu.CompilerParams(
            dimension_semantics=("parallel",)),
        cost_estimate=pl.CostEstimate(
            flops=2 * n_pad * din * dout,
            transcendentals=0,
            bytes_accessed=(2 * n_pad * din + 2 * din * dout
                            + 4 * n_pad * dout)),
    )(x2, w, b.reshape(1, dout))
    return out[:n] if n_pad != n else out


# ------------------------- grouped window attention --------------------------

def _grouped_attn_kernel(q_ref, k_ref, v_ref, bias_ref, o_ref, *,
                         heads, head_dim):
    # q/k/v blocks: (1, 1, G, heads*head_dim) bf16; scale already folded into q.
    q = q_ref[0, 0]
    k = k_ref[0, 0]
    v = v_ref[0, 0]
    bias = bias_ref[0]                       # (G, G) f32, -inf off-window-blocks
    outs = []
    for h in range(heads):                   # heads live on the lane axis
        sl = slice(h * head_dim, (h + 1) * head_dim)
        qh, kh, vh = q[:, sl], k[:, sl], v[:, sl]
        # dense (G, G) scores; contraction on head_dim, no explicit transpose
        s = jax.lax.dot_general(qh, kh, (((1,), (1,)), ((), ())),
                                preferred_element_type=jnp.float32)
        s = s + bias
        m = jnp.max(s, axis=-1, keepdims=True)      # finite: diag blocks finite
        p = jnp.exp(s - m)                          # exp(-inf) -> exactly 0
        attn = p * pl.reciprocal(jnp.sum(p, axis=-1, keepdims=True),
                                 approx=True)
        outs.append(jnp.dot(attn.astype(MATMUL_DTYPE), vh,
                            preferred_element_type=jnp.float32))
    # heads concatenated along lanes -> lane-dense (G, heads*head_dim) store
    o_ref[0, 0] = jnp.concatenate(outs, axis=-1).astype(o_ref.dtype)


def window_attention_core(qg, kg, vg, bias_g, heads, head_dim):
    """qg,kg,vg: (B, NG, G, inner) bf16; bias_g: (NG, G, G) f32."""
    B, NG, G, inner = qg.shape
    grid = (NG, B)        # group axis OUTER -> bias block reused across batch
    qkv_spec = pl.BlockSpec((1, 1, G, inner), lambda gj, b: (b, gj, 0, 0))
    bias_spec = pl.BlockSpec((1, G, G), lambda gj, b: (gj, 0, 0))
    kern = functools.partial(_grouped_attn_kernel, heads=heads,
                             head_dim=head_dim)
    return pl.pallas_call(
        kern,
        out_shape=jax.ShapeDtypeStruct((B, NG, G, inner), ACT_DTYPE),
        grid=grid,
        in_specs=[qkv_spec, qkv_spec, qkv_spec, bias_spec],
        out_specs=pl.BlockSpec((1, 1, G, inner), lambda gj, b: (b, gj, 0, 0)),
        compiler_params=pltpu.CompilerParams(
            dimension_semantics=("parallel", "parallel")),
        cost_estimate=pl.CostEstimate(
            flops=4 * B * NG * heads * G * G * head_dim,
            transcendentals=B * NG * heads * G * G,
            bytes_accessed=2 * 4 * B * NG * G * inner + 4 * NG * G * G),
    )(qg, kg, vg, bias_g)


# ------------------------ bias / mask construction ---------------------------

def create_mask_np(window_size, displacement, upper_lower, left_right):
    ws = window_size
    mask = np.zeros((ws * ws, ws * ws), dtype=np.float32)
    if upper_lower:
        mask[-displacement * ws:, :-displacement * ws] = -np.inf
        mask[:-displacement * ws, -displacement * ws:] = -np.inf
    if left_right:
        mask = mask.reshape(ws, ws, ws, ws)
        mask[:, -displacement:, :, :-displacement] = -np.inf
        mask[:, :-displacement, :, -displacement:] = -np.inf
        mask = mask.reshape(ws * ws, ws * ws)
    return mask


def build_window_bias(pos_emb, window_size, nwh, nww, shifted,
                      relative_pos_embedding=True):
    """Per-window additive bias = (relative) pos bias + shifted-window masks.

    Returns (NW, WS2, WS2) f32.  Mask placement matches the PyTorch slicing:
    dots[:, :, -nw_w:] += upper_lower  <->  windows in the last window-row;
    dots[:, :, nw_w-1::nw_w] += left_right <-> windows in the last window-col.
    """
    ws = window_size
    ws2 = ws * ws
    pos_emb = np.asarray(pos_emb, dtype=np.float32)
    if relative_pos_embedding:
        idx = np.array([[x, y] for x in range(ws) for y in range(ws)])
        rel = idx[None, :, :] - idx[:, None, :] + ws - 1       # (WS2, WS2, 2)
        pos_bias = pos_emb[rel[..., 0], rel[..., 1]]           # (WS2, WS2)
    else:
        pos_bias = pos_emb
    bias = np.broadcast_to(pos_bias, (nwh * nww, ws2, ws2)).copy()
    if shifted:
        disp = ws // 2
        ul = create_mask_np(ws, disp, True, False)
        lr = create_mask_np(ws, disp, False, True)
        for wh in range(nwh):
            for ww in range(nww):
                w = wh * nww + ww
                if wh == nwh - 1:
                    bias[w] += ul
                if ww == nww - 1:
                    bias[w] += lr
    return bias


def group_windows(nw, ws2, target_rows=256):
    """Windows per attention block: aim for ~256 score rows (v6e/v7x MXU)."""
    g = max(1, min(nw, target_rows // max(ws2, 1)))
    while nw % g:
        g -= 1
    return g


def build_grouped_bias(per_window_bias, group):
    """Block-diagonal (NG, G, G) bias; -inf off the window-diagonal blocks.

    Every row keeps its own window's (finite-diagonal) block, so no softmax
    row is fully -inf (no NaN from exp(-inf - (-inf))).
    """
    nw, ws2, _ = per_window_bias.shape
    ng = nw // group
    G = group * ws2
    out = np.full((ng, G, G), -np.inf, dtype=np.float32)
    for j in range(ng):
        for t in range(group):
            w = j * group + t
            out[j, t * ws2:(t + 1) * ws2,
                   t * ws2:(t + 1) * ws2] = per_window_bias[w]
    return jnp.asarray(out)


def prepare_params(w_qkv, w_out, b_out, pos_emb, *, heads, head_dim,
                   window_size, nwh, nww, shifted,
                   relative_pos_embedding=True, target_rows=256):
    """Host-side prep: fold softmax scale into q weights, cast weights to bf16,
    and build the grouped block-diagonal bias."""
    inner = heads * head_dim
    scale = head_dim ** -0.5
    per_window = build_window_bias(pos_emb, window_size, nwh, nww, shifted,
                                   relative_pos_embedding)
    group = group_windows(nwh * nww, window_size * window_size, target_rows)
    return dict(
        wq=(jnp.asarray(w_qkv)[:, :inner] * scale).astype(MATMUL_DTYPE),
        wkv=jnp.asarray(w_qkv)[:, inner:].astype(MATMUL_DTYPE),
        w_out=jnp.asarray(w_out).astype(MATMUL_DTYPE),
        b_out=jnp.asarray(b_out, jnp.float32),
        bias=build_grouped_bias(per_window, group),
    )


# ------------------------------- forward pass --------------------------------

def window_attention4_forward(z, params, *, heads, head_dim, window_size,
                              shifted, split=768):
    ws = window_size
    x = z[..., :split]
    y = z[..., split:]
    b, n_h, n_w, dim = x.shape
    assert y.shape[-1] == dim               # to_qkv is shared by x and y
    inner = heads * head_dim
    disp = ws // 2
    if shifted:
        x = jnp.roll(x, shift=(-disp, -disp), axis=(1, 2))     # CyclicShift(-d)
    n = b * n_h * n_w
    # only q(x) and k(y), v(y) of the qkv chunks are actually used.
    q, kv = qkv_projection(x.reshape(n, dim), y.reshape(n, dim),
                           params["wq"], params["wkv"])
    k, v = kv[:, :inner], kv[:, inner:]

    nwh, nww = n_h // ws, n_w // ws
    NW, WS2 = nwh * nww, ws * ws
    G = params["bias"].shape[-1]
    group = G // WS2
    NG = NW // group

    def to_groups(t):            # (n, inner) -> (b, NG, group*WS2, inner), bf16
        t = t.reshape(b, nwh, ws, nww, ws, inner)
        t = t.transpose(0, 1, 3, 2, 4, 5)
        return t.reshape(b, NG, G, inner)

    ow = window_attention_core(to_groups(q), to_groups(k), to_groups(v),
                               params["bias"], heads, head_dim)
    o = ow.reshape(b, nwh, nww, ws, ws, inner)
    o = o.transpose(0, 1, 3, 2, 4, 5).reshape(n, inner)
    o = out_projection(o, params["w_out"], params["b_out"])
    o = o.reshape(b, n_h, n_w, dim)
    if shifted:
        o = jnp.roll(o, shift=(disp, disp), axis=(1, 2))        # CyclicShift(+d)
    return jnp.concatenate([o, y], axis=-1)


# -------------------------- pure-JAX reference check -------------------------

def _reference_forward(z, w_qkv, w_out, b_out, pos_emb, *, heads, head_dim,
                       window_size, shifted, relative_pos_embedding=True,
                       split=768):
    """Independent reference: masks applied via the original PyTorch slicing."""
    ws = window_size
    x = z[..., :split]
    y = z[..., split:]
    b, n_h, n_w, _ = x.shape
    inner = heads * head_dim
    disp = ws // 2
    if shifted:
        x = jnp.roll(x, shift=(-disp, -disp), axis=(1, 2))
    q = x @ w_qkv[:, :inner]
    K = y @ w_qkv[:, inner:2 * inner]
    V = y @ w_qkv[:, 2 * inner:]
    nwh, nww = n_h // ws, n_w // ws

    def win(t):
        t = t.reshape(b, nwh, ws, nww, ws, heads, head_dim)
        return t.transpose(0, 5, 1, 3, 2, 4, 6).reshape(
            b, heads, nwh * nww, ws * ws, head_dim)

    qw, Kw, Vw = win(q), win(K), win(V)
    dots = jnp.einsum('bhwid,bhwjd->bhwij', qw, Kw) * (head_dim ** -0.5)
    if relative_pos_embedding:
        idx = np.array([[i, j] for i in range(ws) for j in range(ws)])
        rel = idx[None, :, :] - idx[:, None, :] + ws - 1
        pos_bias = jnp.asarray(
            np.asarray(pos_emb, np.float32)[rel[..., 0], rel[..., 1]])
    else:
        pos_bias = jnp.asarray(pos_emb)
    dots = dots + pos_bias[None, None, None]
    if shifted:
        ul = jnp.asarray(create_mask_np(ws, disp, True, False))
        lr = jnp.asarray(create_mask_np(ws, disp, False, True))
        dots = dots.at[:, :, -nww:].add(ul)
        dots = dots.at[:, :, nww - 1::nww].add(lr)
    attn = jax.nn.softmax(dots, axis=-1)
    o = jnp.einsum('bhwij,bhwjd->bhwid', attn, Vw)
    o = o.reshape(b, heads, nwh, nww, ws, ws, head_dim)
    o = o.transpose(0, 2, 4, 3, 5, 1, 6).reshape(b, n_h, n_w, inner)
    o = o @ w_out + b_out
    if shifted:
        o = jnp.roll(o, shift=(disp, disp), axis=(1, 2))
    return jnp.concatenate([o, y], axis=-1)


# ----------------------------------- main ------------------------------------

if __name__ == "__main__":
    heads, head_dim, ws = 4, 32, 4
    dim = 768          # the module hard-codes the channel split z[..., :768]
    b, H, W = 2, 8, 8
    shifted = True
    inner = heads * head_dim
    nwh, nww = H // ws, W // ws

    key = jax.random.PRNGKey(0)
    kz, kq, ko, kb, kpe = jax.random.split(key, 5)
    z = jax.random.normal(kz, (b, H, W, 2 * dim), jnp.float32)
    pos_emb = jax.random.normal(kpe, (2 * ws - 1, 2 * ws - 1), jnp.float32)
    w_qkv = 0.02 * jax.random.normal(kq, (dim, 3 * inner), jnp.float32)
    w_out = 0.02 * jax.random.normal(ko, (inner, dim), jnp.float32)
    b_out = 0.02 * jax.random.normal(kb, (dim,), jnp.float32)

    params = prepare_params(np.asarray(w_qkv), np.asarray(w_out),
                            np.asarray(b_out), np.asarray(pos_emb),
                            heads=heads, head_dim=head_dim, window_size=ws,
                            nwh=nwh, nww=nww, shifted=shifted)

    fwd = jax.jit(functools.partial(window_attention4_forward, heads=heads,
                                    head_dim=head_dim, window_size=ws,
                                    shifted=shifted, split=dim))
    out = jax.block_until_ready(fwd(z, params))
    assert out.shape == (b, H, W, 2 * dim), out.shape
    assert bool(jnp.all(jnp.isfinite(out)))

    ref = _reference_forward(z, w_qkv, w_out, b_out, pos_emb, heads=heads,
                             head_dim=head_dim, window_size=ws,
                             shifted=shifted, split=dim)
    np.testing.assert_allclose(np.asarray(out), np.asarray(ref),
                               atol=3e-2, rtol=3e-2)
    print("KERNEL_OK")
</pallas_src>

<mosaic_0001>
module attributes {stable_mosaic.version = 11 : i64} {
  func.func @_qkv_proj_kernel(%arg0: i32, %arg1: memref<64x768xf32, #tpu.memory_space<vmem>>, %arg2: memref<64x768xf32, #tpu.memory_space<vmem>>, %arg3: memref<768x128xbf16, #tpu.memory_space<vmem>>, %arg4: memref<768x256xbf16, #tpu.memory_space<vmem>>, %arg5: memref<64x128xbf16, #tpu.memory_space<vmem>>, %arg6: memref<64x256xbf16, #tpu.memory_space<vmem>>) attributes {dimension_semantics = [#tpu.dimension_semantics<parallel>], iteration_bounds = array<i64: 2>, scalar_prefetch = 0 : i64, scratch_operands = 0 : i64, tpu.core_type = #tpu.core_type<tc>, window_params = [{transform_indices = @transform_0, window_bounds = array<i64: 64, 768>}, {transform_indices = @transform_1, window_bounds = array<i64: 64, 768>}, {pipeline_mode = #tpu.pipeline_mode<synchronous>, transform_indices = @transform_2, window_bounds = array<i64: 768, 128>}, {pipeline_mode = #tpu.pipeline_mode<synchronous>, transform_indices = @transform_3, window_bounds = array<i64: 768, 256>}, {transform_indices = @transform_4, window_bounds = array<i64: 64, 128>}, {transform_indices = @transform_5, window_bounds = array<i64: 64, 256>}]} {
    %c0 = arith.constant 0 : index
    %c0_0 = arith.constant 0 : index
    %0 = vector.load %arg1[%c0, %c0_0] : memref<64x768xf32, #tpu.memory_space<vmem>>, vector<64x768xf32>
    %1 = arith.truncf %0 : vector<64x768xf32> to vector<64x768xbf16>
    %c0_1 = arith.constant 0 : index
    %c0_2 = arith.constant 0 : index
    %2 = vector.load %arg2[%c0_1, %c0_2] : memref<64x768xf32, #tpu.memory_space<vmem>>, vector<64x768xf32>
    %3 = arith.truncf %2 : vector<64x768xf32> to vector<64x768xbf16>
    %c0_3 = arith.constant 0 : index
    %c0_4 = arith.constant 0 : index
    %4 = vector.load %arg3[%c0_3, %c0_4] : memref<768x128xbf16, #tpu.memory_space<vmem>>, vector<768x128xbf16>
    %cst = arith.constant dense<0.000000e+00> : vector<64x128xf32>
    %5 = tpu.matmul %1, %4, %cst {dimension_numbers = #tpu.dot_dimension_numbers<[1], [0], [0], [1], [0, 0, 1, 1], [], []>} : vector<64x768xbf16>, vector<768x128xbf16>, vector<64x128xf32> -> vector<64x128xf32>
    %6 = arith.truncf %5 : vector<64x128xf32> to vector<64x128xbf16>
    %c0_5 = arith.constant 0 : index
    %c0_6 = arith.constant 0 : index
    %7 = vector.load %arg5[%c0_5, %c0_6] : memref<64x128xbf16, #tpu.memory_space<vmem>>, vector<64x128xbf16>
    tpu.vector_store %arg5[%c0_5, %c0_6], %6 {strides = array<i32>} : memref<64x128xbf16, #tpu.memory_space<vmem>>, vector<64x128xbf16>,
    %c0_7 = arith.constant 0 : index
    %c0_8 = arith.constant 0 : index
    %8 = vector.load %arg4[%c0_7, %c0_8] : memref<768x256xbf16, #tpu.memory_space<vmem>>, vector<768x256xbf16>
    %cst_9 = arith.constant dense<0.000000e+00> : vector<64x256xf32>
    %9 = tpu.matmul %3, %8, %cst_9 {dimension_numbers = #tpu.dot_dimension_numbers<[1], [0], [0], [1], [0, 0, 1, 1], [], []>} : vector<64x768xbf16>, vector<768x256xbf16>, vector<64x256xf32> -> vector<64x256xf32>
    %10 = arith.truncf %9 : vector<64x256xf32> to vector<64x256xbf16>
    %c0_10 = arith.constant 0 : index
    %c0_11 = arith.constant 0 : index
    %11 = vector.load %arg6[%c0_10, %c0_11] : memref<64x256xbf16, #tpu.memory_space<vmem>>, vector<64x256xbf16>
    tpu.vector_store %arg6[%c0_10, %c0_11], %10 {strides = array<i32>} : memref<64x256xbf16, #tpu.memory_space<vmem>>, vector<64x256xbf16>,
    return
  }
  func.func @transform_0(%arg0: i32) -> (i32, i32) {
    %c0_i32 = arith.constant 0 : i32
    %c0_i32_0 = arith.constant 0 : i32
    return %arg0, %c0_i32 : i32, i32
  }
  func.func @transform_1(%arg0: i32) -> (i32, i32) {
    %c0_i32 = arith.constant 0 : i32
    %c0_i32_0 = arith.constant 0 : i32
    return %arg0, %c0_i32 : i32, i32
  }
  func.func @transform_2(%arg0: i32) -> (i32, i32) {
    %c0_i32 = arith.constant 0 : i32
    %c0_i32_0 = arith.constant 0 : i32
    %c0_i32_1 = arith.constant 0 : i32
    return %c0_i32, %c0_i32_0 : i32, i32
  }
  func.func @transform_3(%arg0: i32) -> (i32, i32) {
    %c0_i32 = arith.constant 0 : i32
    %c0_i32_0 = arith.constant 0 : i32
    %c0_i32_1 = arith.constant 0 : i32
    return %c0_i32, %c0_i32_0 : i32, i32
  }
  func.func @transform_4(%arg0: i32) -> (i32, i32) {
    %c0_i32 = arith.constant 0 : i32
    %c0_i32_0 = arith.constant 0 : i32
    return %arg0, %c0_i32 : i32, i32
  }
  func.func @transform_5(%arg0: i32) -> (i32, i32) {
    %c0_i32 = arith.constant 0 : i32
    %c0_i32_0 = arith.constant 0 : i32
    return %arg0, %c0_i32 : i32, i32
  }
}

module attributes {stable_mosaic.version = 11 : i64} {
  func.func @_out_proj_kernel(%arg0: i32, %arg1: memref<64x128xbf16, #tpu.memory_space<vmem>>, %arg2: memref<128x768xbf16, #tpu.memory_space<vmem>>, %arg3: memref<1x768xf32, #tpu.memory_space<vmem>>, %arg4: memref<64x768xf32, #tpu.memory_space<vmem>>) attributes {dimension_semantics = [#tpu.dimension_semantics<parallel>], iteration_bounds = array<i64: 2>, scalar_prefetch = 0 : i64, scratch_operands = 0 : i64, tpu.core_type = #tpu.core_type<tc>, window_params = [{transform_indices = @transform_0, window_bounds = array<i64: 64, 128>}, {pipeline_mode = #tpu.pipeline_mode<synchronous>, transform_indices = @transform_1, window_bounds = array<i64: 128, 768>}, {pipeline_mode = #tpu.pipeline_mode<synchronous>, transform_indices = @transform_2, window_bounds = array<i64: 1, 768>}, {transform_indices = @transform_3, window_bounds = array<i64: 64, 768>}]} {
    %c0 = arith.constant 0 : index
    %c0_0 = arith.constant 0 : index
    %0 = vector.load %arg1[%c0, %c0_0] : memref<64x128xbf16, #tpu.memory_space<vmem>>, vector<64x128xbf16>
    %c0_1 = arith.constant 0 : index
    %c0_2 = arith.constant 0 : index
    %1 = vector.load %arg2[%c0_1, %c0_2] : memref<128x768xbf16, #tpu.memory_space<vmem>>, vector<128x768xbf16>
    %cst = arith.constant dense<0.000000e+00> : vector<64x768xf32>
    %2 = tpu.matmul %0, %1, %cst {dimension_numbers = #tpu.dot_dimension_numbers<[1], [0], [0], [1], [0, 0, 1, 1], [], []>} : vector<64x128xbf16>, vector<128x768xbf16>, vector<64x768xf32> -> vector<64x768xf32>
    %c0_3 = arith.constant 0 : index
    %c0_4 = arith.constant 0 : index
    %3 = vector.load %arg3[%c0_3, %c0_4] : memref<1x768xf32, #tpu.memory_space<vmem>>, vector<1x768xf32>
    %4 = vector.broadcast %3 : vector<1x768xf32> to vector<64x768xf32>
    %5 = arith.addf %2, %4 : vector<64x768xf32>
    %c0_5 = arith.constant 0 : index
    %c0_6 = arith.constant 0 : index
    %6 = vector.load %arg4[%c0_5, %c0_6] : memref<64x768xf32, #tpu.memory_space<vmem>>, vector<64x768xf32>
    tpu.vector_store %arg4[%c0_5, %c0_6], %5 {strides = array<i32>} : memref<64x768xf32, #tpu.memory_space<vmem>>, vector<64x768xf32>,
    return
  }
  func.func @transform_0(%arg0: i32) -> (i32, i32) {
    %c0_i32 = arith.constant 0 : i32
    %c0_i32_0 = arith.constant 0 : i32
    return %arg0, %c0_i32 : i32, i32
  }
  func.func @transform_1(%arg0: i32) -> (i32, i32) {
    %c0_i32 = arith.constant 0 : i32
    %c0_i32_0 = arith.constant 0 : i32
    %c0_i32_1 = arith.constant 0 : i32
    return %c0_i32, %c0_i32_0 : i32, i32
  }
  func.func @transform_2(%arg0: i32) -> (i32, i32) {
    %c0_i32 = arith.constant 0 : i32
    %c0_i32_0 = arith.constant 0 : i32
    %c0_i32_1 = arith.constant 0 : i32
    return %c0_i32, %c0_i32_0 : i32, i32
  }
  func.func @transform_3(%arg0: i32) -> (i32, i32) {
    %c0_i32 = arith.constant 0 : i32
    %c0_i32_0 = arith.constant 0 : i32
    return %arg0, %c0_i32 : i32, i32
  }
}

module attributes {stable_mosaic.version = 11 : i64} {
  func.func @_grouped_attn_kernel(%arg0: i32, %arg1: i32, %arg2: memref<1x1x64x128xbf16, #tpu.memory_space<vmem>>, %arg3: memref<1x1x64x128xbf16, #tpu.memory_space<vmem>>, %arg4: memref<1x1x64x128xbf16, #tpu.memory_space<vmem>>, %arg5: memref<1x64x64xf32, #tpu.memory_space<vmem>>, %arg6: memref<1x1x64x128xbf16, #tpu.memory_space<vmem>>) attributes {dimension_semantics = [#tpu.dimension_semantics<parallel>, #tpu.dimension_semantics<parallel>], iteration_bounds = array<i64: 1, 2>, scalar_prefetch = 0 : i64, scratch_operands = 0 : i64, tpu.core_type = #tpu.core_type<tc>, window_params = [{transform_indices = @transform_0, window_bounds = array<i64: 1, 1, 64, 128>}, {transform_indices = @transform_1, window_bounds = array<i64: 1, 1, 64, 128>}, {transform_indices = @transform_2, window_bounds = array<i64: 1, 1, 64, 128>}, {transform_indices = @transform_3, window_bounds = array<i64: 1, 64, 64>}, {transform_indices = @transform_4, window_bounds = array<i64: 1, 1, 64, 128>}]} {
    %c0 = arith.constant 0 : index
    %c0_0 = arith.constant 0 : index
    %c0_1 = arith.constant 0 : index
    %c0_2 = arith.constant 0 : index
    %0 = vector.load %arg2[%c0, %c0_0, %c0_1, %c0_2] : memref<1x1x64x128xbf16, #tpu.memory_space<vmem>>, vector<1x1x64x128xbf16>
    %1 = vector.shape_cast %0 : vector<1x1x64x128xbf16> to vector<64x128xbf16>
    %c0_3 = arith.constant 0 : index
    %c0_4 = arith.constant 0 : index
    %c0_5 = arith.constant 0 : index
    %c0_6 = arith.constant 0 : index
    %2 = vector.load %arg3[%c0_3, %c0_4, %c0_5, %c0_6] : memref<1x1x64x128xbf16, #tpu.memory_space<vmem>>, vector<1x1x64x128xbf16>
    %3 = vector.shape_cast %2 : vector<1x1x64x128xbf16> to vector<64x128xbf16>
    %c0_7 = arith.constant 0 : index
    %c0_8 = arith.constant 0 : index
    %c0_9 = arith.constant 0 : index
    %c0_10 = arith.constant 0 : index
    %4 = vector.load %arg4[%c0_7, %c0_8, %c0_9, %c0_10] : memref<1x1x64x128xbf16, #tpu.memory_space<vmem>>, vector<1x1x64x128xbf16>
    %5 = vector.shape_cast %4 : vector<1x1x64x128xbf16> to vector<64x128xbf16>
    %c0_11 = arith.constant 0 : index
    %c0_12 = arith.constant 0 : index
    %c0_13 = arith.constant 0 : index
    %6 = vector.load %arg5[%c0_11, %c0_12, %c0_13] : memref<1x64x64xf32, #tpu.memory_space<vmem>>, vector<1x64x64xf32>
    %7 = vector.shape_cast %6 : vector<1x64x64xf32> to vector<64x64xf32>
    %8 = vector.extract_strided_slice %1 {offsets = [0, 0], sizes = [64, 32], strides = [1, 1]} : vector<64x128xbf16> to vector<64x32xbf16>
    %9 = vector.extract_strided_slice %3 {offsets = [0, 0], sizes = [64, 32], strides = [1, 1]} : vector<64x128xbf16> to vector<64x32xbf16>
    %10 = vector.extract_strided_slice %5 {offsets = [0, 0], sizes = [64, 32], strides = [1, 1]} : vector<64x128xbf16> to vector<64x32xbf16>
    %cst = arith.constant dense<0.000000e+00> : vector<64x64xf32>
    %11 = tpu.matmul %8, %9, %cst {dimension_numbers = #tpu.dot_dimension_numbers<[1], [1], [0], [0], [0, 0, 1, 0], [], []>} : vector<64x32xbf16>, vector<64x32xbf16>, vector<64x64xf32> -> vector<64x64xf32>
    %12 = arith.addf %11, %7 : vector<64x64xf32>
    %cst_14 = arith.constant dense<0xFF800000> : vector<64xf32>
    %13 = vector.multi_reduction <maximumf>, %12, %cst_14 [1] : vector<64x64xf32> to vector<64xf32>
    %14 = vector.shape_cast %13 : vector<64xf32> to vector<64x1xf32>
    %15 = vector.broadcast %14 : vector<64x1xf32> to vector<64x64xf32>
    %16 = arith.subf %12, %15 : vector<64x64xf32>
    %17 = math.exp %16 : vector<64x64xf32>
    %cst_15 = arith.constant dense<0.000000e+00> : vector<64xf32>
    %18 = vector.multi_reduction <add>, %17, %cst_15 [1] : vector<64x64xf32> to vector<64xf32>
    %19 = vector.shape_cast %18 : vector<64xf32> to vector<64x1xf32>
    %20 = tpu.reciprocal %19 {approx = true} : vector<64x1xf32> -> vector<64x1xf32>
    %21 = vector.broadcast %20 : vector<64x1xf32> to vector<64x64xf32>
    %22 = arith.mulf %17, %21 : vector<64x64xf32>
    %23 = arith.truncf %22 : vector<64x64xf32> to vector<64x64xbf16>
    %cst_16 = arith.constant dense<0.000000e+00> : vector<64x32xf32>
    %24 = tpu.matmul %23, %10, %cst_16 {dimension_numbers = #tpu.dot_dimension_numbers<[1], [0], [0], [1], [0, 0, 1, 1], [], []>} : vector<64x64xbf16>, vector<64x32xbf16>, vector<64x32xf32> -> vector<64x32xf32>
    %25 = vector.extract_strided_slice %1 {offsets = [0, 32], sizes = [64, 32], strides = [1, 1]} : vector<64x128xbf16> to vector<64x32xbf16>
    %26 = vector.extract_strided_slice %3 {offsets = [0, 32], sizes = [64, 32], strides = [1, 1]} : vector<64x128xbf16> to vector<64x32xbf16>
    %27 = vector.extract_strided_slice %5 {offsets = [0, 32], sizes = [64, 32], strides = [1, 1]} : vector<64x128xbf16> to vector<64x32xbf16>
    %cst_17 = arith.constant dense<0.000000e+00> : vector<64x64xf32>
    %28 = tpu.matmul %25, %26, %cst_17 {dimension_numbers = #tpu.dot_dimension_numbers<[1], [1], [0], [0], [0, 0, 1, 0], [], []>} : vector<64x32xbf16>, vector<64x32xbf16>, vector<64x64xf32> -> vector<64x64xf32>
    %29 = arith.addf %28, %7 : vector<64x64xf32>
    %cst_18 = arith.constant dense<0xFF800000> : vector<64xf32>
    %30 = vector.multi_reduction <maximumf>, %29, %cst_18 [1] : vector<64x64xf32> to vector<64xf32>
    %31 = vector.shape_cast %30 : vector<64xf32> to vector<64x1xf32>
    %32 = vector.broadcast %31 : vector<64x1xf32> to vector<64x64xf32>
    %33 = arith.subf %29, %32 : vector<64x64xf32>
    %34 = math.exp %33 : vector<64x64xf32>
    %cst_19 = arith.constant dense<0.000000e+00> : vector<64xf32>
    %35 = vector.multi_reduction <add>, %34, %cst_19 [1] : vector<64x64xf32> to vector<64xf32>
    %36 = vector.shape_cast %35 : vector<64xf32> to vector<64x1xf32>
    %37 = tpu.reciprocal %36 {approx = true} : vector<64x1xf32> -> vector<64x1xf32>
    %38 = vector.broadcast %37 : vector<64x1xf32> to vector<64x64xf32>
    %39 = arith.mulf %34, %38 : vector<64x64xf32>
    %40 = arith.truncf %39 : vector<64x64xf32> to vector<64x64xbf16>
    %cst_20 = arith.constant dense<0.000000e+00> : vector<64x32xf32>
    %41 = tpu.matmul %40, %27, %cst_20 {dimension_numbers = #tpu.dot_dimension_numbers<[1], [0], [0], [1], [0, 0, 1, 1], [], []>} : vector<64x64xbf16>, vector<64x32xbf16>, vector<64x32xf32> -> vector<64x32xf32>
    %42 = vector.extract_strided_slice %1 {offsets = [0, 64], sizes = [64, 32], strides = [1, 1]} : vector<64x128xbf16> to vector<64x32xbf16>
    %43 = vector.extract_strided_slice %3 {offsets = [0, 64], sizes = [64, 32], strides = [1, 1]} : vector<64x128xbf16> to vector<64x32xbf16>
    %44 = vector.extract_strided_slice %5 {offsets = [0, 64], sizes = [64, 32], strides = [1, 1]} : vector<64x128xbf16> to vector<64x32xbf16>
    %cst_21 = arith.constant dense<0.000000e+00> : vector<64x64xf32>
    %45 = tpu.matmul %42, %43, %cst_21 {dimension_numbers = #tpu.dot_dimension_numbers<[1], [1], [0], [0], [0, 0, 1, 0], [], []>} : vector<64x32xbf16>, vector<64x32xbf16>, vector<64x64xf32> -> vector<64x64xf32>
    %46 = arith.addf %45, %7 : vector<64x64xf32>
    %cst_22 = arith.constant dense<0xFF800000> : vector<64xf32>
    %47 = vector.multi_reduction <maximumf>, %46, %cst_22 [1] : vector<64x64xf32> to vector<64xf32>
    %48 = vector.shape_cast %47 : vector<64xf32> to vector<64x1xf32>
    %49 = vector.broadcast %48 : vector<64x1xf32> to vector<64x64xf32>
    %50 = arith.subf %46, %49 : vector<64x64xf32>
    %51 = math.exp %50 : vector<64x64xf32>
    %cst_23 = arith.constant dense<0.000000e+00> : vector<64xf32>
    %52 = vector.multi_reduction <add>, %51, %cst_23 [1] : vector<64x64xf32> to vector<64xf32>
    %53 = vector.shape_cast %52 : vector<64xf32> to vector<64x1xf32>
    %54 = tpu.reciprocal %53 {approx = true} : vector<64x1xf32> -> vector<64x1xf32>
    %55 = vector.broadcast %54 : vector<64x1xf32> to vector<64x64xf32>
    %56 = arith.mulf %51, %55 : vector<64x64xf32>
    %57 = arith.truncf %56 : vector<64x64xf32> to vector<64x64xbf16>
    %cst_24 = arith.constant dense<0.000000e+00> : vector<64x32xf32>
    %58 = tpu.matmul %57, %44, %cst_24 {dimension_numbers = #tpu.dot_dimension_numbers<[1], [0], [0], [1], [0, 0, 1, 1], [], []>} : vector<64x64xbf16>, vector<64x32xbf16>, vector<64x32xf32> -> vector<64x32xf32>
    %59 = vector.extract_strided_slice %1 {offsets = [0, 96], sizes = [64, 32], strides = [1, 1]} : vector<64x128xbf16> to vector<64x32xbf16>
    %60 = vector.extract_strided_slice %3 {offsets = [0, 96], sizes = [64, 32], strides = [1, 1]} : vector<64x128xbf16> to vector<64x32xbf16>
    %61 = vector.extract_strided_slice %5 {offsets = [0, 96], sizes = [64, 32], strides = [1, 1]} : vector<64x128xbf16> to vector<64x32xbf16>
    %cst_25 = arith.constant dense<0.000000e+00> : vector<64x64xf32>
    %62 = tpu.matmul %59, %60, %cst_25 {dimension_numbers = #tpu.dot_dimension_numbers<[1], [1], [0], [0], [0, 0, 1, 0], [], []>} : vector<64x32xbf16>, vector<64x32xbf16>, vector<64x64xf32> -> vector<64x64xf32>
    %63 = arith.addf %62, %7 : vector<64x64xf32>
    %cst_26 = arith.constant dense<0xFF800000> : vector<64xf32>
    %64 = vector.multi_reduction <maximumf>, %63, %cst_26 [1] : vector<64x64xf32> to vector<64xf32>
    %65 = vector.shape_cast %64 : vector<64xf32> to vector<64x1xf32>
    %66 = vector.broadcast %65 : vector<64x1xf32> to vector<64x64xf32>
    %67 = arith.subf %63, %66 : vector<64x64xf32>
    %68 = math.exp %67 : vector<64x64xf32>
    %cst_27 = arith.constant dense<0.000000e+00> : vector<64xf32>
    %69 = vector.multi_reduction <add>, %68, %cst_27 [1] : vector<64x64xf32> to vector<64xf32>
    %70 = vector.shape_cast %69 : vector<64xf32> to vector<64x1xf32>
    %71 = tpu.reciprocal %70 {approx = true} : vector<64x1xf32> -> vector<64x1xf32>
    %72 = vector.broadcast %71 : vector<64x1xf32> to vector<64x64xf32>
    %73 = arith.mulf %68, %72 : vector<64x64xf32>
    %74 = arith.truncf %73 : vector<64x64xf32> to vector<64x64xbf16>
    %cst_28 = arith.constant dense<0.000000e+00> : vector<64x32xf32>
    %75 = tpu.matmul %74, %61, %cst_28 {dimension_numbers = #tpu.dot_dimension_numbers<[1], [0], [0], [1], [0, 0, 1, 1], [], []>} : vector<64x64xbf16>, vector<64x32xbf16>, vector<64x32xf32> -> vector<64x32xf32>
    %76 = tpu.concatenate %24, %41, %58, %75 in 1 : vector<64x32xf32>, vector<64x32xf32>, vector<64x32xf32>, vector<64x32xf32> -> vector<64x128xf32>
    %77 = arith.truncf %76 : vector<64x128xf32> to vector<64x128xbf16>
    %c0_29 = arith.constant 0 : index
    %c0_30 = arith.constant 0 : index
    %c0_31 = arith.constant 0 : index
    %c0_32 = arith.constant 0 : index
    %78 = vector.load %arg6[%c0_29, %c0_30, %c0_31, %c0_32] : memref<1x1x64x128xbf16, #tpu.memory_space<vmem>>, vector<1x1x64x128xbf16>
    %79 = vector.shape_cast %78 : vector<1x1x64x128xbf16> to vector<64x128xbf16>
    %80 = vector.shape_cast %77 : vector<64x128xbf16> to vector<1x1x64x128xbf16>
    tpu.vector_store %arg6[%c0_29, %c0_30, %c0_31, %c0_32], %80 {strides = array<i32>} : memref<1x1x64x128xbf16, #tpu.memory_space<vmem>>, vector<1x1x64x128xbf16>,
    return
  }
  func.func @transform_0(%arg0: i32, %arg1: i32) -> (i32, i32, i32, i32) {
    %c0_i32 = arith.constant 0 : i32
    %c0_i32_0 = arith.constant 0 : i32
    %c0_i32_1 = arith.constant 0 : i32
    return %arg1, %arg0, %c0_i32, %c0_i32_0 : i32, i32, i32, i32
  }
  func.func @transform_1(%arg0: i32, %arg1: i32) -> (i32, i32, i32, i32) {
    %c0_i32 = arith.constant 0 : i32
    %c0_i32_0 = arith.constant 0 : i32
    %c0_i32_1 = arith.constant 0 : i32
    return %arg1, %arg0, %c0_i32, %c0_i32_0 : i32, i32, i32, i32
  }
  func.func @transform_2(%arg0: i32, %arg1: i32) -> (i32, i32, i32, i32) {
    %c0_i32 = arith.constant 0 : i32
    %c0_i32_0 = arith.constant 0 : i32
    %c0_i32_1 = arith.constant 0 : i32
    return %arg1, %arg0, %c0_i32, %c0_i32_0 : i32, i32, i32, i32
  }
  func.func @transform_3(%arg0: i32, %arg1: i32) -> (i32, i32, i32) {
    %c0_i32 = arith.constant 0 : i32
    %c0_i32_0 = arith.constant 0 : i32
    %c0_i32_1 = arith.constant 0 : i32
    return %arg0, %c0_i32, %c0_i32_0 : i32, i32, i32
  }
  func.func @transform_4(%arg0: i32, %arg1: i32) -> (i32, i32, i32, i32) {
    %c0_i32 = arith.constant 0 : i32
    %c0_i32_0 = arith.constant 0 : i32
    %c0_i32_1 = arith.constant 0 : i32
    return %arg1, %arg0, %c0_i32, %c0_i32_0 : i32, i32, i32, i32
  }
}

</mosaic_0001>

<bundles_post_ra>
// kernel: window_attention4_forward.5
= control target key start
LH: loop header
LB: loop body
LE: loop exit
PB: predicated region body
PF: predicated region fallthrough
CT: control target
= control target key end

     0   :  { %s1048_s12 = smov 0   ;;  %s1345_s0 = inlined_call_operand.vmem [shape: bf16[128,128], index: 0, kind: input, shape index: {}]   ;;  %s1346_s1 = inlined_call_operand.vmem [shape: bf16[128,768], index: 1, kind: input, shape index: {}]   ;;  %s1347_s2 = inlined_call_operand.vmem [shape: f32[1,768], index: 2, kind: input, shape index: {}]   ;;  %s1348_s3 = inlined_call_operand.vmem [shape: f32[128,768], index: 3, kind: output, shape index: {}]  }
   0x1 LB: > { %s854_s13 = sadd.s32 4294967295, %s1025_s12   ;;  %p858_p0 = scmp.ge.s32.totalorder %s1025_s12, 1  ;;  %s1025_s12 = sphi %s1048_s12, %s13_s12  }
   0x2   : > { %p138_p1 = scmp.lt.s32.totalorder %s1025_s12, 3 }
   0x4   : > { %p139_p2 = pnand %p858_p0, %p138_p1 }
   0x5   : > { %v943_v0 = vld [vmem:[%s1346_s1 + $0x4] ss:$24 sps:$4 sm:$0xff] (!%p139_p2)   ;;  %v1027_v2 = vmov (!%p139_p2), 0   ;;  %v947_v3 = vld [vmem:[%s1346_s1] ss:$24 sps:$4 sm:$0xff] (!%p139_p2)   ;;  %s859_s5 = sshll.u32 (!%p139_p2), %s854_s13, 3  ;;  %v235_v53 = vlaneseq (!%p139_p2) }
   0x6   : > { %142 = sbr.rel (%p139_p2) target bundleno = 297 (0x129), region = 32  ;;  %v945_v1 = vld [vmem:[%s1346_s1 + $0xc] ss:$24 sps:$4 sm:$0xff] (!%p139_p2)   ;;  %561 = vmatprep.mubr.bf16.mxu0 (!%p139_p2), %v1027_v2  ;;  %634 = vmatprep.mubr.bf16.mxu1 (!%p139_p2), %v1027_v2  ;;  %v948_v4 = vld [vmem:[%s1346_s1 + $0x8] ss:$24 sps:$4 sm:$0xff] (!%p139_p2)   ;;  %p164_p3 = scmp.lt.s32.totalorder (!%p139_p2), %s859_s5, 15 }
   0x7   : > { %529 = vmatprep.subr.bf16.mxu0 (!%p139_p2), %v943_v0  ;;  %602 = vmatprep.subr.bf16.mxu1 (!%p139_p2), %v945_v1  ;;  %v949_v5 = vld [vmem:[%s1346_s1 + $0x34] ss:$24 sps:$4 sm:$0xff] (!%p139_p2)   ;;  %v953_v7 = vld [vmem:[%s1346_s1 + $0x30] ss:$24 sps:$4 sm:$0xff] (!%p139_p2)   ;;  %v955_v9 = vld [vmem:[%s1346_s1 + $0x64] ss:$24 sps:$4 sm:$0xff] (!%p139_p2)  }
   0x8   : > { %530 = vmatpush1.bf16.msra.mxu0 (!%p139_p2), %v947_v3  ;;  %603 = vmatpush1.bf16.msra.mxu1 (!%p139_p2), %v948_v4  ;;  %v951_v6 = vld [vmem:[%s1346_s1 + $0x3c] ss:$24 sps:$4 sm:$0xff] (!%p139_p2)   ;;  %v954_v8 = vld [vmem:[%s1346_s1 + $0x38] ss:$24 sps:$4 sm:$0xff] (!%p139_p2)   ;;  %v957_v10 = vld [vmem:[%s1346_s1 + $0x6c] ss:$24 sps:$4 sm:$0xff] (!%p139_p2)  }
   0x9   : > { %531 = vmatprep.subr.bf16.mxu0 (!%p139_p2), %v949_v5  ;;  %604 = vmatprep.subr.bf16.mxu1 (!%p139_p2), %v951_v6  ;;  %v959_v11 = vld [vmem:[%s1346_s1 + $0x60] ss:$24 sps:$4 sm:$0xff] (!%p139_p2)   ;;  %v961_v13 = vld [vmem:[%s1346_s1 + $0x94] ss:$24 sps:$4 sm:$0xff] (!%p139_p2)   ;;  %v965_v15 = vld [vmem:[%s1346_s1 + $0x90] ss:$24 sps:$4 sm:$0xff] (!%p139_p2)  }
   0xa   : > { %v960_v12 = vld [vmem:[%s1346_s1 + $0x68] ss:$24 sps:$4 sm:$0xff] (!%p139_p2)   ;;  %v963_v14 = vld [vmem:[%s1346_s1 + $0x9c] ss:$24 sps:$4 sm:$0xff] (!%p139_p2)   ;;  %v966_v16 = vld [vmem:[%s1346_s1 + $0x98] ss:$24 sps:$4 sm:$0xff] (!%p139_p2)  }
   0xb   : > { %v967_v17 = vld [vmem:[%s1346_s1 + $0xc4] ss:$24 sps:$4 sm:$0xff] (!%p139_p2)   ;;  %v971_v19 = vld [vmem:[%s1346_s1 + $0xc0] ss:$24 sps:$4 sm:$0xff] (!%p139_p2)   ;;  %v973_v21 = vld [vmem:[%s1346_s1 + $0xf4] ss:$24 sps:$4 sm:$0xff] (!%p139_p2)  }
   0xc   : > { %532 = vmatpush1.bf16.msra.mxu0 (!%p139_p2), %v953_v7  ;;  %605 = vmatpush1.bf16.msra.mxu1 (!%p139_p2), %v954_v8  ;;  %v969_v18 = vld [vmem:[%s1346_s1 + $0xcc] ss:$24 sps:$4 sm:$0xff] (!%p139_p2)   ;;  %v972_v20 = vld [vmem:[%s1346_s1 + $0xc8] ss:$24 sps:$4 sm:$0xff] (!%p139_p2)   ;;  %v975_v22 = vld [vmem:[%s1346_s1 + $0xfc] ss:$24 sps:$4 sm:$0xff] (!%p139_p2)  }
   0xd   : > { %533 = vmatprep.subr.bf16.mxu0 %v955_v9  ;;  %606 = vmatprep.subr.bf16.mxu1 %v957_v10  ;;  %s1350_s5 = smov (!%p164_p3, %s859_s5), 15  ;;  %v977_v23 = vld [vmem:[%s1346_s1 + $0xf0] ss:$24 sps:$4 sm:$0xff]   ;;  %v979_v25 = vld [vmem:[%s1346_s1 + $0x124] ss:$24 sps:$4 sm:$0xff]   ;;  %v1229_v54 = vshrl.u32 %v235_v53, 7 }
   0xe   : > { %s860_s7 = sshll.u32 %s1350_s5, 2  ;;  %v978_v24 = vld [vmem:[%s1346_s1 + $0xf8] ss:$24 sps:$4 sm:$0xff]   ;;  %v981_v26 = vld [vmem:[%s1346_s1 + $0x12c] ss:$24 sps:$4 sm:$0xff]   ;;  %s933_s16 = smul.u32 48, %s1350_s5 }
   0xf   : > { %s1139_s17 = scalar_lea.vmem %s1345_s0, %s860_s7  ;;  %v983_v27 = vld [vmem:[%s1346_s1 + $0x120] ss:$24 sps:$4 sm:$0xff]   ;;  %v985_v29 = vld [vmem:[%s1346_s1 + $0x154] ss:$24 sps:$4 sm:$0xff]   ;;  %v989_v31 = vld [vmem:[%s1346_s1 + $0x150] ss:$24 sps:$4 sm:$0xff]  }
  0x10   : > { %534 = vmatpush1.bf16.msra.mxu0 %v959_v11  ;;  %607 = vmatpush1.bf16.msra.mxu1 %v960_v12  ;;  %v984_v28 = vld [vmem:[%s1346_s1 + $0x128] ss:$24 sps:$4 sm:$0xff]   ;;  %v987_v30 = vld [vmem:[%s1346_s1 + $0x15c] ss:$24 sps:$4 sm:$0xff]   ;;  %v990_v32 = vld [vmem:[%s1346_s1 + $0x158] ss:$24 sps:$4 sm:$0xff]   ;;  %s1256_s20 = scalar_lea.vmem %s1348_s3, %s933_s16 }
  0x11   : > { %535 = vmatprep.subr.bf16.mxu0 %v961_v13  ;;  %608 = vmatprep.subr.bf16.mxu1 %v963_v14  ;;  %v994_v33 = vld [vmem:[%s1346_s1 + $0x14] ss:$24 sps:$4 sm:$0xff]   ;;  %v1166_v34 = vld [vmem:[%s1139_s17] sm:$0xff]   ;;  %v992_v35 = vld [vmem:[%s1346_s1 + $0x10] ss:$24 sps:$4 sm:$0xff]   ;;  %v237_v55 = vsub.s32 0, %v1229_v54 }
  0x12   : > { %v997_v36 = vld [vmem:[%s1346_s1 + $0x44] ss:$24 sps:$4 sm:$0xff]   ;;  %v995_v37 = vld [vmem:[%s1346_s1 + $0x40] ss:$24 sps:$4 sm:$0xff]   ;;  %v1001_v38 = vld [vmem:[%s1346_s1 + $0x74] ss:$24 sps:$4 sm:$0xff]  }
  0x13   : > { %v998_v39 = vld [vmem:[%s1139_s17 + $0x8] sm:$0xff]   ;;  %v1004_v41 = vld [vmem:[%s1346_s1 + $0xa4] ss:$24 sps:$4 sm:$0xff]   ;;  %v1002_v42 = vld [vmem:[%s1346_s1 + $0xa0] ss:$24 sps:$4 sm:$0xff]   ;;  %v245_v56 = vsub.s32 2, %v1229_v54 }
  0x14   : > { %536 = vmatpush1.bf16.msra.mxu0 %v965_v15  ;;  %609 = vmatpush1.bf16.msra.mxu1 %v966_v16  ;;  %v999_v40 = vld [vmem:[%s1346_s1 + $0x70] ss:$24 sps:$4 sm:$0xff]   ;;  %v1008_v43 = vld [vmem:[%s1346_s1 + $0xd4] ss:$24 sps:$4 sm:$0xff]   ;;  %v1011_v46 = vld [vmem:[%s1346_s1 + $0x104] ss:$24 sps:$4 sm:$0xff]  }
  0x15   : > { %537 = vmatprep.subr.bf16.mxu0 %v967_v17  ;;  %610 = vmatprep.subr.bf16.mxu1 %v969_v18  ;;  %v1005_v44 = vld [vmem:[%s1139_s17 + $0x10] sm:$0xff]   ;;  %v1009_v47 = vld [vmem:[%s1346_s1 + $0x100] ss:$24 sps:$4 sm:$0xff]   ;;  %v1018_v51 = vld [vmem:[%s1346_s1 + $0x164] ss:$24 sps:$4 sm:$0xff]   ;;  %v241_v58 = vsub.s32 1, %v1229_v54 }
  0x16   : > { %v1006_v45 = vld [vmem:[%s1346_s1 + $0xd0] ss:$24 sps:$4 sm:$0xff]   ;;  %v1015_v48 = vld [vmem:[%s1346_s1 + $0x134] ss:$24 sps:$4 sm:$0xff]   ;;  %v1012_v49 = vld [vmem:[%s1139_s17 + $0x18] sm:$0xff]   ;;  %v249_v59 = vsub.s32 3, %v1229_v54 }
  0x17   : > { %v1013_v50 = vld [vmem:[%s1346_s1 + $0x130] ss:$24 sps:$4 sm:$0xff]   ;;  %v1016_v52 = vld [vmem:[%s1346_s1 + $0x160] ss:$24 sps:$4 sm:$0xff]  }
  0x18   : > { %538 = vmatpush1.bf16.msra.mxu0 %v971_v19  ;;  %611 = vmatpush1.bf16.msra.mxu1 %v972_v20  ;;  %v1236_v57 = vld [vmem:[%s1347_s2] sm:$0x3f] }
  0x19   : > { %539 = vmatprep.subr.bf16.mxu0 %v973_v21  ;;  %612 = vmatprep.subr.bf16.mxu1 %v975_v22  ;;  %v1242_v60 = vrot.slane %v1236_v57, %v237_v55  ;;  %v1245_v61 = vrot.slane %v1236_v57, %v245_v56  ;;  %v1248_v62 = vrot.slane %v1236_v57, %v241_v58  ;;  %v253_v55 = vsub.s32 4, %v1229_v54 }
  0x1a   : > { %v1251_v63 = vrot.slane %v1236_v57, %v249_v59 }
  0x1c   : > { %540 = vmatpush1.bf16.msra.mxu0 %v977_v23  ;;  %613 = vmatpush1.bf16.msra.mxu1 %v978_v24 }
  0x1d   : > { %541 = vmatprep.subr.bf16.mxu0 %v979_v25  ;;  %614 = vmatprep.subr.bf16.mxu1 %v981_v26 }
  0x20   : > { %542 = vmatpush1.bf16.msra.mxu0 %v983_v27  ;;  %615 = vmatpush1.bf16.msra.mxu1 %v984_v28 }
  0x21   : > { %543 = vmatprep.subr.bf16.mxu0 %v985_v29  ;;  %616 = vmatprep.subr.bf16.mxu1 %v987_v30 }
  0x24   : > { %544 = vmatpush1.bf16.msra.mxu0 %v989_v31  ;;  %617 = vmatpush1.bf16.msra.mxu1 %v990_v32 }
  0x25   : > { %675 = vmatprep.subr.bf16.mxu0 %v994_v33  ;;  %917 = vmatprep.subr.bf16.mxu1 %v994_v33 }
  0x27   : > { %562 = vmatmul.mubr.bf16.vlgmr.msra.gmra.mrb[0].mxu0 %v1166_v34  ;;  %635 = vmatmul.mubr.bf16.vlgmr.msra.gmra.mrb[0].mxu1 %v1166_v34 }
  0x28   : > { %676 = vmatpush1.bf16.msra.mxu0 %v992_v35  ;;  %925 = vmatpush1.bf16.msra.mxu1 %v992_v35 }
  0x29   : > { %677 = vmatprep.subr.bf16.mxu0 %v997_v36  ;;  %918 = vmatprep.subr.bf16.mxu1 %v997_v36 }
  0x2a   : > { %571 = vmatprep.mubr.bf16.mxu0 %v1027_v2  ;;  %644 = vmatprep.mubr.bf16.mxu1 %v1027_v2 }
  0x2c   : > { %678 = vmatpush1.bf16.msra.mxu0 %v995_v37  ;;  %926 = vmatpush1.bf16.msra.mxu1 %v995_v37 }
  0x2d   : > { %679 = vmatprep.subr.bf16.mxu0 %v1001_v38  ;;  %919 = vmatprep.subr.bf16.mxu1 %v1001_v38 }
  0x2f   : > { %572 = vmatmul.mubr.bf16.gmra.mrb[4].mxu0 %v998_v39  ;;  %645 = vmatmul.mubr.bf16.gmra.mrb[4].mxu1 %v998_v39 }
  0x30   : > { %680 = vmatpush1.bf16.msra.mxu0 %v999_v40  ;;  %927 = vmatpush1.bf16.msra.mxu1 %v999_v40 }
  0x31   : > { %681 = vmatprep.subr.bf16.mxu0 %v1004_v41  ;;  %920 = vmatprep.subr.bf16.mxu1 %v1004_v41 }
  0x32   : > { %581 = vmatprep.mubr.bf16.mxu0 %v1027_v2  ;;  %654 = vmatprep.mubr.bf16.mxu1 %v1027_v2 }
  0x34   : > { %682 = vmatpush1.bf16.msra.mxu0 %v1002_v42  ;;  %928 = vmatpush1.bf16.msra.mxu1 %v1002_v42 }
  0x35   : > { %683 = vmatprep.subr.bf16.mxu0 %v1008_v43  ;;  %921 = vmatprep.subr.bf16.mxu1 %v1008_v43 }
  0x37   : > { %582 = vmatmul.mubr.bf16.gmra.mrb[8].mxu0 %v1005_v44  ;;  %655 = vmatmul.mubr.bf16.gmra.mrb[8].mxu1 %v1005_v44 }
  0x38   : > { %684 = vmatpush1.bf16.msra.mxu0 %v1006_v45  ;;  %929 = vmatpush1.bf16.msra.mxu1 %v1006_v45 }
  0x39   : > { %685 = vmatprep.subr.bf16.mxu0 %v1011_v46  ;;  %922 = vmatprep.subr.bf16.mxu1 %v1011_v46 }
  0x3a   : > { %591 = vmatprep.mubr.bf16.mxu0 %v1027_v2  ;;  %664 = vmatprep.mubr.bf16.mxu1 %v1027_v2 }
  0x3c   : > { %686 = vmatpush1.bf16.msra.mxu0 %v1009_v47  ;;  %930 = vmatpush1.bf16.msra.mxu1 %v1009_v47 }
  0x3d   : > { %687 = vmatprep.subr.bf16.mxu0 %v1015_v48  ;;  %923 = vmatprep.subr.bf16.mxu1 %v1015_v48 }
  0x3f   : > { %592 = vmatmul.mubr.bf16.gmra.mrb[12].mxu0 %v1012_v49  ;;  %665 = vmatmul.mubr.bf16.gmra.mrb[12].mxu1 %v1012_v49 }
  0x40   : > { %688 = vmatpush1.bf16.msra.mxu0 %v1013_v50  ;;  %931 = vmatpush1.bf16.msra.mxu1 %v1013_v50 }
  0x41   : > { %689 = vmatprep.subr.bf16.mxu0 %v1018_v51  ;;  %924 = vmatprep.subr.bf16.mxu1 %v1018_v51 }
  0x42   : > { %707 = vmatprep.mubr.bf16.mxu0 %v1027_v2  ;;  %727 = vmatprep.mubr.bf16.mxu1 %v1027_v2 }
  0x44   : > { %690 = vmatpush1.bf16.msra.mxu0 %v1016_v52  ;;  %932 = vmatpush1.bf16.msra.mxu1 %v1016_v52 }
  0x47   : > { %708 = vmatmul.mubr.bf16.vlgmr.msra.gmra.mrb[16].mxu0 %v1166_v34  ;;  %728 = vmatmul.mubr.bf16.vlgmr.msra.gmra.mrb[16].mxu1 %v1005_v44 }
  0x48   : > { %717 = vmatprep.mubr.bf16.mxu0 %v1027_v2  ;;  %737 = vmatprep.mubr.bf16.mxu1 %v1027_v2 }
  0x4f   : > { %718 = vmatmul.mubr.bf16.gmra.mrb[20].mxu0 %v998_v39  ;;  %738 = vmatmul.mubr.bf16.gmra.mrb[20].mxu1 %v1012_v49 }
  0xfa   : > { %v563_v0 = vpop.f32.mrb[0].mxu0  ;;  %v636_v1 = vpop.f32.mrb[0].mxu1 }
  0xfb   : > { %v564_v2 = vadd.f32 %v563_v0, %v1242_v60  ;;  %v637_v3 = vadd.f32 %v636_v1, %v1245_v61  ;;  %v565_v4 = vpop.f32.mrb[1].mxu0  ;;  %v638_v5 = vpop.f32.mrb[1].mxu1  ;;  %v257_v1 = vsub.s32 5, %v1229_v54  ;;  %v254_v54 = vrot.slane %v1236_v57, %v253_v55 }
  0xfc   : > { %v566_v6 = vadd.f32 %v565_v4, %v1248_v62  ;;  %v639_v7 = vadd.f32 %v638_v5, %v1251_v63  ;;  %v567_v8 = vpop.f32.mrb[2].mxu0  ;;  %v640_v9 = vpop.f32.mrb[2].mxu1 }
  0xfd   : > { %748 = vst [vmem:[%s1256_s20] sm:$0xff] %v564_v2  ;;  %750 = vst [vmem:[%s1256_s20 + $0x10] sm:$0xff] %v637_v3  ;;  %v568_v10 = vadd.f32 %v567_v8, %v1242_v60  ;;  %v641_v11 = vadd.f32 %v640_v9, %v1245_v61  ;;  %v569_v12 = vpop.f32.mrb[3].mxu0  ;;  %v642_v13 = vpop.f32.mrb[3].mxu1 }
  0xfe   : > { %749 = vst [vmem:[%s1256_s20 + $0x8] sm:$0xff] %v566_v6  ;;  %751 = vst [vmem:[%s1256_s20 + $0x18] sm:$0xff] %v639_v7  ;;  %v570_v14 = vadd.f32 %v569_v12, %v1248_v62  ;;  %v643_v15 = vadd.f32 %v642_v13, %v1251_v63 }
  0xff   : > { %754 = vst [vmem:[%s1256_s20 + $0x30] sm:$0xff] %v568_v10  ;;  %756 = vst [vmem:[%s1256_s20 + $0x40] sm:$0xff] %v641_v11 }
 0x100   : > { %755 = vst [vmem:[%s1256_s20 + $0x38] sm:$0xff] %v570_v14  ;;  %757 = vst [vmem:[%s1256_s20 + $0x48] sm:$0xff] %v643_v15 }
 0x102   : > { %v573_v16 = vpop.f32.mrb[4].mxu0  ;;  %v646_v17 = vpop.f32.mrb[4].mxu1 }
 0x103   : > { %v574_v18 = vadd.f32 %v573_v16, %v1242_v60  ;;  %v647_v19 = vadd.f32 %v646_v17, %v1245_v61  ;;  %v575_v20 = vpop.f32.mrb[5].mxu0  ;;  %v648_v21 = vpop.f32.mrb[5].mxu1 }
 0x104   : > { %v576_v22 = vadd.f32 %v575_v20, %v1248_v62  ;;  %v649_v23 = vadd.f32 %v648_v21, %v1251_v63  ;;  %v577_v24 = vpop.f32.mrb[6].mxu0  ;;  %v650_v25 = vpop.f32.mrb[6].mxu1 }
 0x105   : > { %760 = vst [vmem:[%s1256_s20 + $0x60] sm:$0xff] %v574_v18  ;;  %762 = vst [vmem:[%s1256_s20 + $0x70] sm:$0xff] %v647_v19  ;;  %v578_v26 = vadd.f32 %v577_v24, %v1242_v60  ;;  %v651_v27 = vadd.f32 %v650_v25, %v1245_v61  ;;  %v579_v28 = vpop.f32.mrb[7].mxu0  ;;  %v652_v29 = vpop.f32.mrb[7].mxu1 }
 0x106   : > { %761 = vst [vmem:[%s1256_s20 + $0x68] sm:$0xff] %v576_v22  ;;  %763 = vst [vmem:[%s1256_s20 + $0x78] sm:$0xff] %v649_v23  ;;  %v580_v30 = vadd.f32 %v579_v28, %v1248_v62  ;;  %v653_v31 = vadd.f32 %v652_v29, %v1251_v63 }
 0x107   : > { %766 = vst [vmem:[%s1256_s20 + $0x90] sm:$0xff] %v578_v26  ;;  %768 = vst [vmem:[%s1256_s20 + $0xa0] sm:$0xff] %v651_v27 }
 0x108   : > { %767 = vst [vmem:[%s1256_s20 + $0x98] sm:$0xff] %v580_v30  ;;  %769 = vst [vmem:[%s1256_s20 + $0xa8] sm:$0xff] %v653_v31 }
 0x10a   : > { %v583_v32 = vpop.f32.mrb[8].mxu0  ;;  %v656_v33 = vpop.f32.mrb[8].mxu1 }
 0x10b   : > { %v584_v34 = vadd.f32 %v583_v32, %v1242_v60  ;;  %v657_v35 = vadd.f32 %v656_v33, %v1245_v61  ;;  %v585_v36 = vpop.f32.mrb[9].mxu0  ;;  %v658_v37 = vpop.f32.mrb[9].mxu1 }
 0x10c   : > { %v586_v38 = vadd.f32 %v585_v36, %v1248_v62  ;;  %v659_v39 = vadd.f32 %v658_v37, %v1251_v63  ;;  %v587_v40 = vpop.f32.mrb[10].mxu0  ;;  %v660_v41 = vpop.f32.mrb[10].mxu1 }
 0x10d   : > { %772 = vst [vmem:[%s1256_s20 + $0xc0] sm:$0xff] %v584_v34  ;;  %774 = vst [vmem:[%s1256_s20 + $0xd0] sm:$0xff] %v657_v35  ;;  %v588_v42 = vadd.f32 %v587_v40, %v1242_v60  ;;  %v661_v43 = vadd.f32 %v660_v41, %v1245_v61  ;;  %v589_v44 = vpop.f32.mrb[11].mxu0  ;;  %v662_v45 = vpop.f32.mrb[11].mxu1 }
 0x10e   : > { %773 = vst [vmem:[%s1256_s20 + $0xc8] sm:$0xff] %v586_v38  ;;  %775 = vst [vmem:[%s1256_s20 + $0xd8] sm:$0xff] %v659_v39  ;;  %v590_v46 = vadd.f32 %v589_v44, %v1248_v62  ;;  %v663_v47 = vadd.f32 %v662_v45, %v1251_v63 }
 0x10f   : > { %778 = vst [vmem:[%s1256_s20 + $0xf0] sm:$0xff] %v588_v42  ;;  %780 = vst [vmem:[%s1256_s20 + $0x100] sm:$0xff] %v661_v43 }
 0x110   : > { %779 = vst [vmem:[%s1256_s20 + $0xf8] sm:$0xff] %v590_v46  ;;  %781 = vst [vmem:[%s1256_s20 + $0x108] sm:$0xff] %v663_v47 }
 0x112   : > { %v593_v48 = vpop.f32.mrb[12].mxu0  ;;  %v666_v49 = vpop.f32.mrb[12].mxu1 }
 0x113   : > { %v594_v50 = vadd.f32 %v593_v48, %v1242_v60  ;;  %v667_v51 = vadd.f32 %v666_v49, %v1245_v61  ;;  %v595_v52 = vpop.f32.mrb[13].mxu0  ;;  %v668_v53 = vpop.f32.mrb[13].mxu1 }
 0x114   : > { %v596_v56 = vadd.f32 %v595_v52, %v1248_v62  ;;  %v669_v58 = vadd.f32 %v668_v53, %v1251_v63  ;;  %v597_v59 = vpop.f32.mrb[14].mxu0  ;;  %v670_v0 = vpop.f32.mrb[14].mxu1 }
 0x115   : > { %784 = vst [vmem:[%s1256_s20 + $0x120] sm:$0xff] %v594_v50  ;;  %786 = vst [vmem:[%s1256_s20 + $0x130] sm:$0xff] %v667_v51  ;;  %v598_v2 = vadd.f32 %v597_v59, %v1242_v60  ;;  %v671_v3 = vadd.f32 %v670_v0, %v1245_v61  ;;  %v599_v4 = vpop.f32.mrb[15].mxu0  ;;  %v672_v5 = vpop.f32.mrb[15].mxu1  ;;  %v258_v60 = vrot.slane %v1236_v57, %v257_v1 }
 0x116   : > { %785 = vst [vmem:[%s1256_s20 + $0x128] sm:$0xff] %v596_v56  ;;  %787 = vst [vmem:[%s1256_s20 + $0x138] sm:$0xff] %v669_v58  ;;  %v600_v6 = vadd.f32 %v599_v4, %v1248_v62  ;;  %v673_v7 = vadd.f32 %v672_v5, %v1251_v63 }
 0x117   : > { %790 = vst [vmem:[%s1256_s20 + $0x150] sm:$0xff] %v598_v2  ;;  %792 = vst [vmem:[%s1256_s20 + $0x160] sm:$0xff] %v671_v3 }
 0x118   : > { %791 = vst [vmem:[%s1256_s20 + $0x158] sm:$0xff] %v600_v6  ;;  %793 = vst [vmem:[%s1256_s20 + $0x168] sm:$0xff] %v673_v7 }
 0x11a   : > { %v709_v8 = vpop.f32.mrb[16].mxu0  ;;  %v729_v61 = vpop.f32.mrb[16].mxu1 }
 0x11b   : > { %v710_v9 = vadd.f32 %v709_v8, %v254_v54  ;;  %v730_v10 = vadd.f32 %v729_v61, %v254_v54  ;;  %v711_v11 = vpop.f32.mrb[17].mxu0  ;;  %v731_v62 = vpop.f32.mrb[17].mxu1 }
 0x11c   : > { %v712_v63 = vadd.f32 %v711_v11, %v258_v60  ;;  %v732_v12 = vadd.f32 %v731_v62, %v258_v60  ;;  %v713_v13 = vpop.f32.mrb[18].mxu0  ;;  %v733_v14 = vpop.f32.mrb[18].mxu1 }
 0x11d   : > { %752 = vst [vmem:[%s1256_s20 + $0x20] sm:$0xff] %v710_v9  ;;  %776 = vst [vmem:[%s1256_s20 + $0xe0] sm:$0xff] %v730_v10  ;;  %v714_v15 = vadd.f32 %v713_v13, %v254_v54  ;;  %v734_v57 = vadd.f32 %v733_v14, %v254_v54  ;;  %v715_v16 = vpop.f32.mrb[19].mxu0  ;;  %v735_v17 = vpop.f32.mrb[19].mxu1 }
 0x11e   : > { %753 = vst [vmem:[%s1256_s20 + $0x28] sm:$0xff] %v712_v63  ;;  %777 = vst [vmem:[%s1256_s20 + $0xe8] sm:$0xff] %v732_v12  ;;  %v716_v18 = vadd.f32 %v715_v16, %v258_v60  ;;  %v736_v19 = vadd.f32 %v735_v17, %v258_v60 }
 0x11f   : > { %758 = vst [vmem:[%s1256_s20 + $0x50] sm:$0xff] %v714_v15  ;;  %782 = vst [vmem:[%s1256_s20 + $0x110] sm:$0xff] %v734_v57 }
 0x120   : > { %759 = vst [vmem:[%s1256_s20 + $0x58] sm:$0xff] %v716_v18  ;;  %783 = vst [vmem:[%s1256_s20 + $0x118] sm:$0xff] %v736_v19 }
 0x122   : > { %v719_v20 = vpop.f32.mrb[20].mxu0  ;;  %v739_v21 = vpop.f32.mrb[20].mxu1 }
 0x123   : > { %v720_v22 = vadd.f32 %v719_v20, %v254_v54  ;;  %v740_v23 = vadd.f32 %v739_v21, %v254_v54  ;;  %v721_v24 = vpop.f32.mrb[21].mxu0  ;;  %v741_v25 = vpop.f32.mrb[21].mxu1 }
 0x124   : > { %v722_v26 = vadd.f32 %v721_v24, %v258_v60  ;;  %v742_v27 = vadd.f32 %v741_v25, %v258_v60  ;;  %v723_v28 = vpop.f32.mrb[22].mxu0  ;;  %v743_v29 = vpop.f32.mrb[22].mxu1 }
 0x125   : > { %764 = vst [vmem:[%s1256_s20 + $0x80] sm:$0xff] %v720_v22  ;;  %788 = vst [vmem:[%s1256_s20 + $0x140] sm:$0xff] %v740_v23  ;;  %v724_v30 = vadd.f32 %v723_v28, %v254_v54  ;;  %v744_v31 = vadd.f32 %v743_v29, %v254_v54  ;;  %v725_v32 = vpop.f32.mrb[23].mxu0  ;;  %v745_v33 = vpop.f32.mrb[23].mxu1 }
 0x126   : > { %765 = vst [vmem:[%s1256_s20 + $0x88] sm:$0xff] %v722_v26  ;;  %789 = vst [vmem:[%s1256_s20 + $0x148] sm:$0xff] %v742_v27  ;;  %v726_v34 = vadd.f32 %v725_v32, %v258_v60  ;;  %v746_v35 = vadd.f32 %v745_v33, %v258_v60 }
 0x127   : > { %770 = vst [vmem:[%s1256_s20 + $0xb0] sm:$0xff] %v724_v30  ;;  %794 = vst [vmem:[%s1256_s20 + $0x170] sm:$0xff] %v744_v31 }
 0x128   : > { %771 = vst [vmem:[%s1256_s20 + $0xb8] sm:$0xff] %v726_v34  ;;  %795 = vst [vmem:[%s1256_s20 + $0x178] sm:$0xff] %v746_v35 }
 0x129 PF: > { %s13_s12 = sadd.s32 1, %s1025_s12  }
 0x12a   : > { %p10_p4 = scmp.ge.s32.totalorder %s13_s12, 4  }
 0x12c   :  { %12 = sbr.rel (!%p10_p4) target bundleno = 1 (0x1), region = 62 }

// kernel: window_attention4_forward.4
= control target key start
LH: loop header
LB: loop body
LE: loop exit
PB: predicated region body
PF: predicated region fallthrough
CT: control target
= control target key end

     0   :  { %s2453_s15 = smov 0   ;;  %s2455_s16 = smov 0   ;;  %s3090_s0 = inlined_call_operand.vmem [shape: bf16[2,1,64,128], index: 0, kind: input, shape index: {}]   ;;  %s3091_s1 = inlined_call_operand.vmem [shape: bf16[2,1,64,128], index: 1, kind: input, shape index: {}]   ;;  %s3092_s2 = inlined_call_operand.vmem [shape: bf16[2,1,64,128], index: 2, kind: input, shape index: {}]   ;;  %s3093_s3 = inlined_call_operand.vmem [shape: f32[1,64,64], index: 3, kind: input, shape index: {}]   ;;  %s3094_s4 = inlined_call_operand.vmem [shape: bf16[2,1,64,128], index: 4, kind: output, shape index: {}]  }
   0x1   :  { %s2457_s17 = smov 0  }
   0x2 LB: > { %s23_s18 = sadd.s32 1, %s2419_s16  ;;  %p1853_p0 = scmp.ge.s32.totalorder %s2423_s17, 1  ;;  %s2423_s17 = sphi %s2457_s17, %s14_s17   ;;  %s2419_s16 = sphi %s2455_s16, %s3096_s16   ;;  %s2415_s15 = sphi %s2453_s15, %s3095_s15  }
   0x3   : > { %p24_p1 = scmp.ge.s32.totalorder %s23_s18, 2  ;;  %p224_p2 = scmp.lt.s32.totalorder %s2423_s17, 3 }
   0x5   : > { %s3098_s18 = smov (%p24_p1, %s23_s18), 0  ;;  %p225_p3 = pnand %p1853_p0, %p224_p2 }
   0x6   : > { %p281_p4 = scmp.lt.s32.totalorder (!%p225_p3), %s2415_s15, 1  ;;  %vm395_vm0 = vcmask (!%p225_p3), 261120   ;;  %v2536_v12 = vld [vmem:[%s3093_s3 + $0x10] sm:$0xff] (!%p225_p3)  ;;  %v2541_v13 = vld [vmem:[%s3093_s3] sm:$0xff] (!%p225_p3)  ;;  %v2546_v15 = vld [vmem:[%s3093_s3 + $0x18] sm:$0xff] (!%p225_p3)  ;;  %vm485_vm1 = vcmask (!%p225_p3), 523264  }
   0x7   : > { %228 = sbr.rel (%p225_p3) target bundleno = 2823 (0xb07), region = 36  ;;  %v2552_v18 = vld [vmem:[%s3093_s3 + $0x8] sm:$0xff] (!%p225_p3)  ;;  %v2563_v27 = vld [vmem:[%s3093_s3 + $0x30] sm:$0xff] (!%p225_p3)  ;;  %v2568_v28 = vld [vmem:[%s3093_s3 + $0x20] sm:$0xff] (!%p225_p3)  ;;  %s2425_s24 = smov (!%p225_p3), 96   ;;  %vm1649_vm2 = vcmask (!%p225_p3), 785408  }
   0x8   : > { %v2574_v32 = vld [vmem:[%s3093_s3 + $0x38] sm:$0xff] (!%p225_p3)  ;;  %v2579_v33 = vld [vmem:[%s3093_s3 + $0x28] sm:$0xff] (!%p225_p3)  ;;  %s2426_s26 = smov (!%p225_p3), 64   ;;  %s2427_s27 = smov (!%p225_p3), 32  }
   0xe   : > { %s3100_s15 = smov (!%p281_p4, %s2415_s15), 1 }
   0xf   : > { %s2471_s19 = sshll.u32 %s3100_s15, 5 }
  0x10   : > { %s2477_s22 = scalar_lea.vmem %s3091_s1, %s2471_s19  ;;  %s2489_s25 = scalar_lea.vmem %s3090_s0, %s2471_s19 }
  0x11   : > { %v2480_v0 = vld [vmem:[%s2477_s22] sm:$0xff]   ;;  %v2483_v1 = vld [vmem:[%s2477_s22 + $0x8] sm:$0xff]   ;;  %v2505_v5 = vld [vmem:[%s2477_s22 + $0x10] sm:$0xff]   ;;  %s2621_s23 = scalar_lea.vmem %s3092_s2, %s2471_s19 }
  0x12   : > { %2143 = vmatprep.subr.msk.bf16.mxu0 %vm395_vm0, %v2480_v0  ;;  %v409_v2 = vsel %vm395_vm0, %v2480_v0, 0  ;;  %v2498_v3 = vld [vmem:[%s2489_s25] sm:$0xff]   ;;  %v412_v4 = vsel %vm395_vm0, %v2483_v1, 0  ;;  %v415_v6 = vsel %vm395_vm0, %v2505_v5, 0  ;;  %v2512_v7 = vld [vmem:[%s2477_s22 + $0x18] sm:$0xff]   ;;  %v2519_v9 = vld [vmem:[%s2489_s25 + $0x8] sm:$0xff]  }
  0x13   : > { %2016 = vmatpush3.bf16.xpose.msra.mxu0 %v409_v2  ;;  %2023 = vmatprep.mubr.msk.bf16.mxu0 %vm395_vm0, %v2498_v3  ;;  %v418_v8 = vsel %vm395_vm0, %v2512_v7, 0  ;;  %v2522_v10 = vld [vmem:[%s2489_s25 + $0x10] sm:$0xff]   ;;  %v2529_v11 = vld [vmem:[%s2489_s25 + $0x18] sm:$0xff]  }
  0x14   : > { %2144 = vmatprep.subr.msk.bf16.mxu0 %vm395_vm0, %v2483_v1 }
  0x1b   : > { %2018 = vmatpush3.bf16.xpose.msra.mxu0 %v412_v4 }
  0x1c   : > { %2145 = vmatprep.subr.msk.bf16.mxu0 %vm395_vm0, %v2505_v5 }
  0x23   : > { %2020 = vmatpush3.bf16.xpose.msra.mxu0 %v415_v6 }
  0x24   : > { %2146 = vmatprep.subr.msk.bf16.mxu0 %vm395_vm0, %v2512_v7 }
  0x2b   : > { %2022 = vmatpush3.bf16.xpose.msra.mxu0 %v418_v8 }
  0x32   : > { %2024 = vmatmul.mubr.msk.bf16.vlgmr.msra.gmra.mrb[0].mxu0 %vm395_vm0, %v2519_v9 }
  0x33   : > { %2027 = vmatprep.mubr.msk.bf16.mxu0 %vm395_vm0, %v2522_v10 }
  0x3a   : > { %2028 = vmatmul.mubr.msk.bf16.gmra.mrb[4].mxu0 %vm395_vm0, %v2529_v11 }
 0x105   : > { %v2025_v14 = vpop.f32.mrb[0].mxu0 }
 0x106   : > { %v463_v16 = vadd.f32 %v2025_v14, %v2536_v12  ;;  %v454_v17 = vpop.f32.mrb[1].mxu0 }
 0x107   : > { %v455_v19 = vadd.f32 %v454_v17, %v2541_v13  ;;  %v2026_v20 = vpop.f32.mrb[2].mxu0 }
 0x108   : > { %v466_v21 = vadd.f32 %v2026_v20, %v2546_v15  ;;  %v457_v22 = vpop.f32.mrb[3].mxu0  ;;  %v492_v23 = vsel %vm485_vm1, %v463_v16, -inf }
 0x109   : > { %v458_v24 = vadd.f32 %v457_v22, %v2552_v18  ;;  %493 = vmax.xlane.f32.xlu1 %v492_v23  ;;  %v486_v25 = vsel %vm485_vm1, %v455_v19, -inf  ;;  %v2626_v22 = vld [vmem:[%s2621_s23] sm:$0xff]   ;;  %v2631_v23 = vld [vmem:[%s2621_s23 + $0x8] sm:$0xff]  }
 0x10a   : > { %487 = vmax.xlane.f32.xlu0 %v486_v25  ;;  %v495_v26 = vsel %vm485_vm1, %v466_v21, -inf  ;;  %2031 = vmatprep.subr.bf16.mxu1 %v2626_v22  ;;  %v2643_v25 = vld [vmem:[%s2621_s23 + $0x18] sm:$0xff]  }
 0x10b   : > { %v489_v30 = vsel %vm485_vm1, %v458_v24, -inf  ;;  %2032 = vmatpush3.bf16.msra.mxu1 %v2626_v22 }
 0x10c   : > { %2033 = vmatprep.subr.bf16.mxu1 %v2631_v23 }
 0x10d   : > { %496 = vmax.xlane.f32.xlu1 %v495_v26  ;;  %v2029_v29 = vpop.f32.mrb[4].mxu0 }
 0x10e   : > { %v470_v31 = vpop.f32.mrb[5].mxu0  ;;  %490 = vmax.xlane.f32.xlu0 %v489_v30  ;;  %v479_v34 = vadd.f32 %v2029_v29, %v2563_v27 }
 0x10f   : > { %v471_v35 = vadd.f32 %v470_v31, %v2568_v28  ;;  %v2030_v36 = vpop.f32.mrb[6].mxu0  ;;  %2034 = vmatpush3.bf16.msra.mxu1 %v2631_v23 }
 0x110   : > { %v473_v37 = vpop.f32.mrb[7].mxu0  ;;  %v2584_v38 = vadd.f32 %v2030_v36, %v2574_v32  ;;  %v504_v42 = vsel %vm485_vm1, %v479_v34, -inf }
 0x111   : > { %v2587_v39 = vadd.f32 %v473_v37, %v2579_v33  ;;  %v498_v40 = vsel %vm485_vm1, %v471_v35, -inf }
 0x112   : > { %499 = vmax.xlane.f32.xlu0 %v498_v40  ;;  %v507_v43 = vsel %vm485_vm1, %v2584_v38, -inf }
 0x113   : > { %v501_v41 = vsel %vm485_vm1, %v2587_v39, -inf }
 0x114   : > { %502 = vmax.xlane.f32.xlu1 %v501_v41 }
 0x116   : > { %505 = vmax.xlane.f32.xlu0 %v504_v42 }
 0x118   : > { %508 = vmax.xlane.f32.xlu1 %v507_v43 }
 0x196   : > { %v494_v44 = vpop.xlane.xlu1 %493 }
 0x197   : > { %v512_v45 = vsub.f32 %v463_v16, %v494_v44  ;;  %v488_v46 = vpop.xlane.xlu0 %487 }
 0x198   : > { %v510_v47 = vsub.f32 %v455_v19, %v488_v46 }
 0x199   : > { %v522_v48 = vmul.f32 1.442695, %v512_v45 }
 0x19a   : > { %v518_v49 = vmul.f32 1.442695, %v510_v47  ;;  %v497_v50 = vpop.xlane.xlu1 %496 }
 0x19b   : > { %2258 = vpow2.f32 %v522_v48  ;;  %v513_v51 = vsub.f32 %v466_v21, %v497_v50  ;;  %v491_v52 = vpop.xlane.xlu0 %490 }
 0x19c   : > { %v511_v53 = vsub.f32 %v458_v24, %v491_v52  ;;  %2260 = vpow2.f32 %v518_v49  ;;  %v2636_v24 = vld [vmem:[%s2621_s23 + $0x10] sm:$0xff]  }
 0x19d   : > { %v524_v54 = vmul.f32 1.442695, %v513_v51  ;;  %2035 = vmatprep.subr.bf16.mxu1 %v2636_v24 }
 0x19e   : > { %v520_v55 = vmul.f32 1.442695, %v511_v53  ;;  %2036 = vmatpush3.bf16.msra.mxu1 %v2636_v24 }
 0x19f   : > { %2262 = vpow2.f32 %v524_v54  ;;  %v500_v56 = vpop.xlane.xlu0 %499  ;;  %2037 = vmatprep.subr.bf16.mxu1 %v2643_v25 }
 0x1a0   : > { %v514_v57 = vsub.f32 %v471_v35, %v500_v56  ;;  %2264 = vpow2.f32 %v520_v55 }
 0x1a1   : > { %v503_v26 = vpop.xlane.xlu1 %502 }
 0x1a2   : > { %v526_v58 = vmul.f32 1.442695, %v514_v57  ;;  %2038 = vmatpush3.bf16.msra.mxu1 %v2643_v25  ;;  %v515_v31 = vsub.f32 %v2587_v39, %v503_v26 }
 0x1a3   : > { %v506_v59 = vpop.xlane.xlu0 %505 }
 0x1a4   : > { %v516_v60 = vsub.f32 %v479_v34, %v506_v59  ;;  %2266 = vpow2.f32 %v526_v58  ;;  %v528_v35 = vmul.f32 1.442695, %v515_v31 }
 0x1a5   : > { %v2595_v61 = vpop.eup %2258  ;;  %v509_v29 = vpop.xlane.xlu1 %508 }
 0x1a6   : > { %v530_v62 = vmul.f32 1.442695, %v516_v60  ;;  %v540_v63 = vsel %vm485_vm1, %v2595_v61, 0.0  ;;  %v2599_v2 = vpop.eup %2260  ;;  %v517_v30 = vsub.f32 %v2584_v38, %v509_v29 }
 0x1a7   : > { %541 = vadd.xlane.f32.xlu0 %v540_v63  ;;  %v534_v8 = vsel %vm485_vm1, %v2599_v2, 0.0 }
 0x1a8   : > { %2268 = vpow2.f32 %v530_v62  ;;  %v532_v34 = vmul.f32 1.442695, %v517_v30 }
 0x1a9   : > { %v2601_v4 = vpop.eup %2262 }
 0x1aa   : > { %v543_v6 = vsel %vm485_vm1, %v2601_v4, 0.0  ;;  %v2607_v14 = vpop.eup %2264  ;;  %2270 = vpow2.f32 %v532_v34 }
 0x1ab   : > { %544 = vadd.xlane.f32.xlu1 %v543_v6  ;;  %535 = vadd.xlane.f32.xlu0 %v534_v8  ;;  %v537_v16 = vsel %vm485_vm1, %v2607_v14, 0.0  ;;  %2272 = vpow2.f32 %v528_v35 }
 0x1ae   : > { %v2611_v17 = vpop.eup %2266 }
 0x1af   : > { %538 = vadd.xlane.f32.xlu1 %v537_v16  ;;  %v546_v21 = vsel %vm485_vm1, %v2611_v17, 0.0 }
 0x1b2   : > { %v2613_v19 = vpop.eup %2268 }
 0x1b3   : > { %v552_v20 = vsel %vm485_vm1, %v2613_v19, 0.0 }
 0x1b4   : > { %553 = vadd.xlane.f32.xlu0 %v552_v20  ;;  %v2271_v36 = vpop.eup %2270 }
 0x1b5   : > { %v555_v37 = vsel %vm485_vm1, %v2271_v36, 0.0  ;;  %v2273_v40 = vpop.eup %2272 }
 0x1b6   : > { %v549_v41 = vsel %vm485_vm1, %v2273_v40, 0.0 }
 0x1b8   : > { %547 = vadd.xlane.f32.xlu0 %v546_v21 }
 0x1c0   : > { %689 = vrot.lane.b32.xlu1 %v2483_v1, %s2425_s24 }
 0x1c4   : > { %691 = vrot.lane.b32.xlu1 %v2505_v5, %s2425_s24 }
 0x1ce   : > { %687 = vrot.lane.b32.xlu0 %v2480_v0, %s2425_s24 }
 0x1d2   : > { %679 = vrot.lane.b32.xlu0 %v2498_v3, %s2425_s24 }
 0x1d6   : > { %683 = vrot.lane.b32.xlu0 %v2522_v10, %s2425_s24 }
 0x1e8   : > { %556 = vadd.xlane.f32.xlu1 %v555_v37 }
 0x1ec   : > { %550 = vadd.xlane.f32.xlu1 %v549_v41 }
 0x1fd   : > { %693 = vrot.lane.b32.xlu1 %v2512_v7, %s2425_s24 }
 0x201   : > { %681 = vrot.lane.b32.xlu1 %v2519_v9, %s2425_s24 }
 0x205   : > { %685 = vrot.lane.b32.xlu1 %v2529_v11, %s2425_s24 }
 0x234   : > { %v542_v38 = vpop.xlane.xlu0 %541 }
 0x238   : > { %v545_v39 = vpop.xlane.xlu1 %544  ;;  %v536_v42 = vpop.xlane.xlu0 %535 }
 0x239   : > { %2274 = vrcp.f32 %v545_v39 }
 0x23a   : > { %2276 = vrcp.f32 %v536_v42 }
 0x23b   : > { %2278 = vrcp.f32 %v542_v38 }
 0x23c   : > { %v539_v43 = vpop.xlane.xlu1 %538 }
 0x23d   : > { %2280 = vrcp.f32 %v539_v43 }
 0x240   : > { %v690_v58 = vpop.permute.xlu1 %689 }
 0x241   : > { %v554_v44 = vpop.xlane.xlu0 %553  ;;  %v711_v59 = vsel %vm395_vm0, %v690_v58, 0 }
 0x243   : > { %v2275_v45 = vpop.eup %2274 }
 0x244   : > { %v2277_v46 = vpop.eup %2276  ;;  %v569_v50 = vmul.f32 %v2275_v45, %v2601_v4  ;;  %v692_v60 = vpop.permute.xlu1 %691 }
 0x245   : > { %v548_v47 = vpop.xlane.xlu0 %547  ;;  %v2279_v48 = vpop.eup %2278  ;;  %v566_v51 = vmul.f32 %v2277_v46, %v2599_v2 }
 0x246   : > { %v568_v54 = vmul.f32 %v2279_v48, %v2595_v61  ;;  %v714_v61 = vsel %vm395_vm0, %v692_v60, 0 }
 0x247   : > { %v2281_v49 = vpop.eup %2280 }
 0x248   : > { %v567_v52 = vmul.f32 %v2281_v49, %v2607_v14  ;;  %v575_v57 = vpack.c.bf16 %v569_v50, %v568_v54 }
 0x249   : > { %v688_v53 = vpop.permute.xlu0 %687 }
 0x24a   : > { %v574_v55 = vpack.c.bf16 %v567_v52, %v566_v51  ;;  %2147 = vmatprep.subr.msk.bf16.mxu1 %vm395_vm0, %v688_v53  ;;  %v708_v56 = vsel %vm395_vm0, %v688_v53, 0 }
 0x24c   : > { %2039 = vmatprep.mubr.msk.bf16.mxu1 %vm485_vm1, %v574_v55 }
 0x24d   : > { %2040 = vmatmul.mubr.msk.bf16.vlgmr.msra.gmra.mrb[0].mxu1 %vm485_vm1, %v575_v57  ;;  %v680_v34 = vpop.permute.xlu0 %679 }
 0x24e   : > { %2048 = vmatpush3.bf16.xpose.msra.mxu1 %v708_v56 }
 0x24f   : > { %2148 = vmatprep.subr.msk.bf16.mxu1 %vm395_vm0, %v690_v58 }
 0x251   : > { %v684_v37 = vpop.permute.xlu0 %683 }
 0x256   : > { %2050 = vmatpush3.bf16.xpose.msra.mxu1 %v711_v59 }
 0x257   : > { %2149 = vmatprep.subr.msk.bf16.mxu1 %vm395_vm0, %v692_v60 }
 0x25e   : > { %2052 = vmatpush3.bf16.xpose.msra.mxu1 %v714_v61 }
 0x275   : > { %v557_v62 = vpop.xlane.xlu1 %556 }
 0x276   : > { %2282 = vrcp.f32 %v557_v62 }
 0x277   : > { %2284 = vrcp.f32 %v548_v47 }
 0x278   : > { %2286 = vrcp.f32 %v554_v44 }
 0x279   : > { %v551_v63 = vpop.xlane.xlu1 %550 }
 0x27a   : > { %2288 = vrcp.f32 %v551_v63 }
 0x27d   : > { %v694_v2 = vpop.permute.xlu1 %693 }
 0x27e   : > { %v717_v4 = vsel %vm395_vm0, %v694_v2, 0  ;;  %2150 = vmatprep.subr.msk.bf16.mxu1 %vm395_vm0, %v694_v2 }
 0x27f   : > { %2054 = vmatpush3.bf16.xpose.msra.mxu1 %v717_v4 }
 0x280   : > { %v2283_v6 = vpop.eup %2282 }
 0x281   : > { %v2285_v8 = vpop.eup %2284  ;;  %v573_v20 = vmul.f32 %v2283_v6, %v2271_v36  ;;  %v682_v35 = vpop.permute.xlu1 %681 }
 0x282   : > { %v2287_v14 = vpop.eup %2286  ;;  %v570_v21 = vmul.f32 %v2285_v8, %v2611_v17 }
 0x283   : > { %v572_v29 = vmul.f32 %v2287_v14, %v2613_v19 }
 0x284   : > { %v2289_v16 = vpop.eup %2288 }
 0x285   : > { %v571_v26 = vmul.f32 %v2289_v16, %v2273_v40  ;;  %v577_v31 = vpack.c.bf16 %v573_v20, %v572_v29  ;;  %v686_v36 = vpop.permute.xlu1 %685 }
 0x287   : > { %v576_v30 = vpack.c.bf16 %v571_v26, %v570_v21 }
 0x289   : > { %2043 = vmatprep.mubr.msk.bf16.mxu1 %vm485_vm1, %v576_v30 }
 0x28a   : > { %2044 = vmatmul.mubr.msk.bf16.gmra.mrb[4].mxu1 %vm485_vm1, %v577_v31 }
 0x28b   : > { %2055 = vmatprep.mubr.msk.bf16.mxu1 %vm395_vm0, %v680_v34 }
 0x292   : > { %2056 = vmatmul.mubr.msk.bf16.vlgmr.msra.gmra.mrb[8].mxu1 %vm395_vm0, %v682_v35 }
 0x293   : > { %2059 = vmatprep.mubr.msk.bf16.mxu1 %vm395_vm0, %v684_v37 }
 0x29a   : > { %2060 = vmatmul.mubr.msk.bf16.gmra.mrb[12].mxu1 %vm395_vm0, %v686_v36 }
 0x320   : > { %v2687_v17 = vpop.f32.mrb[0].mxu1 }
 0x321   : > { %v2689_v19 = vpop.f32.mrb[1].mxu1 }
 0x322   : > { %v2691_v40 = vpop.f32.mrb[2].mxu1 }
 0x323   : > { %v2693_v41 = vpop.f32.mrb[3].mxu1 }
 0x35d   : > { %v2695_v38 = vpop.f32.mrb[4].mxu1 }
 0x35e   : > { %v2697_v39 = vpop.f32.mrb[5].mxu1 }
 0x35f   : > { %v2699_v42 = vpop.f32.mrb[6].mxu1 }
 0x360   : > { %v2701_v43 = vpop.f32.mrb[7].mxu1 }
 0x365   : > { %v2057_v44 = vpop.f32.mrb[8].mxu1 }
 0x366   : > { %v762_v45 = vadd.f32 %v2057_v44, %v2536_v12  ;;  %v753_v46 = vpop.f32.mrb[9].mxu1 }
 0x367   : > { %v2058_v47 = vpop.f32.mrb[10].mxu1  ;;  %v754_v48 = vadd.f32 %v753_v46, %v2541_v13 }
 0x368   : > { %v756_v49 = vpop.f32.mrb[11].mxu1  ;;  %v790_v50 = vsel %vm485_vm1, %v762_v45, -inf  ;;  %v765_v53 = vadd.f32 %v2058_v47, %v2546_v15 }
 0x369   : > { %v757_v51 = vadd.f32 %v756_v49, %v2552_v18  ;;  %791 = vmax.xlane.f32.xlu0 %v790_v50  ;;  %v784_v54 = vsel %vm485_vm1, %v754_v48, -inf }
 0x36a   : > { %v793_v59 = vsel %vm485_vm1, %v765_v53, -inf }
 0x36b   : > { %v787_v52 = vsel %vm485_vm1, %v757_v51, -inf }
 0x36c   : > { %788 = vmax.xlane.f32.xlu1 %v787_v52 }
 0x36d   : > { %785 = vmax.xlane.f32.xlu0 %v784_v54  ;;  %v2061_v55 = vpop.f32.mrb[12].mxu1 }
 0x36e   : > { %v778_v56 = vadd.f32 %v2061_v55, %v2563_v27  ;;  %v769_v57 = vpop.f32.mrb[13].mxu1 }
 0x36f   : > { %v2062_v58 = vpop.f32.mrb[14].mxu1  ;;  %v770_v62 = vadd.f32 %v769_v57, %v2568_v28 }
 0x370   : > { %v772_v60 = vpop.f32.mrb[15].mxu1  ;;  %v802_v61 = vsel %vm485_vm1, %v778_v56, -inf  ;;  %v2722_v2 = vadd.f32 %v2062_v58, %v2574_v32 }
 0x371   : > { %794 = vmax.xlane.f32.xlu0 %v793_v59  ;;  %v796_v63 = vsel %vm485_vm1, %v770_v62, -inf  ;;  %v2725_v4 = vadd.f32 %v772_v60, %v2579_v33 }
 0x372   : > { %v805_v6 = vsel %vm485_vm1, %v2722_v2, -inf }
 0x373   : > { %v799_v8 = vsel %vm485_vm1, %v2725_v4, -inf }
 0x375   : > { %803 = vmax.xlane.f32.xlu0 %v802_v61 }
 0x379   : > { %797 = vmax.xlane.f32.xlu0 %v796_v63 }
 0x37d   : > { %878 = vrot.lane.b32.xlu1 %v2631_v23, %s2425_s24 }
 0x381   : > { %880 = vrot.lane.b32.xlu1 %v2636_v24, %s2425_s24 }
 0x38f   : > { %876 = vrot.lane.b32.xlu0 %v2626_v22, %s2425_s24 }
 0x3a5   : > { %806 = vmax.xlane.f32.xlu1 %v805_v6 }
 0x3a9   : > { %800 = vmax.xlane.f32.xlu1 %v799_v8 }
 0x3ba   : > { %882 = vrot.lane.b32.xlu1 %v2643_v25, %s2425_s24 }
 0x3f6   : > { %v792_v14 = vpop.xlane.xlu0 %791 }
 0x3f7   : > { %v810_v16 = vsub.f32 %v762_v45, %v792_v14 }
 0x3f9   : > { %v820_v20 = vmul.f32 1.442695, %v810_v16  ;;  %v789_v21 = vpop.xlane.xlu1 %788 }
 0x3fa   : > { %v786_v26 = vpop.xlane.xlu0 %785  ;;  %v809_v30 = vsub.f32 %v757_v51, %v789_v21 }
 0x3fb   : > { %2290 = vpow2.f32 %v820_v20  ;;  %v808_v29 = vsub.f32 %v754_v48, %v786_v26 }
 0x3fc   : > { %v818_v37 = vmul.f32 1.442695, %v809_v30 }
 0x3fd   : > { %v816_v31 = vmul.f32 1.442695, %v808_v29 }
 0x3fe   : > { %v795_v34 = vpop.xlane.xlu0 %794 }
 0x3ff   : > { %2292 = vpow2.f32 %v816_v31  ;;  %v811_v35 = vsub.f32 %v765_v53, %v795_v34  ;;  %v879_v53 = vpop.permute.xlu1 %878 }
 0x401   : > { %v822_v36 = vmul.f32 1.442695, %v811_v35 }
 0x402   : > { %v804_v44 = vpop.xlane.xlu0 %803 }
 0x403   : > { %2294 = vpow2.f32 %v822_v36  ;;  %v814_v46 = vsub.f32 %v778_v56, %v804_v44  ;;  %v881_v59 = vpop.permute.xlu1 %880 }
 0x404   : > { %2296 = vpow2.f32 %v818_v37 }
 0x405   : > { %v2733_v47 = vpop.eup %2290  ;;  %v828_v49 = vmul.f32 1.442695, %v814_v46 }
 0x406   : > { %v798_v45 = vpop.xlane.xlu0 %797  ;;  %v838_v50 = vsel %vm485_vm1, %v2733_v47, 0.0 }
 0x407   : > { %2298 = vpow2.f32 %v828_v49  ;;  %v812_v48 = vsub.f32 %v770_v62, %v798_v45  ;;  %839 = vadd.xlane.f32.xlu0 %v838_v50 }
 0x409   : > { %v2737_v51 = vpop.eup %2292  ;;  %v824_v52 = vmul.f32 1.442695, %v812_v48 }
 0x40a   : > { %v877_v54 = vpop.permute.xlu0 %876  ;;  %v832_v55 = vsel %vm485_vm1, %v2737_v51, 0.0 }
 0x40b   : > { %2300 = vpow2.f32 %v824_v52  ;;  %833 = vadd.xlane.f32.xlu0 %v832_v55  ;;  %2063 = vmatprep.subr.bf16.mxu0 %v877_v54 }
 0x40c   : > { %2064 = vmatpush3.bf16.msra.mxu0 %v877_v54 }
 0x40d   : > { %v2295_v56 = vpop.eup %2294  ;;  %2065 = vmatprep.subr.bf16.mxu0 %v879_v53 }
 0x40e   : > { %v841_v57 = vsel %vm485_vm1, %v2295_v56, 0.0  ;;  %v2297_v58 = vpop.eup %2296 }
 0x40f   : > { %842 = vadd.xlane.f32.xlu1 %v841_v57  ;;  %v835_v61 = vsel %vm485_vm1, %v2297_v58, 0.0 }
 0x410   : > { %2066 = vmatpush3.bf16.msra.mxu0 %v879_v53 }
 0x411   : > { %v2742_v60 = vpop.eup %2298  ;;  %2067 = vmatprep.subr.bf16.mxu0 %v881_v59 }
 0x412   : > { %v850_v62 = vsel %vm485_vm1, %v2742_v60, 0.0 }
 0x413   : > { %836 = vadd.xlane.f32.xlu1 %v835_v61  ;;  %851 = vadd.xlane.f32.xlu0 %v850_v62 }
 0x414   : > { %2068 = vmatpush3.bf16.msra.mxu0 %v881_v59 }
 0x415   : > { %v2747_v63 = vpop.eup %2300 }
 0x416   : > { %v844_v6 = vsel %vm485_vm1, %v2747_v63, 0.0 }
 0x417   : > { %845 = vadd.xlane.f32.xlu0 %v844_v6 }
 0x424   : > { %975 = vrot.lane.b32.xlu1 %v2483_v1, %s2426_s26 }
 0x428   : > { %977 = vrot.lane.b32.xlu1 %v2505_v5, %s2426_s26 }
 0x432   : > { %v807_v8 = vpop.xlane.xlu1 %806 }
 0x433   : > { %v815_v14 = vsub.f32 %v2722_v2, %v807_v8 }
 0x435   : > { %v830_v16 = vmul.f32 1.442695, %v815_v14 }
 0x436   : > { %v801_v20 = vpop.xlane.xlu1 %800 }
 0x437   : > { %2302 = vpow2.f32 %v830_v16  ;;  %v813_v21 = vsub.f32 %v2725_v4, %v801_v20 }
 0x439   : > { %v826_v26 = vmul.f32 1.442695, %v813_v21 }
 0x43a   : > { %v883_v29 = vpop.permute.xlu1 %882 }
 0x43b   : > { %2069 = vmatprep.subr.bf16.mxu0 %v883_v29  ;;  %2304 = vpow2.f32 %v826_v26 }
 0x43c   : > { %2070 = vmatpush3.bf16.msra.mxu0 %v883_v29 }
 0x441   : > { %v2303_v30 = vpop.eup %2302 }
 0x442   : > { %v853_v31 = vsel %vm485_vm1, %v2303_v30, 0.0 }
 0x443   : > { %854 = vadd.xlane.f32.xlu0 %v853_v31 }
 0x445   : > { %v2305_v1 = vpop.eup %2304 }
 0x446   : > { %v847_v34 = vsel %vm485_vm1, %v2305_v1, 0.0 }
 0x44c   : > { %848 = vadd.xlane.f32.xlu1 %v847_v34 }
 0x459   : > { %973 = vrot.lane.b32.xlu0 %v2480_v0, %s2426_s26 }
 0x45d   : > { %979 = vrot.lane.b32.xlu1 %v2512_v7, %s2426_s26  ;;  %965 = vrot.lane.b32.xlu0 %v2498_v3, %s2426_s26 }
 0x461   : > { %967 = vrot.lane.b32.xlu1 %v2519_v9, %s2426_s26  ;;  %969 = vrot.lane.b32.xlu0 %v2522_v10, %s2426_s26 }
 0x465   : > { %971 = vrot.lane.b32.xlu1 %v2529_v11, %s2426_s26 }
 0x494   : > { %v840_v2 = vpop.xlane.xlu0 %839 }
 0x498   : > { %v834_v4 = vpop.xlane.xlu0 %833 }
 0x49c   : > { %v843_v35 = vpop.xlane.xlu1 %842 }
 0x49d   : > { %2306 = vrcp.f32 %v843_v35 }
 0x49e   : > { %2308 = vrcp.f32 %v834_v4 }
 0x49f   : > { %2310 = vrcp.f32 %v840_v2 }
 0x4a0   : > { %v837_v0 = vpop.xlane.xlu1 %836  ;;  %v852_v53 = vpop.xlane.xlu0 %851 }
 0x4a1   : > { %2312 = vrcp.f32 %v837_v0 }
 0x4a4   : > { %v846_v54 = vpop.xlane.xlu0 %845  ;;  %v976_v55 = vpop.permute.xlu1 %975 }
 0x4a7   : > { %v2307_v37 = vpop.eup %2306 }
 0x4a8   : > { %v2309_v36 = vpop.eup %2308  ;;  %v867_v46 = vmul.f32 %v2307_v37, %v2295_v56  ;;  %v978_v61 = vpop.permute.xlu1 %977 }
 0x4a9   : > { %v2311_v3 = vpop.eup %2310  ;;  %v864_v49 = vmul.f32 %v2309_v36, %v2737_v51  ;;  %v997_v51 = vsel %vm395_vm0, %v976_v55, 0  ;;  %v1000_v20 = vsel %vm395_vm0, %v978_v61, 0 }
 0x4aa   : > { %v866_v50 = vmul.f32 %v2311_v3, %v2733_v47 }
 0x4ab   : > { %v2313_v44 = vpop.eup %2312 }
 0x4ac   : > { %v865_v45 = vmul.f32 %v2313_v44, %v2297_v58  ;;  %v873_v52 = vpack.c.bf16 %v867_v46, %v866_v50 }
 0x4ae   : > { %v872_v48 = vpack.c.bf16 %v865_v45, %v864_v49 }
 0x4b0   : > { %2071 = vmatprep.mubr.msk.bf16.mxu0 %vm485_vm1, %v872_v48 }
 0x4b1   : > { %2072 = vmatmul.mubr.msk.bf16.vlgmr.msra.gmra.mrb[8].mxu0 %vm485_vm1, %v873_v52 }
 0x4d0   : > { %v855_v57 = vpop.xlane.xlu0 %854 }
 0x4d1   : > { %2314 = vrcp.f32 %v855_v57 }
 0x4d2   : > { %2316 = vrcp.f32 %v846_v54 }
 0x4d3   : > { %2318 = vrcp.f32 %v852_v53 }
 0x4d4   : > { %v974_v59 = vpop.permute.xlu0 %973 }
 0x4d5   : > { %v994_v62 = vsel %vm395_vm0, %v974_v59, 0  ;;  %2151 = vmatprep.subr.msk.bf16.mxu0 %vm395_vm0, %v974_v59 }
 0x4d6   : > { %2080 = vmatpush3.bf16.xpose.msra.mxu0 %v994_v62 }
 0x4d7   : > { %2152 = vmatprep.subr.msk.bf16.mxu0 %vm395_vm0, %v976_v55 }
 0x4d8   : > { %v966_v2 = vpop.permute.xlu0 %965 }
 0x4d9   : > { %v849_v47 = vpop.xlane.xlu1 %848 }
 0x4da   : > { %2320 = vrcp.f32 %v849_v47 }
 0x4db   : > { %v2315_v56 = vpop.eup %2314 }
 0x4dc   : > { %v2317_v58 = vpop.eup %2316  ;;  %v871_v14 = vmul.f32 %v2315_v56, %v2303_v30 }
 0x4dd   : > { %v2319_v6 = vpop.eup %2318  ;;  %v980_v16 = vpop.permute.xlu1 %979  ;;  %v868_v21 = vmul.f32 %v2317_v58, %v2747_v63 }
 0x4de   : > { %2082 = vmatpush3.bf16.xpose.msra.mxu0 %v997_v51  ;;  %v870_v29 = vmul.f32 %v2319_v6, %v2742_v60  ;;  %v1003_v30 = vsel %vm395_vm0, %v980_v16, 0  ;;  %v970_v63 = vpop.permute.xlu0 %969 }
 0x4df   : > { %2153 = vmatprep.subr.msk.bf16.mxu0 %vm395_vm0, %v978_v61 }
 0x4e0   : > { %v875_v34 = vpack.c.bf16 %v871_v14, %v870_v29 }
 0x4e1   : > { %v968_v4 = vpop.permute.xlu1 %967 }
 0x4e4   : > { %v2321_v8 = vpop.eup %2320 }
 0x4e5   : > { %v869_v26 = vmul.f32 %v2321_v8, %v2305_v1  ;;  %v972_v60 = vpop.permute.xlu1 %971 }
 0x4e6   : > { %2084 = vmatpush3.bf16.xpose.msra.mxu0 %v1000_v20 }
 0x4e7   : > { %v874_v31 = vpack.c.bf16 %v869_v26, %v868_v21  ;;  %2154 = vmatprep.subr.msk.bf16.mxu0 %vm395_vm0, %v980_v16 }
 0x4e9   : > { %2075 = vmatprep.mubr.msk.bf16.mxu0 %vm485_vm1, %v874_v31 }
 0x4ea   : > { %2076 = vmatmul.mubr.msk.bf16.gmra.mrb[12].mxu0 %vm485_vm1, %v875_v34 }
 0x4eb   : > { %2087 = vmatprep.mubr.msk.bf16.mxu0 %vm395_vm0, %v966_v2 }
 0x4ee   : > { %2086 = vmatpush3.bf16.xpose.msra.mxu0 %v1003_v30 }
 0x4f5   : > { %2088 = vmatmul.mubr.msk.bf16.vlgmr.msra.gmra.mrb[16].mxu0 %vm395_vm0, %v968_v4 }
 0x4f6   : > { %2091 = vmatprep.mubr.msk.bf16.mxu0 %vm395_vm0, %v970_v63 }
 0x4fd   : > { %2092 = vmatmul.mubr.msk.bf16.gmra.mrb[20].mxu0 %vm395_vm0, %v972_v60 }
 0x584   : > { %v2791_v1 = vpop.f32.mrb[8].mxu0 }
 0x585   : > { %v2793_v35 = vpop.f32.mrb[9].mxu0 }
 0x586   : > { %v2795_v0 = vpop.f32.mrb[10].mxu0 }
 0x587   : > { %v2191_v37 = vpack.i.bf16 %v2795_v0, %v2791_v1  ;;  %v2799_v36 = vpop.f32.mrb[11].mxu0 }
 0x588   : > { %v2186_v3 = vpack.i.bf16 %v2799_v36, %v2793_v35 }
 0x5bd   : > { %v2803_v44 = vpop.f32.mrb[12].mxu0 }
 0x5be   : > { %v2805_v46 = vpop.f32.mrb[13].mxu0 }
 0x5bf   : > { %v2807_v49 = vpop.f32.mrb[14].mxu0 }
 0x5c0   : > { %v2201_v45 = vpack.i.bf16 %v2807_v49, %v2803_v44  ;;  %v2811_v50 = vpop.f32.mrb[15].mxu0 }
 0x5c1   : > { %v2196_v48 = vpack.i.bf16 %v2811_v50, %v2805_v46  ;;  %v2400_v50 = vld [vmem:[%s2621_s23 + $0x18] sm:$0xff]  }
 0x5c8   : > { %v2089_v52 = vpop.f32.mrb[16].mxu0 }
 0x5c9   : > { %v1048_v53 = vadd.f32 %v2089_v52, %v2536_v12  ;;  %v1039_v54 = vpop.f32.mrb[17].mxu0 }
 0x5ca   : > { %v2090_v55 = vpop.f32.mrb[18].mxu0  ;;  %v1040_v57 = vadd.f32 %v1039_v54, %v2541_v13 }
 0x5cb   : > { %v1042_v59 = vpop.f32.mrb[19].mxu0  ;;  %v1076_v61 = vsel %vm485_vm1, %v1048_v53, -inf  ;;  %v1051_v51 = vadd.f32 %v2090_v55, %v2546_v15 }
 0x5cc   : > { %v1043_v62 = vadd.f32 %v1042_v59, %v2552_v18  ;;  %1077 = vmax.xlane.f32.xlu0 %v1076_v61  ;;  %v1070_v56 = vsel %vm485_vm1, %v1040_v57, -inf }
 0x5cd   : > { %v1079_v13 = vsel %vm485_vm1, %v1051_v51, -inf }
 0x5ce   : > { %v1073_v47 = vsel %vm485_vm1, %v1043_v62, -inf }
 0x5cf   : > { %1074 = vmax.xlane.f32.xlu1 %v1073_v47 }
 0x5d0   : > { %1071 = vmax.xlane.f32.xlu0 %v1070_v56  ;;  %v2093_v58 = vpop.f32.mrb[20].mxu0 }
 0x5d1   : > { %v1064_v12 = vadd.f32 %v2093_v58, %v2563_v27  ;;  %v1055_v6 = vpop.f32.mrb[21].mxu0 }
 0x5d2   : > { %v2094_v8 = vpop.f32.mrb[22].mxu0  ;;  %v1056_v16 = vadd.f32 %v1055_v6, %v2568_v28 }
 0x5d3   : > { %v1058_v14 = vpop.f32.mrb[23].mxu0  ;;  %v1088_v18 = vsel %vm485_vm1, %v1064_v12, -inf  ;;  %v2834_v27 = vadd.f32 %v2094_v8, %v2574_v32 }
 0x5d4   : > { %1080 = vmax.xlane.f32.xlu0 %v1079_v13  ;;  %v1082_v15 = vsel %vm485_vm1, %v1056_v16, -inf  ;;  %v2837_v20 = vadd.f32 %v1058_v14, %v2579_v33 }
 0x5d5   : > { %v1091_v28 = vsel %vm485_vm1, %v2834_v27, -inf }
 0x5d6   : > { %v1085_v21 = vsel %vm485_vm1, %v2837_v20, -inf }
 0x5d8   : > { %1089 = vmax.xlane.f32.xlu0 %v1088_v18 }
 0x5dc   : > { %1083 = vmax.xlane.f32.xlu0 %v1082_v15 }
 0x5e0   : > { %1164 = vrot.lane.b32.xlu1 %v2631_v23, %s2426_s26 }
 0x5e4   : > { %1166 = vrot.lane.b32.xlu1 %v2636_v24, %s2426_s26 }
 0x5f2   : > { %1162 = vrot.lane.b32.xlu0 %v2626_v22, %s2426_s26 }
 0x608   : > { %1092 = vmax.xlane.f32.xlu1 %v1091_v28 }
 0x60c   : > { %1086 = vmax.xlane.f32.xlu1 %v1085_v21 }
 0x61d   : > { %1168 = vrot.lane.b32.xlu1 %v2643_v25, %s2426_s26 }
 0x659   : > { %v1078_v23 = vpop.xlane.xlu0 %1077 }
 0x65a   : > { %v1096_v24 = vsub.f32 %v1048_v53, %v1078_v23 }
 0x65c   : > { %v1106_v22 = vmul.f32 1.442695, %v1096_v24  ;;  %v1075_v26 = vpop.xlane.xlu1 %1074 }
 0x65d   : > { %v1072_v32 = vpop.xlane.xlu0 %1071  ;;  %v1095_v33 = vsub.f32 %v1043_v62, %v1075_v26 }
 0x65e   : > { %2322 = vpow2.f32 %v1106_v22  ;;  %v1094_v29 = vsub.f32 %v1040_v57, %v1072_v32 }
 0x65f   : > { %v1104_v30 = vmul.f32 1.442695, %v1095_v33 }
 0x660   : > { %v1102_v31 = vmul.f32 1.442695, %v1094_v29  ;;  %v1165_v61 = vpop.permute.xlu1 %1164 }
 0x661   : > { %v1081_v34 = vpop.xlane.xlu0 %1080 }
 0x662   : > { %2324 = vpow2.f32 %v1102_v31  ;;  %v1097_v2 = vsub.f32 %v1051_v51, %v1081_v34 }
 0x664   : > { %v1108_v4 = vmul.f32 1.442695, %v1097_v2 }
 0x665   : > { %v1090_v63 = vpop.xlane.xlu0 %1089 }
 0x666   : > { %2326 = vpow2.f32 %v1108_v4  ;;  %v1100_v60 = vsub.f32 %v1064_v12, %v1090_v63  ;;  %v1167_v12 = vpop.permute.xlu1 %1166 }
 0x667   : > { %2328 = vpow2.f32 %v1104_v30 }
 0x668   : > { %v2845_v52 = vpop.eup %2322  ;;  %v1114_v25 = vmul.f32 1.442695, %v1100_v60 }
 0x669   : > { %v1084_v53 = vpop.xlane.xlu0 %1083  ;;  %v1124_v54 = vsel %vm485_vm1, %v2845_v52, 0.0 }
 0x66a   : > { %2330 = vpow2.f32 %v1114_v25  ;;  %v1098_v55 = vsub.f32 %v1056_v16, %v1084_v53  ;;  %1125 = vadd.xlane.f32.xlu0 %v1124_v54  ;;  %v2386_v16 = vld [vmem:[%s2477_s22 + $0x8] sm:$0xff]  }
 0x66c   : > { %v2849_v57 = vpop.eup %2324  ;;  %v1110_v59 = vmul.f32 1.442695, %v1098_v55 }
 0x66d   : > { %v1163_v62 = vpop.permute.xlu0 %1162  ;;  %v1118_v47 = vsel %vm485_vm1, %v2849_v57, 0.0 }
 0x66e   : > { %2332 = vpow2.f32 %v1110_v59  ;;  %1119 = vadd.xlane.f32.xlu0 %v1118_v47  ;;  %2095 = vmatprep.subr.bf16.mxu1 %v1163_v62 }
 0x66f   : > { %2096 = vmatpush3.bf16.msra.mxu1 %v1163_v62 }
 0x670   : > { %v2327_v51 = vpop.eup %2326  ;;  %2097 = vmatprep.subr.bf16.mxu1 %v1165_v61 }
 0x671   : > { %v1127_v56 = vsel %vm485_vm1, %v2327_v51, 0.0  ;;  %v2329_v58 = vpop.eup %2328 }
 0x672   : > { %1128 = vadd.xlane.f32.xlu1 %v1127_v56  ;;  %v1121_v8 = vsel %vm485_vm1, %v2329_v58, 0.0 }
 0x673   : > { %2098 = vmatpush3.bf16.msra.mxu1 %v1165_v61 }
 0x674   : > { %v2854_v6 = vpop.eup %2330  ;;  %2099 = vmatprep.subr.bf16.mxu1 %v1167_v12 }
 0x675   : > { %v1136_v13 = vsel %vm485_vm1, %v2854_v6, 0.0 }
 0x676   : > { %1122 = vadd.xlane.f32.xlu1 %v1121_v8  ;;  %1137 = vadd.xlane.f32.xlu0 %v1136_v13 }
 0x677   : > { %2100 = vmatpush3.bf16.msra.mxu1 %v1167_v12 }
 0x678   : > { %v2859_v14 = vpop.eup %2332 }
 0x679   : > { %v1130_v18 = vsel %vm485_vm1, %v2859_v14, 0.0 }
 0x67a   : > { %1131 = vadd.xlane.f32.xlu0 %v1130_v18 }
 0x687   : > { %1261 = vrot.lane.b32.xlu1 %v2386_v16, %s2427_s27 }
 0x68b   : > { %1263 = vrot.lane.b32.xlu1 %v2505_v5, %s2427_s27 }
 0x695   : > { %v1093_v15 = vpop.xlane.xlu1 %1092 }
 0x696   : > { %v1101_v28 = vsub.f32 %v2834_v27, %v1093_v15  ;;  %v2387_v27 = vld [vmem:[%s2477_s22] sm:$0xff]  }
 0x698   : > { %v1116_v21 = vmul.f32 1.442695, %v1101_v28 }
 0x699   : > { %v1087_v23 = vpop.xlane.xlu1 %1086 }
 0x69a   : > { %2334 = vpow2.f32 %v1116_v21  ;;  %v1099_v24 = vsub.f32 %v2837_v20, %v1087_v23  ;;  %v2388_v20 = vld [vmem:[%s2489_s25] sm:$0xff]  }
 0x69c   : > { %v1112_v22 = vmul.f32 1.442695, %v1099_v24 }
 0x69d   : > { %v1169_v26 = vpop.permute.xlu1 %1168 }
 0x69e   : > { %2101 = vmatprep.subr.bf16.mxu1 %v1169_v26  ;;  %2336 = vpow2.f32 %v1112_v22 }
 0x69f   : > { %2102 = vmatpush3.bf16.msra.mxu1 %v1169_v26 }
 0x6a4   : > { %v2335_v32 = vpop.eup %2334 }
 0x6a5   : > { %v1139_v29 = vsel %vm485_vm1, %v2335_v32, 0.0 }
 0x6a6   : > { %1140 = vadd.xlane.f32.xlu0 %v1139_v29 }
 0x6a8   : > { %v2337_v5 = vpop.eup %2336 }
 0x6a9   : > { %v1133_v33 = vsel %vm485_vm1, %v2337_v5, 0.0 }
 0x6af   : > { %1134 = vadd.xlane.f32.xlu1 %v1133_v33 }
 0x6bc   : > { %1259 = vrot.lane.b32.xlu0 %v2387_v27, %s2427_s27 }
 0x6c0   : > { %1265 = vrot.lane.b32.xlu1 %v2512_v7, %s2427_s27  ;;  %1251 = vrot.lane.b32.xlu0 %v2388_v20, %s2427_s27 }
 0x6c4   : > { %1253 = vrot.lane.b32.xlu1 %v2519_v9, %s2427_s27  ;;  %1255 = vrot.lane.b32.xlu0 %v2522_v10, %s2427_s27 }
 0x6c8   : > { %1257 = vrot.lane.b32.xlu1 %v2529_v11, %s2427_s27 }
 0x6f7   : > { %v1126_v31 = vpop.xlane.xlu0 %1125 }
 0x6fb   : > { %v1120_v34 = vpop.xlane.xlu0 %1119 }
 0x6ff   : > { %v1129_v2 = vpop.xlane.xlu1 %1128 }
 0x700   : > { %2338 = vrcp.f32 %v1129_v2 }
 0x701   : > { %2340 = vrcp.f32 %v1120_v34 }
 0x702   : > { %2342 = vrcp.f32 %v1126_v31 }
 0x703   : > { %v1123_v30 = vpop.xlane.xlu1 %1122  ;;  %v1138_v55 = vpop.xlane.xlu0 %1137 }
 0x704   : > { %2344 = vrcp.f32 %v1123_v30 }
 0x707   : > { %v1132_v59 = vpop.xlane.xlu0 %1131  ;;  %v1262_v61 = vpop.permute.xlu1 %1261 }
 0x70a   : > { %v2339_v7 = vpop.eup %2338 }
 0x70b   : > { %v2341_v4 = vpop.eup %2340  ;;  %v1153_v25 = vmul.f32 %v2339_v7, %v2327_v51  ;;  %v1264_v56 = vpop.permute.xlu1 %1263 }
 0x70c   : > { %v2343_v63 = vpop.eup %2342  ;;  %v1150_v9 = vmul.f32 %v2341_v4, %v2849_v57  ;;  %v1283_v57 = vsel %vm395_vm0, %v1262_v61, 0  ;;  %v1286_v15 = vsel %vm395_vm0, %v1264_v56, 0 }
 0x70d   : > { %v1152_v10 = vmul.f32 %v2343_v63, %v2845_v52 }
 0x70e   : > { %v2345_v60 = vpop.eup %2344 }
 0x70f   : > { %v1151_v53 = vmul.f32 %v2345_v60, %v2329_v58  ;;  %v1159_v11 = vpack.c.bf16 %v1153_v25, %v1152_v10 }
 0x711   : > { %v1158_v54 = vpack.c.bf16 %v1151_v53, %v1150_v9  ;;  %v2389_v53 = vld [vmem:[%s3093_s3] sm:$0xff] }
 0x713   : > { %2103 = vmatprep.mubr.msk.bf16.mxu1 %vm485_vm1, %v1158_v54 }
 0x714   : > { %2104 = vmatmul.mubr.msk.bf16.vlgmr.msra.gmra.mrb[16].mxu1 %vm485_vm1, %v1159_v11 }
 0x733   : > { %v1141_v62 = vpop.xlane.xlu0 %1140 }
 0x734   : > { %2346 = vrcp.f32 %v1141_v62 }
 0x735   : > { %2348 = vrcp.f32 %v1132_v59 }
 0x736   : > { %2350 = vrcp.f32 %v1138_v55  ;;  %v2390_v55 = vld [vmem:[%s3093_s3 + $0x10] sm:$0xff] }
 0x737   : > { %v1260_v47 = vpop.permute.xlu0 %1259 }
 0x738   : > { %v1280_v12 = vsel %vm395_vm0, %v1260_v47, 0  ;;  %2155 = vmatprep.subr.msk.bf16.mxu1 %vm395_vm0, %v1260_v47 }
 0x739   : > { %2112 = vmatpush3.bf16.xpose.msra.mxu1 %v1280_v12  ;;  %v2392_v12 = vld [vmem:[%s3093_s3 + $0x18] sm:$0xff] }
 0x73a   : > { %2156 = vmatprep.subr.msk.bf16.mxu1 %vm395_vm0, %v1262_v61  ;;  %v2391_v61 = vld [vmem:[%s3093_s3 + $0x8] sm:$0xff] }
 0x73b   : > { %v1252_v26 = vpop.permute.xlu0 %1251 }
 0x73c   : > { %v1135_v52 = vpop.xlane.xlu1 %1134 }
 0x73d   : > { %2352 = vrcp.f32 %v1135_v52 }
 0x73e   : > { %v2347_v51 = vpop.eup %2346 }
 0x73f   : > { %v2349_v58 = vpop.eup %2348  ;;  %v1157_v18 = vmul.f32 %v2347_v51, %v2335_v32 }
 0x740   : > { %v2351_v8 = vpop.eup %2350  ;;  %v1266_v16 = vpop.permute.xlu1 %1265  ;;  %v1154_v28 = vmul.f32 %v2349_v58, %v2859_v14 }
 0x741   : > { %2114 = vmatpush3.bf16.xpose.msra.mxu1 %v1283_v57  ;;  %v1156_v23 = vmul.f32 %v2351_v8, %v2854_v6  ;;  %v1289_v32 = vsel %vm395_vm0, %v1266_v16, 0  ;;  %v1256_v14 = vpop.permute.xlu0 %1255  ;;  %v2393_v8 = vld [vmem:[%s3093_s3 + $0x20] sm:$0xff] }
 0x742   : > { %2157 = vmatprep.subr.msk.bf16.mxu1 %vm395_vm0, %v1264_v56 }
 0x743   : > { %v1161_v22 = vpack.c.bf16 %v1157_v18, %v1156_v23 }
 0x744   : > { %v1254_v29 = vpop.permute.xlu1 %1253 }
 0x747   : > { %v2353_v13 = vpop.eup %2352 }
 0x748   : > { %v1155_v21 = vmul.f32 %v2353_v13, %v2337_v5  ;;  %v1258_v6 = vpop.permute.xlu1 %1257 }
 0x749   : > { %2116 = vmatpush3.bf16.xpose.msra.mxu1 %v1286_v15  ;;  %v2394_v15 = vld [vmem:[%s3093_s3 + $0x38] sm:$0xff] }
 0x74a   : > { %v1160_v24 = vpack.c.bf16 %v1155_v21, %v1154_v28  ;;  %2158 = vmatprep.subr.msk.bf16.mxu1 %vm395_vm0, %v1266_v16  ;;  %v2395_v21 = vld [vmem:[%s3093_s3 + $0x28] sm:$0xff] }
 0x74c   : > { %2107 = vmatprep.mubr.msk.bf16.mxu1 %vm485_vm1, %v1160_v24 }
 0x74d   : > { %2108 = vmatmul.mubr.msk.bf16.gmra.mrb[20].mxu1 %vm485_vm1, %v1161_v22  ;;  %v2396_v22 = vld [vmem:[%s3093_s3 + $0x30] sm:$0xff] }
 0x74e   : > { %2119 = vmatprep.mubr.msk.bf16.mxu1 %vm395_vm0, %v1252_v26 }
 0x751   : > { %2118 = vmatpush3.bf16.xpose.msra.mxu1 %v1289_v32 }
 0x758   : > { %2120 = vmatmul.mubr.msk.bf16.vlgmr.msra.gmra.mrb[24].mxu1 %vm395_vm0, %v1254_v29 }
 0x759   : > { %2123 = vmatprep.mubr.msk.bf16.mxu1 %vm395_vm0, %v1256_v14 }
 0x760   : > { %2124 = vmatmul.mubr.msk.bf16.gmra.mrb[28].mxu1 %vm395_vm0, %v1258_v6 }
 0x7e7   : > { %v2903_v5 = vpop.f32.mrb[16].mxu1 }
 0x7e8   : > { %v2905_v33 = vpop.f32.mrb[17].mxu1 }
 0x7e9   : > { %v2907_v27 = vpop.f32.mrb[18].mxu1 }
 0x7ea   : > { %v2211_v20 = vpack.i.bf16 %v2907_v27, %v2903_v5  ;;  %v2911_v31 = vpop.f32.mrb[19].mxu1 }
 0x7eb   : > { %v2206_v34 = vpack.i.bf16 %v2911_v31, %v2905_v33 }
 0x820   : > { %v2915_v2 = vpop.f32.mrb[20].mxu1 }
 0x821   : > { %v2917_v30 = vpop.f32.mrb[21].mxu1 }
 0x822   : > { %v2919_v7 = vpop.f32.mrb[22].mxu1 }
 0x823   : > { %v2221_v4 = vpack.i.bf16 %v2919_v7, %v2915_v2  ;;  %v2923_v63 = vpop.f32.mrb[23].mxu1 }
 0x824   : > { %v2216_v60 = vpack.i.bf16 %v2923_v63, %v2917_v30 }
 0x82b   : > { %v2121_v25 = vpop.f32.mrb[24].mxu1 }
 0x82c   : > { %v1325_v9 = vpop.f32.mrb[25].mxu1  ;;  %v1334_v59 = vadd.f32 %v2390_v55, %v2121_v25 }
 0x82d   : > { %v1326_v10 = vadd.f32 %v2389_v53, %v1325_v9  ;;  %v2122_v54 = vpop.f32.mrb[26].mxu1 }
 0x82e   : > { %v1328_v11 = vpop.f32.mrb[27].mxu1  ;;  %v1337_v52 = vadd.f32 %v2392_v12, %v2122_v54  ;;  %v1362_v51 = vsel %vm485_vm1, %v1334_v59, -inf }
 0x82f   : > { %v1329_v62 = vadd.f32 %v2391_v61, %v1328_v11  ;;  %v1356_v47 = vsel %vm485_vm1, %v1326_v10, -inf }
 0x830   : > { %1357 = vmax.xlane.f32.xlu0 %v1356_v47  ;;  %v1365_v24 = vsel %vm485_vm1, %v1337_v52, -inf }
 0x831   : > { %v1359_v56 = vsel %vm485_vm1, %v1329_v62, -inf }
 0x832   : > { %1360 = vmax.xlane.f32.xlu1 %v1359_v56 }
 0x833   : > { %v2125_v57 = vpop.f32.mrb[28].mxu1 }
 0x834   : > { %1363 = vmax.xlane.f32.xlu0 %v1362_v51  ;;  %v1341_v58 = vpop.f32.mrb[29].mxu1  ;;  %v1350_v26 = vadd.f32 %v2396_v22, %v2125_v57 }
 0x835   : > { %v1342_v13 = vadd.f32 %v2393_v8, %v1341_v58  ;;  %v2126_v18 = vpop.f32.mrb[30].mxu1 }
 0x836   : > { %v1344_v16 = vpop.f32.mrb[31].mxu1  ;;  %v2948_v28 = vadd.f32 %v2394_v15, %v2126_v18  ;;  %v1374_v6 = vsel %vm485_vm1, %v1350_v26, -inf }
 0x837   : > { %v2953_v23 = vadd.f32 %v2395_v21, %v1344_v16  ;;  %v1368_v29 = vsel %vm485_vm1, %v1342_v13, -inf }
 0x838   : > { %1366 = vmax.xlane.f32.xlu0 %v1365_v24  ;;  %v1377_v14 = vsel %vm485_vm1, %v2948_v28, -inf }
 0x839   : > { %v1371_v32 = vsel %vm485_vm1, %v2953_v23, -inf }
 0x83a   : > { %1372 = vmax.xlane.f32.xlu1 %v1371_v32 }
 0x83c   : > { %1369 = vmax.xlane.f32.xlu0 %v1368_v29 }
 0x83e   : > { %1378 = vmax.xlane.f32.xlu1 %v1377_v14 }
 0x840   : > { %1375 = vmax.xlane.f32.xlu0 %v1374_v6 }
 0x8bd   : > { %v1358_v25 = vpop.xlane.xlu0 %1357 }
 0x8be   : > { %v1380_v9 = vsub.f32 %v1326_v10, %v1358_v25  ;;  %v2397_v25 = vld [vmem:[%s2621_s23 + $0x8] sm:$0xff]  }
 0x8bf   : > { %v1361_v53 = vpop.xlane.xlu1 %1360 }
 0x8c0   : > { %v1388_v55 = vmul.f32 1.442695, %v1380_v9  ;;  %v1381_v61 = vsub.f32 %v1329_v62, %v1361_v53  ;;  %v2398_v9 = vld [vmem:[%s2621_s23 + $0x10] sm:$0xff]  }
 0x8c1   : > { %v1364_v54 = vpop.xlane.xlu0 %1363 }
 0x8c2   : > { %v1382_v11 = vsub.f32 %v1334_v59, %v1364_v54  ;;  %v1390_v57 = vmul.f32 1.442695, %v1381_v61  ;;  %v2399_v54 = vld [vmem:[%s2621_s23] sm:$0xff]   ;;  %s3055_s23 = scalar_lea.vmem %s3094_s4, %s2471_s19 }
 0x8c4   : > { %v1392_v47 = vmul.f32 1.442695, %v1382_v11 }
 0x8c5   : > { %v1367_v56 = vpop.xlane.xlu0 %1366 }
 0x8c6   : > { %2354 = vpow2.f32 %v1392_v47  ;;  %v1383_v12 = vsub.f32 %v1337_v52, %v1367_v56 }
 0x8c7   : > { %2356 = vpow2.f32 %v1388_v55  ;;  %v1373_v53 = vpop.xlane.xlu1 %1372 }
 0x8c8   : > { %v1394_v51 = vmul.f32 1.442695, %v1383_v12  ;;  %v1385_v61 = vsub.f32 %v2953_v23, %v1373_v53 }
 0x8c9   : > { %v1370_v58 = vpop.xlane.xlu0 %1369 }
 0x8ca   : > { %2358 = vpow2.f32 %v1394_v51  ;;  %v1384_v8 = vsub.f32 %v1342_v13, %v1370_v58  ;;  %v1398_v56 = vmul.f32 1.442695, %v1385_v61 }
 0x8cb   : > { %2360 = vpow2.f32 %v1390_v57  ;;  %v1379_v11 = vpop.xlane.xlu1 %1378 }
 0x8cc   : > { %v1396_v10 = vmul.f32 1.442695, %v1384_v8  ;;  %v1387_v55 = vsub.f32 %v2948_v28, %v1379_v11 }
 0x8cd   : > { %v1376_v18 = vpop.xlane.xlu0 %1375 }
 0x8ce   : > { %v1386_v16 = vsub.f32 %v1350_v26, %v1376_v18  ;;  %v1402_v47 = vmul.f32 1.442695, %v1387_v55 }
 0x8d0   : > { %v2965_v15 = vpop.eup %2354  ;;  %v1400_v21 = vmul.f32 1.442695, %v1386_v16 }
 0x8d1   : > { %v1410_v59 = vsel %vm485_vm1, %v2965_v15, 0.0  ;;  %v2357_v62 = vpop.eup %2356 }
 0x8d2   : > { %2362 = vpow2.f32 %v1400_v21  ;;  %1411 = vadd.xlane.f32.xlu0 %v1410_v59  ;;  %v1404_v24 = vsel %vm485_vm1, %v2357_v62, 0.0 }
 0x8d3   : > { %2364 = vpow2.f32 %v1396_v10 }
 0x8d4   : > { %v2969_v52 = vpop.eup %2358  ;;  %2366 = vpow2.f32 %v1402_v47 }
 0x8d5   : > { %v1413_v13 = vsel %vm485_vm1, %v2969_v52, 0.0  ;;  %v2361_v22 = vpop.eup %2360  ;;  %2368 = vpow2.f32 %v1398_v56 }
 0x8d6   : > { %1405 = vadd.xlane.f32.xlu0 %v1404_v24  ;;  %1414 = vadd.xlane.f32.xlu1 %v1413_v13  ;;  %v1407_v26 = vsel %vm485_vm1, %v2361_v22, 0.0 }
 0x8da   : > { %1408 = vadd.xlane.f32.xlu1 %v1407_v26 }
 0x8dc   : > { %v2975_v32 = vpop.eup %2362 }
 0x8dd   : > { %v1422_v29 = vsel %vm485_vm1, %v2975_v32, 0.0  ;;  %v2979_v14 = vpop.eup %2364 }
 0x8de   : > { %1423 = vadd.xlane.f32.xlu0 %v1422_v29  ;;  %v1416_v6 = vsel %vm485_vm1, %v2979_v14, 0.0  ;;  %v2367_v35 = vpop.eup %2366 }
 0x8df   : > { %v1425_v36 = vsel %vm485_vm1, %v2367_v35, 0.0 }
 0x8e2   : > { %1417 = vadd.xlane.f32.xlu0 %v1416_v6 }
 0x8eb   : > { %1450 = vrot.lane.b32.xlu1 %v2397_v25, %s2427_s27 }
 0x8ef   : > { %1452 = vrot.lane.b32.xlu1 %v2398_v9, %s2427_s27 }
 0x8f8   : > { %1448 = vrot.lane.b32.xlu0 %v2399_v54, %s2427_s27 }
 0x8fc   : > { %2187 = vrot.lane.b32.xlu0 %v2186_v3, %s2427_s27  ;;  %v2369_v3 = vpop.eup %2368 }
 0x8fd   : > { %v1419_v46 = vsel %vm485_vm1, %v2369_v3, 0.0 }
 0x900   : > { %2197 = vrot.lane.b32.xlu0 %v2196_v48, %s2427_s27 }
 0x904   : > { %2207 = vrot.lane.b32.xlu0 %v2206_v34, %s2426_s26 }
 0x908   : > { %2217 = vrot.lane.b32.xlu0 %v2216_v60, %s2426_s26 }
 0x913   : > { %1426 = vadd.xlane.f32.xlu1 %v1425_v36 }
 0x917   : > { %1420 = vadd.xlane.f32.xlu1 %v1419_v46 }
 0x928   : > { %1454 = vrot.lane.b32.xlu1 %v2400_v50, %s2427_s27 }
 0x92c   : > { %2192 = vrot.lane.b32.xlu1 %v2191_v37, %s2427_s27 }
 0x930   : > { %2202 = vrot.lane.b32.xlu1 %v2201_v45, %s2427_s27 }
 0x934   : > { %2212 = vrot.lane.b32.xlu1 %v2211_v20, %s2426_s26 }
 0x938   : > { %2222 = vrot.lane.b32.xlu1 %v2221_v4, %s2426_s26 }
 0x95f   : > { %v1412_v48 = vpop.xlane.xlu0 %1411 }
 0x963   : > { %v1415_v33 = vpop.xlane.xlu1 %1414  ;;  %v1406_v31 = vpop.xlane.xlu0 %1405 }
 0x964   : > { %2370 = vrcp.f32 %v1406_v31 }
 0x967   : > { %v1409_v1 = vpop.xlane.xlu1 %1408 }
 0x968   : > { %2372 = vrcp.f32 %v1409_v1 }
 0x969   : > { %2374 = vrcp.f32 %v1415_v33 }
 0x96a   : > { %2376 = vrcp.f32 %v1412_v48 }
 0x96b   : > { %v1424_v0 = vpop.xlane.xlu0 %1423  ;;  %v1451_v45 = vpop.permute.xlu1 %1450 }
 0x96e   : > { %v2371_v44 = vpop.eup %2370 }
 0x96f   : > { %v1418_v37 = vpop.xlane.xlu0 %1417  ;;  %v1436_v30 = vmul.f32 %v2371_v44, %v2357_v62  ;;  %v1453_v20 = vpop.permute.xlu1 %1452 }
 0x972   : > { %v2373_v49 = vpop.eup %2372 }
 0x973   : > { %v1449_v34 = vpop.permute.xlu0 %1448  ;;  %v1437_v5 = vmul.f32 %v2373_v49, %v2361_v22  ;;  %v2375_v7 = vpop.eup %2374 }
 0x974   : > { %2127 = vmatprep.subr.bf16.mxu0 %v1449_v34  ;;  %v2377_v63 = vpop.eup %2376  ;;  %v1439_v60 = vmul.f32 %v2375_v7, %v2969_v52 }
 0x975   : > { %2128 = vmatpush3.bf16.msra.mxu0 %v1449_v34  ;;  %v1444_v27 = vpack.c.bf16 %v1437_v5, %v1436_v30  ;;  %v1438_v23 = vmul.f32 %v2377_v63, %v2965_v15 }
 0x976   : > { %2129 = vmatprep.subr.bf16.mxu0 %v1451_v45 }
 0x977   : > { %2135 = vmatprep.mubr.msk.bf16.mxu0 %vm485_vm1, %v1444_v27  ;;  %v1445_v12 = vpack.c.bf16 %v1439_v60, %v1438_v23  ;;  %v2188_v54 = vpop.permute.xlu0 %2187 }
 0x978   : > { %v2190_v56 = vunpack.i.h.bf16 %v2188_v54 }
 0x979   : > { %2130 = vmatpush3.bf16.msra.mxu0 %v1451_v45 }
 0x97a   : > { %2131 = vmatprep.subr.bf16.mxu0 %v1453_v20 }
 0x97b   : > { %v2198_v55 = vpop.permute.xlu0 %2197 }
 0x97c   : > { %v2200_v44 = vunpack.i.h.bf16 %v2198_v55  ;;  %v2199_v63 = vunpack.i.l.bf16 %v2198_v55 }
 0x97d   : > { %2132 = vmatpush3.bf16.msra.mxu0 %v1453_v20 }
 0x97f   : > { %v2208_v47 = vpop.permute.xlu0 %2207 }
 0x980   : > { %v2210_v31 = vunpack.i.h.bf16 %v2208_v47  ;;  %v2209_v1 = vunpack.i.l.bf16 %v2208_v47 }
 0x9a0   : > { %v1427_v2 = vpop.xlane.xlu1 %1426 }
 0x9a1   : > { %2378 = vrcp.f32 %v1427_v2 }
 0x9a2   : > { %2380 = vrcp.f32 %v1418_v37 }
 0x9a3   : > { %2382 = vrcp.f32 %v1424_v0  ;;  %v1634_v0 = vsel %vm395_vm0, %v2693_v41, %v2190_v56 }
 0x9a4   : > { %v1421_v4 = vpop.xlane.xlu1 %1420 }
 0x9a5   : > { %2384 = vrcp.f32 %v1421_v4  ;;  %v1642_v4 = vsel %vm485_vm1, %v1634_v0, %v2210_v31 }
 0x9a8   : > { %v1455_v28 = vpop.permute.xlu1 %1454 }
 0x9a9   : > { %2133 = vmatprep.subr.bf16.mxu0 %v1455_v28 }
 0x9aa   : > { %2134 = vmatpush3.bf16.msra.mxu0 %v1455_v28 }
 0x9ab   : > { %v2379_v57 = vpop.eup %2378 }
 0x9ac   : > { %v2381_v51 = vpop.eup %2380  ;;  %v1443_v18 = vmul.f32 %v2379_v57, %v2367_v35  ;;  %v2193_v53 = vpop.permute.xlu1 %2192  ;;  %v2189_v35 = vunpack.i.l.bf16 %v2188_v54 }
 0x9ad   : > { %2136 = vmatmul.mubr.msk.bf16.vlgmr.msra.gmra.mrb[24].mxu0 %vm485_vm1, %v1445_v12  ;;  %v2383_v58 = vpop.eup %2382  ;;  %v1440_v16 = vmul.f32 %v2381_v51, %v2979_v14  ;;  %v2195_v46 = vunpack.i.h.bf16 %v2193_v53  ;;  %v2194_v50 = vunpack.i.l.bf16 %v2193_v53 }
 0x9ae   : > { %v1442_v21 = vmul.f32 %v2383_v58, %v2975_v32  ;;  %v1633_v37 = vsel %vm395_vm0, %v2689_v19, %v2189_v35 }
 0x9af   : > { %v2385_v8 = vpop.eup %2384  ;;  %v1636_v45 = vsel %vm395_vm0, %v2691_v40, %v2195_v46  ;;  %v1635_v34 = vsel %vm395_vm0, %v2687_v17, %v2194_v50  ;;  %v1641_v19 = vsel %vm485_vm1, %v1633_v37, %v2209_v1 }
 0x9b0   : > { %v1441_v10 = vmul.f32 %v2385_v8, %v2369_v3  ;;  %v1447_v62 = vpack.c.bf16 %v1443_v18, %v1442_v21  ;;  %v2203_v11 = vpop.permute.xlu1 %2202  ;;  %v2218_v3 = vpop.permute.xlu0 %2217  ;;  %v1637_v21 = vsel %vm395_vm0, %v2697_v39, %v2199_v63 }
 0x9b1   : > { %v2205_v12 = vunpack.i.h.bf16 %v2203_v11  ;;  %v2204_v57 = vunpack.i.l.bf16 %v2203_v11  ;;  %v2220_v18 = vunpack.i.h.bf16 %v2218_v3 }
 0x9b2   : > { %v1446_v59 = vpack.c.bf16 %v1441_v10, %v1440_v16  ;;  %v2219_v16 = vunpack.i.l.bf16 %v2218_v3  ;;  %v1638_v10 = vsel %vm395_vm0, %v2701_v43, %v2200_v44 }
 0x9b4   : > { %2139 = vmatprep.mubr.msk.bf16.mxu0 %vm485_vm1, %v1446_v59  ;;  %v2213_v61 = vpop.permute.xlu1 %2212  ;;  %v1645_v39 = vsel %vm485_vm1, %v1637_v21, %v2219_v16 }
 0x9b5   : > { %2140 = vmatmul.mubr.msk.bf16.gmra.mrb[28].mxu0 %vm485_vm1, %v1447_v62  ;;  %v2215_v48 = vunpack.i.h.bf16 %v2213_v61  ;;  %v2214_v33 = vunpack.i.l.bf16 %v2213_v61  ;;  %v1640_v62 = vsel %vm395_vm0, %v2699_v42, %v2205_v12 }
 0x9b7   : > { %v1643_v20 = vsel %vm485_vm1, %v1635_v34, %v2214_v33  ;;  %v1644_v41 = vsel %vm485_vm1, %v1636_v45, %v2215_v48 }
 0x9b8   : > { %v2223_v36 = vpop.permute.xlu1 %2222 }
 0x9b9   : > { %v2225_v58 = vunpack.i.h.bf16 %v2223_v36  ;;  %v2224_v8 = vunpack.i.l.bf16 %v2223_v36 }
 0xa80   : > { %v2137_v15 = vpop.f32.mrb[24].mxu0 }
 0xa81   : > { %v1506_v52 = vpop.f32.mrb[25].mxu0 }
 0xa82   : > { %v2138_v24 = vpop.f32.mrb[26].mxu0 }
 0xa83   : > { %v2226_v13 = vpack.i.bf16 %v2138_v24, %v2137_v15  ;;  %v1509_v22 = vpop.f32.mrb[27].mxu0  ;;  %v1639_v15 = vsel %vm395_vm0, %v2695_v38, %v2204_v57 }
 0xa84   : > { %v2231_v26 = vpack.i.bf16 %v1509_v22, %v1506_v52  ;;  %v1647_v22 = vsel %vm485_vm1, %v1639_v15, %v2224_v8 }
 0xa85   : > { %2227 = vrot.lane.b32.xlu1 %v2226_v13, %s2425_s24 }
 0xa86   : > { %2232 = vrot.lane.b32.xlu0 %v2231_v26, %s2425_s24  ;;  %v1648_v26 = vsel %vm485_vm1, %v1640_v62, %v2225_v58 }
 0xa88   : > { %v2141_v29 = vpop.f32.mrb[28].mxu0 }
 0xa89   : > { %v1522_v14 = vpop.f32.mrb[29].mxu0 }
 0xa8a   : > { %v2142_v6 = vpop.f32.mrb[30].mxu0 }
 0xa8b   : > { %v2241_v32 = vpack.i.bf16 %v2142_v6, %v2141_v29  ;;  %v1525_v25 = vpop.f32.mrb[31].mxu0 }
 0xa8c   : > { %v2236_v9 = vpack.i.bf16 %v1525_v25, %v1522_v14  ;;  %v1646_v14 = vsel %vm485_vm1, %v1638_v10, %v2220_v18 }
 0xa8d   : > { %2242 = vrot.lane.b32.xlu1 %v2241_v32, %s2425_s24 }
 0xa8e   : > { %2237 = vrot.lane.b32.xlu0 %v2236_v9, %s2425_s24 }
 0xaf7   : > { %v2228_v49 = vpop.permute.xlu1 %2227 }
 0xaf8   : > { %v2230_v30 = vunpack.i.h.bf16 %v2228_v49  ;;  %v2229_v5 = vunpack.i.l.bf16 %v2228_v49  ;;  %v2233_v27 = vpop.permute.xlu0 %2232 }
 0xaf9   : > { %v2235_v2 = vunpack.i.h.bf16 %v2233_v27  ;;  %v2234_v7 = vunpack.i.l.bf16 %v2233_v27 }
 0xafa   : > { %v1653_v17 = vsel %vm1649_vm2, %v1644_v41, %v2230_v30  ;;  %v1652_v40 = vsel %vm1649_vm2, %v1643_v20, %v2229_v5 }
 0xafb   : > { %v1936_v60 = vpack.c.bf16 %v1653_v17, %v1652_v40  ;;  %v1650_v28 = vsel %vm1649_vm2, %v1641_v19, %v2234_v7  ;;  %v1651_v23 = vsel %vm1649_vm2, %v1642_v4, %v2235_v2 }
 0xafc   : > { %v1931_v51 = vpack.c.bf16 %v1651_v23, %v1650_v28 }
 0xafd   : > { %1948 = vst [vmem:[%s3055_s23 + $0x8] sm:$0xff] %v1936_v60  }
 0xafe   : > { %1932 = vst [vmem:[%s3055_s23] sm:$0xff] %v1931_v51  }
 0xaff   : > { %v2243_v59 = vpop.permute.xlu1 %2242 }
 0xb00   : > { %v2245_v52 = vunpack.i.h.bf16 %v2243_v59  ;;  %v2244_v24 = vunpack.i.l.bf16 %v2243_v59  ;;  %v2238_v13 = vpop.permute.xlu0 %2237 }
 0xb01   : > { %v2240_v43 = vunpack.i.h.bf16 %v2238_v13  ;;  %v2239_v29 = vunpack.i.l.bf16 %v2238_v13 }
 0xb02   : > { %v1657_v42 = vsel %vm1649_vm2, %v1648_v26, %v2245_v52  ;;  %v1656_v6 = vsel %vm1649_vm2, %v1647_v22, %v2244_v24 }
 0xb03   : > { %v1946_v38 = vpack.c.bf16 %v1657_v42, %v1656_v6  ;;  %v1654_v32 = vsel %vm1649_vm2, %v1645_v39, %v2239_v29  ;;  %v1655_v25 = vsel %vm1649_vm2, %v1646_v14, %v2240_v43 }
 0xb04   : > { %v1941_v9 = vpack.c.bf16 %v1655_v25, %v1654_v32 }
 0xb05   : > { %1950 = vst [vmem:[%s3055_s23 + $0x18] sm:$0xff] %v1946_v38  }
 0xb06   : > { %1949 = vst [vmem:[%s3055_s23 + $0x10] sm:$0xff] %v1941_v9  }
 0xb07 PF: > { %s14_s17 = sadd.s32 1, %s2423_s17   ;;  %s3095_s15 = smov %s2419_s16 }
 0xb08   : > { %p11_p5 = scmp.ge.s32.totalorder %s14_s17, 4   ;;  %s3096_s16 = smov %s3098_s18 }
 0xb0a   :  { %13 = sbr.rel (!%p11_p5) target bundleno = 2 (0x2), region = 75 }

// kernel: window_attention4_forward.3
= control target key start
LH: loop header
LB: loop body
LE: loop exit
PB: predicated region body
PF: predicated region fallthrough
CT: control target
= control target key end

     0   :  { %s2598_s18 = smov 0   ;;  %s3180_s0 = inlined_call_operand.vmem [shape: f32[128,768], index: 0, kind: input, shape index: {}]   ;;  %s3181_s1 = inlined_call_operand.vmem [shape: f32[128,768], index: 1, kind: input, shape index: {}]   ;;  %s3182_s2 = inlined_call_operand.vmem [shape: bf16[768,128], index: 2, kind: input, shape index: {}]   ;;  %s3183_s3 = inlined_call_operand.vmem [shape: bf16[768,256], index: 3, kind: input, shape index: {}]   ;;  %s3184_s4 = inlined_call_operand.vmem [shape: bf16[128,128], index: 4, kind: output, shape index: {0}]   ;;  %s3185_s5 = inlined_call_operand.vmem [shape: bf16[128,256], index: 5, kind: output, shape index: {1}]  }
   0x1 LB: > { %s1991_s19 = sadd.s32 4294967295, %s2566_s18   ;;  %p1995_p0 = scmp.ge.s32.totalorder %s2566_s18, 1  ;;  %s2566_s18 = sphi %s2598_s18, %s16_s18  }
   0x2   : > { %p204_p1 = scmp.lt.s32.totalorder %s2566_s18, 3 }
   0x4   : > { %p205_p2 = pnand %p1995_p0, %p204_p1 }
   0x5   : > { %v2368_v0 = vld [vmem:[%s3182_s2 + $0x40] sm:$0xff] (!%p205_p2)   ;;  %v2372_v4 = vld [vmem:[%s3182_s2 + $0x48] sm:$0xff] (!%p205_p2)   ;;  %v2376_v8 = vld [vmem:[%s3182_s2 + $0x50] sm:$0xff] (!%p205_p2)   ;;  %s1996_s27 = sshll.u32 (!%p205_p2), %s1991_s19, 3 }
   0x6   : > { %208 = sbr.rel (%p205_p2) target bundleno = 412 (0x19c), region = 36  ;;  %v2369_v1 = vld [vmem:[%s3182_s2 + $0xc0] sm:$0xff] (!%p205_p2)   ;;  %2207 = vmatprep.subr.bf16.mxu0 (!%p205_p2), %v2368_v0  ;;  %v2373_v5 = vld [vmem:[%s3182_s2 + $0xc8] sm:$0xff] (!%p205_p2)   ;;  %v2377_v9 = vld [vmem:[%s3182_s2 + $0xd0] sm:$0xff] (!%p205_p2)   ;;  %p246_p3 = scmp.lt.s32.totalorder (!%p205_p2), %s1996_s27, 15 }
   0x7   : > { %v2370_v2 = vld [vmem:[%s3182_s2] sm:$0xff] (!%p205_p2)   ;;  %2247 = vmatprep.subr.bf16.mxu1 (!%p205_p2), %v2369_v1  ;;  %v2374_v6 = vld [vmem:[%s3182_s2 + $0x8] sm:$0xff] (!%p205_p2)   ;;  %v2378_v10 = vld [vmem:[%s3182_s2 + $0x10] sm:$0xff] (!%p205_p2)  }
   0x8   : > { %v2371_v3 = vld [vmem:[%s3182_s2 + $0x80] sm:$0xff] (!%p205_p2)   ;;  %2208 = vmatpush3.bf16.msra.mxu0 (!%p205_p2), %v2370_v2  ;;  %v2375_v7 = vld [vmem:[%s3182_s2 + $0x88] sm:$0xff] (!%p205_p2)   ;;  %v2379_v11 = vld [vmem:[%s3182_s2 + $0x90] sm:$0xff] (!%p205_p2)  }
   0x9   : > { %2248 = vmatpush3.bf16.msra.mxu1 (!%p205_p2), %v2371_v3  ;;  %2209 = vmatprep.subr.bf16.mxu0 (!%p205_p2), %v2372_v4  ;;  %v2380_v12 = vld [vmem:[%s3182_s2 + $0x58] sm:$0xff] (!%p205_p2)   ;;  %v2384_v16 = vld [vmem:[%s3182_s2 + $0x60] sm:$0xff] (!%p205_p2)   ;;  %v2388_v20 = vld [vmem:[%s3182_s2 + $0x68] sm:$0xff] (!%p205_p2)  }
   0xa   : > { %2249 = vmatprep.subr.bf16.mxu1 (!%p205_p2), %v2373_v5  ;;  %v2381_v13 = vld [vmem:[%s3182_s2 + $0xd8] sm:$0xff] (!%p205_p2)   ;;  %v2385_v17 = vld [vmem:[%s3182_s2 + $0xe0] sm:$0xff] (!%p205_p2)   ;;  %v2389_v21 = vld [vmem:[%s3182_s2 + $0xe8] sm:$0xff] (!%p205_p2)  }
   0xb   : > { %v2382_v14 = vld [vmem:[%s3182_s2 + $0x18] sm:$0xff] (!%p205_p2)   ;;  %v2386_v18 = vld [vmem:[%s3182_s2 + $0x20] sm:$0xff] (!%p205_p2)   ;;  %v2390_v22 = vld [vmem:[%s3182_s2 + $0x28] sm:$0xff] (!%p205_p2)  }
   0xc   : > { %2210 = vmatpush3.bf16.msra.mxu0 (!%p205_p2), %v2374_v6  ;;  %v2383_v15 = vld [vmem:[%s3182_s2 + $0x98] sm:$0xff] (!%p205_p2)   ;;  %v2387_v19 = vld [vmem:[%s3182_s2 + $0xa0] sm:$0xff] (!%p205_p2)   ;;  %v2391_v23 = vld [vmem:[%s3182_s2 + $0xa8] sm:$0xff] (!%p205_p2)  }
   0xd   : > { %2250 = vmatpush3.bf16.msra.mxu1 %v2375_v7  ;;  %2211 = vmatprep.subr.bf16.mxu0 %v2376_v8  ;;  %s3187_s27 = smov (!%p246_p3, %s1996_s27), 15  ;;  %v2392_v24 = vld [vmem:[%s3182_s2 + $0x70] sm:$0xff]   ;;  %v2396_v28 = vld [vmem:[%s3182_s2 + $0x78] sm:$0xff]   ;;  %v2400_v44 = vld [vmem:[%s3182_s2 + $0x140] sm:$0xff]  }
   0xe   : > { %2251 = vmatprep.subr.bf16.mxu1 %v2377_v9  ;;  %v2393_v25 = vld [vmem:[%s3182_s2 + $0xf0] sm:$0xff]   ;;  %s2359_s26 = smul.u32 48, %s3187_s27  ;;  %v2397_v29 = vld [vmem:[%s3182_s2 + $0xf8] sm:$0xff]   ;;  %v2401_v45 = vld [vmem:[%s3183_s3 + $0x100] ss:$8 sps:$4 sm:$0xff]   ;;  %s2167_s8 = sshll.u32 %s3187_s27, 3 }
   0xf   : > { %v2394_v26 = vld [vmem:[%s3182_s2 + $0x30] sm:$0xff]   ;;  %v2398_v30 = vld [vmem:[%s3182_s2 + $0x38] sm:$0xff]   ;;  %v2403_v46 = vld [vmem:[%s3183_s3 + $0x104] ss:$8 sps:$4 sm:$0xff]   ;;  %s3167_s19 = scalar_lea.vmem %s3185_s5, %s2167_s8 }
  0x10   : > { %2212 = vmatpush3.bf16.msra.mxu0 %v2378_v10  ;;  %v2395_v27 = vld [vmem:[%s3182_s2 + $0xb0] sm:$0xff]   ;;  %s2706_s12 = scalar_lea.vmem %s3180_s0, %s2359_s26  ;;  %v2399_v31 = vld [vmem:[%s3182_s2 + $0xb8] sm:$0xff]   ;;  %v2404_v47 = vld [vmem:[%s3182_s2 + $0x100] sm:$0xff]   ;;  %s2891_s21 = scalar_lea.vmem %s3181_s1, %s2359_s26 }
  0x11   : > { %2252 = vmatpush3.bf16.msra.mxu1 %v2379_v11  ;;  %2213 = vmatprep.subr.bf16.mxu0 %v2380_v12  ;;  %v274_v32 = vld [vmem:[%s2706_s12 + $0x8] sm:$0xff]  ;;  %v280_v33 = vld [vmem:[%s2706_s12 + $0x38] sm:$0xff]  ;;  %v273_v37 = vld [vmem:[%s2706_s12] sm:$0xff] }
  0x12   : > { %2253 = vmatprep.subr.bf16.mxu1 %v2381_v13  ;;  %v276_v34 = vld [vmem:[%s2706_s12 + $0x18] sm:$0xff]  ;;  %v322_v35 = vpack.c.bf16 %v280_v33, %v274_v32  ;;  %v282_v36 = vld [vmem:[%s2706_s12 + $0x48] sm:$0xff]  ;;  %v279_v38 = vld [vmem:[%s2706_s12 + $0x30] sm:$0xff] }
  0x13   : > { %v324_v39 = vpack.c.bf16 %v282_v36, %v276_v34  ;;  %v321_v40 = vpack.c.bf16 %v279_v38, %v273_v37  ;;  %v275_v41 = vld [vmem:[%s2706_s12 + $0x10] sm:$0xff]  ;;  %v281_v42 = vld [vmem:[%s2706_s12 + $0x40] sm:$0xff]  ;;  %v2405_v48 = vld [vmem:[%s3182_s2 + $0x148] sm:$0xff]  }
  0x14   : > { %2214 = vmatpush3.bf16.msra.mxu0 %v2382_v14  ;;  %833 = vmatprep.mubr.bf16.mxu0 %v322_v35  ;;  %v323_v43 = vpack.c.bf16 %v281_v42, %v275_v41  ;;  %v2406_v49 = vld [vmem:[%s3183_s3 + $0x110] ss:$8 sps:$4 sm:$0xff]   ;;  %v2408_v50 = vld [vmem:[%s3183_s3 + $0x114] ss:$8 sps:$4 sm:$0xff]   ;;  %v2409_v51 = vld [vmem:[%s3182_s2 + $0x108] sm:$0xff]  }
  0x15   : > { %2254 = vmatpush3.bf16.msra.mxu1 %v2383_v15  ;;  %2215 = vmatprep.subr.bf16.mxu0 %v2384_v16  ;;  %v286_v52 = vld [vmem:[%s2706_s12 + $0x68] sm:$0xff]  ;;  %v292_v53 = vld [vmem:[%s2706_s12 + $0x98] sm:$0xff]  ;;  %v285_v55 = vld [vmem:[%s2706_s12 + $0x60] sm:$0xff] }
  0x16   : > { %2255 = vmatprep.subr.bf16.mxu1 %v2385_v17  ;;  %898 = vmatprep.mubr.bf16.mxu1 %v324_v39  ;;  %v328_v54 = vpack.c.bf16 %v292_v53, %v286_v52  ;;  %v291_v56 = vld [vmem:[%s2706_s12 + $0x90] sm:$0xff]  ;;  %v2411_v59 = vld [vmem:[%s3183_s3 + $0x120] ss:$8 sps:$4 sm:$0xff]   ;;  %v2413_v60 = vld [vmem:[%s3183_s3 + $0x124] ss:$8 sps:$4 sm:$0xff]  }
  0x17   : > { %v327_v57 = vpack.c.bf16 %v291_v56, %v285_v55  ;;  %v2410_v58 = vld [vmem:[%s3182_s2 + $0x150] sm:$0xff]   ;;  %v2415_v62 = vld [vmem:[%s3182_s2 + $0x158] sm:$0xff]   ;;  %v298_v2 = vld [vmem:[%s2706_s12 + $0xc8] sm:$0xff] }
  0x18   : > { %2216 = vmatpush3.bf16.msra.mxu0 %v2386_v18  ;;  %v2414_v61 = vld [vmem:[%s3182_s2 + $0x110] sm:$0xff]   ;;  %v2419_v1 = vld [vmem:[%s3182_s2 + $0x118] sm:$0xff]   ;;  %v297_v5 = vld [vmem:[%s2706_s12 + $0xc0] sm:$0xff] }
  0x19   : > { %2256 = vmatpush3.bf16.msra.mxu1 %v2387_v19  ;;  %2217 = vmatprep.subr.bf16.mxu0 %v2388_v20  ;;  %v2416_v63 = vld [vmem:[%s3183_s3 + $0x130] ss:$8 sps:$4 sm:$0xff]   ;;  %v2418_v0 = vld [vmem:[%s3183_s3 + $0x134] ss:$8 sps:$4 sm:$0xff]   ;;  %v2420_v8 = vld [vmem:[%s3182_s2 + $0x160] sm:$0xff]  }
  0x1a   : > { %2257 = vmatprep.subr.bf16.mxu1 %v2389_v21  ;;  %v304_v3 = vld [vmem:[%s2706_s12 + $0xf8] sm:$0xff]  ;;  %v303_v6 = vld [vmem:[%s2706_s12 + $0xf0] sm:$0xff]  ;;  %v2421_v9 = vld [vmem:[%s3183_s3 + $0x140] ss:$8 sps:$4 sm:$0xff]  }
  0x1b   : > { %v334_v4 = vpack.c.bf16 %v304_v3, %v298_v2  ;;  %v333_v7 = vpack.c.bf16 %v303_v6, %v297_v5  ;;  %v2423_v10 = vld [vmem:[%s3183_s3 + $0x144] ss:$8 sps:$4 sm:$0xff]   ;;  %v2426_v13 = vld [vmem:[%s3183_s3 + $0x150] ss:$8 sps:$4 sm:$0xff]   ;;  %v2428_v14 = vld [vmem:[%s3183_s3 + $0x154] ss:$8 sps:$4 sm:$0xff]  }
  0x1c   : > { %2218 = vmatpush3.bf16.msra.mxu0 %v2390_v22  ;;  %v2424_v11 = vld [vmem:[%s3182_s2 + $0x120] sm:$0xff]   ;;  %v2425_v12 = vld [vmem:[%s3182_s2 + $0x168] sm:$0xff]   ;;  %v316_v17 = vld [vmem:[%s2706_s12 + $0x158] sm:$0xff] }
  0x1d   : > { %2258 = vmatpush3.bf16.msra.mxu1 %v2391_v23  ;;  %2219 = vmatprep.subr.bf16.mxu0 %v2392_v24  ;;  %v2429_v15 = vld [vmem:[%s3182_s2 + $0x128] sm:$0xff]   ;;  %v309_v19 = vld [vmem:[%s2706_s12 + $0x120] sm:$0xff]  ;;  %v315_v20 = vld [vmem:[%s2706_s12 + $0x150] sm:$0xff] }
  0x1e   : > { %2259 = vmatprep.subr.bf16.mxu1 %v2393_v25  ;;  %v310_v16 = vld [vmem:[%s2706_s12 + $0x128] sm:$0xff]  ;;  %v339_v21 = vpack.c.bf16 %v315_v20, %v309_v19  ;;  %v2430_v22 = vld [vmem:[%s3182_s2 + $0x170] sm:$0xff]   ;;  %v277_v33 = vld [vmem:[%s2706_s12 + $0x20] sm:$0xff] }
  0x1f   : > { %v340_v18 = vpack.c.bf16 %v316_v17, %v310_v16  ;;  %v2431_v23 = vld [vmem:[%s3183_s3 + $0x160] ss:$8 sps:$4 sm:$0xff]   ;;  %v2433_v24 = vld [vmem:[%s3183_s3 + $0x164] ss:$8 sps:$4 sm:$0xff]   ;;  %v2434_v25 = vld [vmem:[%s3182_s2 + $0x130] sm:$0xff]  }
  0x20   : > { %2220 = vmatpush3.bf16.msra.mxu0 %v2394_v26  ;;  %v2435_v26 = vld [vmem:[%s3182_s2 + $0x178] sm:$0xff]   ;;  %v283_v34 = vld [vmem:[%s2706_s12 + $0x50] sm:$0xff]  ;;  %v2440_v36 = vld [vmem:[%s3183_s3 + $0x180] ss:$8 sps:$4 sm:$0xff]  }
  0x21   : > { %2260 = vmatpush3.bf16.msra.mxu1 %v2395_v27  ;;  %2221 = vmatprep.subr.bf16.mxu0 %v2396_v28  ;;  %v2436_v27 = vld [vmem:[%s3183_s3 + $0x170] ss:$8 sps:$4 sm:$0xff]   ;;  %v2438_v28 = vld [vmem:[%s3183_s3 + $0x174] ss:$8 sps:$4 sm:$0xff]   ;;  %v325_v35 = vpack.c.bf16 %v283_v34, %v277_v33  ;;  %v2442_v37 = vld [vmem:[%s3183_s3 + $0x184] ss:$8 sps:$4 sm:$0xff]  }
  0x22   : > { %2261 = vmatprep.subr.bf16.mxu1 %v2397_v29  ;;  %v2439_v29 = vld [vmem:[%s3182_s2 + $0x138] sm:$0xff]   ;;  %v294_v41 = vld [vmem:[%s2706_s12 + $0xa8] sm:$0xff]  ;;  %v299_v56 = vld [vmem:[%s2706_s12 + $0xd0] sm:$0xff] }
  0x23   : > { %v2443_v38 = vld [vmem:[%s3183_s3 + $0x190] ss:$8 sps:$4 sm:$0xff]   ;;  %v2445_v39 = vld [vmem:[%s3183_s3 + $0x194] ss:$8 sps:$4 sm:$0xff]   ;;  %v2446_v53 = vld [vmem:[%s3183_s3 + $0x1a0] ss:$8 sps:$4 sm:$0xff]  }
  0x24   : > { %2222 = vmatpush3.bf16.msra.mxu0 %v2398_v30  ;;  %v278_v30 = vld [vmem:[%s2706_s12 + $0x28] sm:$0xff]  ;;  %v307_v2 = vld [vmem:[%s2706_s12 + $0x110] sm:$0xff]  ;;  %v313_v17 = vld [vmem:[%s2706_s12 + $0x140] sm:$0xff] }
  0x25   : > { %2262 = vmatpush3.bf16.msra.mxu1 %v2399_v31  ;;  %2287 = vmatprep.subr.bf16.mxu0 %v2400_v44  ;;  %v284_v31 = vld [vmem:[%s2706_s12 + $0x58] sm:$0xff]  ;;  %v293_v44 = vld [vmem:[%s2706_s12 + $0xa0] sm:$0xff]  ;;  %v306_v55 = vld [vmem:[%s2706_s12 + $0x108] sm:$0xff] }
  0x26   : > { %1685 = vmatprep.subr.bf16.mxu1 %v2403_v46  ;;  %v326_v32 = vpack.c.bf16 %v284_v31, %v278_v30  ;;  %v2454_v3 = vld [vmem:[%s3183_s3 + $0x1c4] ss:$8 sps:$4 sm:$0xff]   ;;  %v2464_v19 = vld [vmem:[%s3183_s3] ss:$8 sps:$4 sm:$0xff]   ;;  %v347_v33 = vld [vmem:[%s2891_s21 + $0x10] sm:$0xff] }
  0x27   : > { %834 = vmatmul.mubr.bf16.vlgmr.msra.gmra.mrb[0].mxu0 %v321_v40  ;;  %v288_v40 = vld [vmem:[%s2706_s12 + $0x78] sm:$0xff]  ;;  %v318_v5 = vld [vmem:[%s2706_s12 + $0x168] sm:$0xff]  ;;  %v353_v34 = vld [vmem:[%s2891_s21 + $0x40] sm:$0xff] }
  0x28   : > { %899 = vmatmul.mubr.bf16.vlgmr.msra.gmra.mrb[0].mxu1 %v323_v43  ;;  %2288 = vmatpush3.bf16.msra.mxu0 %v2404_v47  ;;  %v330_v42 = vpack.c.bf16 %v294_v41, %v288_v40  ;;  %v287_v43 = vld [vmem:[%s2706_s12 + $0x70] sm:$0xff]  ;;  %v296_v47 = vld [vmem:[%s2706_s12 + $0xb8] sm:$0xff]  ;;  %v2466_v20 = vld [vmem:[%s3183_s3 + $0x4] ss:$8 sps:$4 sm:$0xff]  }
  0x29   : > { %1686 = vmatpush1.bf16.msra.mxu1 %v2401_v45  ;;  %2289 = vmatprep.subr.bf16.mxu0 %v2405_v48  ;;  %v290_v45 = vld [vmem:[%s2706_s12 + $0x88] sm:$0xff]  ;;  %v329_v46 = vpack.c.bf16 %v293_v44, %v287_v43  ;;  %v289_v48 = vld [vmem:[%s2706_s12 + $0x80] sm:$0xff]  ;;  %v2475_v41 = vld [vmem:[%s3183_s3 + $0x214] ss:$8 sps:$4 sm:$0xff]  }
  0x2a   : > { %1687 = vmatprep.subr.bf16.mxu1 %v2408_v50  ;;  %841 = vmatprep.mubr.bf16.mxu0 %v328_v54  ;;  %v332_v50 = vpack.c.bf16 %v296_v47, %v290_v45  ;;  %v300_v54 = vld [vmem:[%s2706_s12 + $0xd8] sm:$0xff]  ;;  %v2476_v30 = vld [vmem:[%s3183_s3 + $0x20] ss:$8 sps:$4 sm:$0xff]   ;;  %v2478_v31 = vld [vmem:[%s3183_s3 + $0x24] ss:$8 sps:$4 sm:$0xff]  }
  0x2b   : > { %906 = vmatprep.mubr.bf16.mxu1 %v330_v42  ;;  %v2467_v40 = vld [vmem:[%s3183_s3 + $0x200] ss:$8 sps:$4 sm:$0xff]   ;;  %v2496_v43 = vld [vmem:[%s3183_s3 + $0x54] ss:$8 sps:$4 sm:$0xff]   ;;  %v2473_v44 = vld [vmem:[%s3183_s3 + $0x210] ss:$8 sps:$4 sm:$0xff]  }
  0x2c   : > { %2290 = vmatpush3.bf16.msra.mxu0 %v2409_v51  ;;  %v2448_v51 = vld [vmem:[%s3183_s3 + $0x1a4] ss:$8 sps:$4 sm:$0xff]   ;;  %v2488_v42 = vld [vmem:[%s3183_s3 + $0x40] ss:$8 sps:$4 sm:$0xff]  }
  0x2d   : > { %1688 = vmatpush1.bf16.msra.mxu1 %v2406_v49  ;;  %2291 = vmatprep.subr.bf16.mxu0 %v2410_v58  ;;  %v295_v49 = vld [vmem:[%s2706_s12 + $0xb0] sm:$0xff]  ;;  %v2481_v45 = vld [vmem:[%s3183_s3 + $0x224] ss:$8 sps:$4 sm:$0xff]  }
  0x2e   : > { %1689 = vmatprep.subr.bf16.mxu1 %v2413_v60  ;;  %v331_v52 = vpack.c.bf16 %v295_v49, %v289_v48  ;;  %v2451_v58 = vld [vmem:[%s3183_s3 + $0x1b4] ss:$8 sps:$4 sm:$0xff]   ;;  %v302_v60 = vld [vmem:[%s2706_s12 + $0xe8] sm:$0xff] }
  0x2f   : > { %842 = vmatmul.mubr.bf16.gmra.mrb[4].mxu0 %v327_v57  ;;  %v305_v57 = vld [vmem:[%s2706_s12 + $0x100] sm:$0xff]  ;;  %v2487_v49 = vld [vmem:[%s3183_s3 + $0x234] ss:$8 sps:$4 sm:$0xff]  }
  0x30   : > { %2292 = vmatpush3.bf16.msra.mxu0 %v2414_v61  ;;  %849 = vmatprep.mubr.bf16.mxu0 %v334_v4  ;;  %v308_v61 = vld [vmem:[%s2706_s12 + $0x118] sm:$0xff]  ;;  %v2502_v47 = vld [vmem:[%s3183_s3 + $0x64] ss:$8 sps:$4 sm:$0xff]   ;;  %v2479_v48 = vld [vmem:[%s3183_s3 + $0x220] ss:$8 sps:$4 sm:$0xff]  }
  0x31   : > { %1690 = vmatpush1.bf16.msra.mxu1 %v2411_v59  ;;  %2293 = vmatprep.subr.bf16.mxu0 %v2415_v62  ;;  %v336_v59 = vpack.c.bf16 %v306_v55, %v300_v54  ;;  %v335_v62 = vpack.c.bf16 %v305_v57, %v299_v56  ;;  %v312_v4 = vld [vmem:[%s2706_s12 + $0x138] sm:$0xff]  ;;  %v2491_v55 = vld [vmem:[%s3183_s3 + $0x240] ss:$8 sps:$4 sm:$0xff]   ;;  %v2514_v56 = vld [vmem:[%s3183_s3 + $0x84] ss:$8 sps:$4 sm:$0xff]  }
  0x32   : > { %1691 = vmatprep.subr.bf16.mxu1 %v2418_v0  ;;  %907 = vmatmul.mubr.bf16.gmra.mrb[4].mxu1 %v329_v46  ;;  %v2449_v0 = vld [vmem:[%s3183_s3 + $0x1b0] ss:$8 sps:$4 sm:$0xff]   ;;  %v342_v6 = vpack.c.bf16 %v318_v5, %v312_v4  ;;  %v2526_v5 = vld [vmem:[%s3183_s3 + $0xa4] ss:$8 sps:$4 sm:$0xff]  }
  0x33   : > { %914 = vmatprep.mubr.bf16.mxu1 %v336_v59  ;;  %v2494_v46 = vld [vmem:[%s3183_s3 + $0x50] ss:$8 sps:$4 sm:$0xff]  }
  0x34   : > { %2294 = vmatpush3.bf16.msra.mxu0 %v2419_v1  ;;  %v301_v1 = vld [vmem:[%s2706_s12 + $0xe0] sm:$0xff]  ;;  %v2506_v54 = vld [vmem:[%s3183_s3 + $0x70] ss:$8 sps:$4 sm:$0xff]  }
  0x35   : > { %1692 = vmatpush1.bf16.msra.mxu1 %v2416_v63  ;;  %2295 = vmatprep.subr.bf16.mxu0 %v2420_v8  ;;  %v338_v63 = vpack.c.bf16 %v308_v61, %v302_v60  ;;  %v320_v8 = vld [vmem:[%s2706_s12 + $0x178] sm:$0xff]  ;;  %v359_v59 = vld [vmem:[%s2891_s21 + $0x70] sm:$0xff]  ;;  %v365_v60 = vld [vmem:[%s2891_s21 + $0xa0] sm:$0xff] }
  0x36   : > { %1693 = vmatprep.subr.bf16.mxu1 %v2423_v10  ;;  %v311_v10 = vld [vmem:[%s2706_s12 + $0x130] sm:$0xff]  ;;  %v360_v57 = vld [vmem:[%s2891_s21 + $0x78] sm:$0xff] }
  0x37   : > { %850 = vmatmul.mubr.bf16.gmra.mrb[8].mxu0 %v333_v7  ;;  %v314_v7 = vld [vmem:[%s2706_s12 + $0x148] sm:$0xff]  ;;  %v2499_v61 = vld [vmem:[%s3183_s3 + $0x254] ss:$8 sps:$4 sm:$0xff]   ;;  %v2518_v4 = vld [vmem:[%s3183_s3 + $0x90] ss:$8 sps:$4 sm:$0xff]  }
  0x38   : > { %2296 = vmatpush3.bf16.msra.mxu0 %v2424_v11  ;;  %857 = vmatprep.mubr.bf16.mxu0 %v340_v18  ;;  %v317_v11 = vld [vmem:[%s2706_s12 + $0x160] sm:$0xff]  ;;  %v319_v18 = vld [vmem:[%s2706_s12 + $0x170] sm:$0xff] }
  0x39   : > { %1694 = vmatpush1.bf16.msra.mxu1 %v2421_v9  ;;  %2297 = vmatprep.subr.bf16.mxu0 %v2425_v12  ;;  %v337_v9 = vpack.c.bf16 %v307_v2, %v301_v1  ;;  %v2452_v12 = vld [vmem:[%s3183_s3 + $0x1c0] ss:$8 sps:$4 sm:$0xff]   ;;  %v341_v16 = vpack.c.bf16 %v317_v11, %v311_v10  ;;  %v2520_v1 = vld [vmem:[%s3183_s3 + $0x94] ss:$8 sps:$4 sm:$0xff]   ;;  %v2497_v2 = vld [vmem:[%s3183_s3 + $0x250] ss:$8 sps:$4 sm:$0xff]  }
  0x3a   : > { %1695 = vmatprep.subr.bf16.mxu1 %v2428_v14  ;;  %915 = vmatmul.mubr.bf16.gmra.mrb[8].mxu1 %v335_v62  ;;  %v2457_v14 = vld [vmem:[%s3183_s3 + $0x1d4] ss:$8 sps:$4 sm:$0xff]   ;;  %v377_v10 = vld [vmem:[%s2891_s21 + $0x100] sm:$0xff] }
  0x3b   : > { %922 = vmatprep.mubr.bf16.mxu1 %v342_v6  ;;  %v372_v6 = vld [vmem:[%s2891_s21 + $0xd8] sm:$0xff]  ;;  %v2503_v11 = vld [vmem:[%s3183_s3 + $0x260] ss:$8 sps:$4 sm:$0xff]  }
  0x3c   : > { %2298 = vmatpush3.bf16.msra.mxu0 %v2429_v15  ;;  %v2455_v15 = vld [vmem:[%s3183_s3 + $0x1d0] ss:$8 sps:$4 sm:$0xff]  }
  0x3d   : > { %1696 = vmatpush1.bf16.msra.mxu1 %v2426_v13  ;;  %2299 = vmatprep.subr.bf16.mxu0 %v2430_v22  ;;  %v344_v13 = vpack.c.bf16 %v320_v8, %v314_v7  ;;  %v354_v22 = vld [vmem:[%s2891_s21 + $0x48] sm:$0xff] }
  0x3e   : > { %1697 = vmatprep.subr.bf16.mxu1 %v2433_v24  ;;  %v378_v7 = vld [vmem:[%s2891_s21 + $0x108] sm:$0xff] }
  0x3f   : > { %858 = vmatmul.mubr.bf16.gmra.mrb[12].mxu0 %v339_v21  ;;  %v348_v21 = vld [vmem:[%s2891_s21 + $0x18] sm:$0xff]  ;;  %v408_v8 = vpack.c.bf16 %v378_v7, %v372_v6  ;;  %v369_v6 = vld [vmem:[%s2891_s21 + $0xc0] sm:$0xff]  ;;  %v375_v7 = vld [vmem:[%s2891_s21 + $0xf0] sm:$0xff] }
  0x40   : > { %2300 = vmatpush3.bf16.msra.mxu0 %v2434_v25  ;;  %963 = vmatprep.mubr.bf16.mxu0 %v326_v32  ;;  %v396_v24 = vpack.c.bf16 %v354_v22, %v348_v21  ;;  %v2470_v25 = vld [vmem:[%s3183_s3 + $0x10] ss:$8 sps:$4 sm:$0xff]  }
  0x41   : > { %1698 = vmatpush1.bf16.msra.mxu1 %v2431_v23  ;;  %2301 = vmatprep.subr.bf16.mxu0 %v2435_v26  ;;  %v2460_v23 = vld [vmem:[%s3183_s3 + $0x1e4] ss:$8 sps:$4 sm:$0xff]   ;;  %v2472_v26 = vld [vmem:[%s3183_s3 + $0x14] ss:$8 sps:$4 sm:$0xff]   ;;  %v2461_v32 = vld [vmem:[%s3183_s3 + $0x1f0] ss:$8 sps:$4 sm:$0xff]  }
  0x42   : > { %1699 = vmatprep.subr.bf16.mxu1 %v2438_v28  ;;  %923 = vmatmul.mubr.bf16.gmra.mrb[12].mxu1 %v341_v16  ;;  %v2458_v28 = vld [vmem:[%s3183_s3 + $0x1e0] ss:$8 sps:$4 sm:$0xff]   ;;  %v2532_v16 = vld [vmem:[%s3183_s3 + $0xb4] ss:$8 sps:$4 sm:$0xff]  }
  0x43   : > { %1717 = vmatprep.mubr.bf16.mxu1 %v396_v24  ;;  %v383_v21 = vld [vmem:[%s2891_s21 + $0x130] sm:$0xff]  ;;  %v2538_v24 = vld [vmem:[%s3183_s3 + $0xc4] ss:$8 sps:$4 sm:$0xff]  }
  0x44   : > { %2302 = vmatpush3.bf16.msra.mxu0 %v2439_v29  ;;  %v2463_v29 = vld [vmem:[%s3183_s3 + $0x1f4] ss:$8 sps:$4 sm:$0xff]  }
  0x45   : > { %1700 = vmatpush1.bf16.msra.mxu1 %v2436_v27  ;;  %1612 = vmatprep.subr.bf16.mxu0 %v2466_v20  ;;  %v343_v27 = vpack.c.bf16 %v319_v18, %v313_v17  ;;  %v2517_v17 = vld [vmem:[%s3183_s3 + $0x284] ss:$8 sps:$4 sm:$0xff]   ;;  %v2530_v18 = vld [vmem:[%s3183_s3 + $0xb0] ss:$8 sps:$4 sm:$0xff]  }
  0x46   : > { %1701 = vmatprep.subr.bf16.mxu1 %v2442_v37  ;;  %v2482_v37 = vld [vmem:[%s3183_s3 + $0x30] ss:$8 sps:$4 sm:$0xff]   ;;  %v390_v20 = vld [vmem:[%s2891_s21 + $0x168] sm:$0xff] }
  0x47   : > { %964 = vmatmul.mubr.bf16.vlgmr.msra.gmra.mrb[16].mxu0 %v325_v35  ;;  %v2484_v35 = vld [vmem:[%s3183_s3 + $0x34] ss:$8 sps:$4 sm:$0xff]  }
  0x48   : > { %971 = vmatprep.mubr.bf16.mxu0 %v332_v50  ;;  %1613 = vmatpush1.bf16.msra.mxu0 %v2464_v19  ;;  %v2500_v50 = vld [vmem:[%s3183_s3 + $0x60] ss:$8 sps:$4 sm:$0xff]   ;;  %v384_v19 = vld [vmem:[%s2891_s21 + $0x138] sm:$0xff] }
  0x49   : > { %1702 = vmatpush1.bf16.msra.mxu1 %v2440_v36  ;;  %1614 = vmatprep.subr.bf16.mxu0 %v2472_v26  ;;  %v2469_v36 = vld [vmem:[%s3183_s3 + $0x204] ss:$8 sps:$4 sm:$0xff]   ;;  %v414_v22 = vpack.c.bf16 %v390_v20, %v384_v19  ;;  %v2523_v26 = vld [vmem:[%s3183_s3 + $0x294] ss:$8 sps:$4 sm:$0xff]  }
  0x4a   : > { %1703 = vmatprep.subr.bf16.mxu1 %v2445_v39  ;;  %v2490_v39 = vld [vmem:[%s3183_s3 + $0x44] ss:$8 sps:$4 sm:$0xff]   ;;  %v387_v19 = vld [vmem:[%s2891_s21 + $0x150] sm:$0xff] }
  0x4c   : > { %1615 = vmatpush1.bf16.msra.mxu0 %v2470_v25  ;;  %v2515_v25 = vld [vmem:[%s3183_s3 + $0x280] ss:$8 sps:$4 sm:$0xff]  }
  0x4d   : > { %1704 = vmatpush1.bf16.msra.mxu1 %v2443_v38  ;;  %1616 = vmatprep.subr.bf16.mxu0 %v2478_v31  ;;  %v395_v38 = vpack.c.bf16 %v353_v34, %v347_v33  ;;  %v350_v33 = vld [vmem:[%s2891_s21 + $0x28] sm:$0xff]  ;;  %v2521_v34 = vld [vmem:[%s3183_s3 + $0x290] ss:$8 sps:$4 sm:$0xff]  }
  0x4e   : > { %1705 = vmatprep.subr.bf16.mxu1 %v2448_v51  ;;  %v2508_v51 = vld [vmem:[%s3183_s3 + $0x74] ss:$8 sps:$4 sm:$0xff]  }
  0x4f   : > { %972 = vmatmul.mubr.bf16.gmra.mrb[20].mxu0 %v331_v52  ;;  %v2485_v52 = vld [vmem:[%s3183_s3 + $0x230] ss:$8 sps:$4 sm:$0xff]  }
  0x50   : > { %979 = vmatprep.mubr.bf16.mxu0 %v338_v63  ;;  %1617 = vmatpush1.bf16.msra.mxu0 %v2476_v30  ;;  %v401_v63 = vpack.c.bf16 %v365_v60, %v359_v59  ;;  %v2536_v30 = vld [vmem:[%s3183_s3 + $0xc0] ss:$8 sps:$4 sm:$0xff]   ;;  %v376_v60 = vld [vmem:[%s2891_s21 + $0xf8] sm:$0xff] }
  0x51   : > { %1706 = vmatpush1.bf16.msra.mxu1 %v2446_v53  ;;  %1618 = vmatprep.subr.bf16.mxu0 %v2484_v35  ;;  %v2493_v53 = vld [vmem:[%s3183_s3 + $0x244] ss:$8 sps:$4 sm:$0xff]   ;;  %v356_v35 = vld [vmem:[%s2891_s21 + $0x58] sm:$0xff] }
  0x52   : > { %1707 = vmatprep.subr.bf16.mxu1 %v2451_v58  ;;  %v366_v58 = vld [vmem:[%s2891_s21 + $0xa8] sm:$0xff] }
  0x53   : > { %v402_v62 = vpack.c.bf16 %v366_v58, %v360_v57  ;;  %v357_v57 = vld [vmem:[%s2891_s21 + $0x60] sm:$0xff]  ;;  %v363_v58 = vld [vmem:[%s2891_s21 + $0x90] sm:$0xff]  ;;  %v370_v59 = vld [vmem:[%s2891_s21 + $0xc8] sm:$0xff] }
  0x54   : > { %1619 = vmatpush1.bf16.msra.mxu0 %v2482_v37  ;;  %v398_v37 = vpack.c.bf16 %v356_v35, %v350_v33 }
  0x55   : > { %1708 = vmatpush1.bf16.msra.mxu1 %v2449_v0  ;;  %1620 = vmatprep.subr.bf16.mxu0 %v2490_v39  ;;  %v2512_v0 = vld [vmem:[%s3183_s3 + $0x80] ss:$8 sps:$4 sm:$0xff]   ;;  %v2550_v39 = vld [vmem:[%s3183_s3 + $0xe4] ss:$8 sps:$4 sm:$0xff]  }
  0x56   : > { %1709 = vmatprep.subr.bf16.mxu1 %v2454_v3  ;;  %v2505_v3 = vld [vmem:[%s3183_s3 + $0x264] ss:$8 sps:$4 sm:$0xff]  }
  0x57   : > { %980 = vmatmul.mubr.bf16.gmra.mrb[24].mxu0 %v337_v9  ;;  %v371_v9 = vld [vmem:[%s2891_s21 + $0xd0] sm:$0xff] }
  0x58   : > { %987 = vmatprep.mubr.bf16.mxu0 %v344_v13  ;;  %1621 = vmatpush1.bf16.msra.mxu0 %v2488_v42  ;;  %v407_v13 = vpack.c.bf16 %v377_v10, %v371_v9  ;;  %v2548_v42 = vld [vmem:[%s3183_s3 + $0xe0] ss:$8 sps:$4 sm:$0xff]   ;;  %v388_v10 = vld [vmem:[%s2891_s21 + $0x158] sm:$0xff] }
  0x59   : > { %1710 = vmatpush1.bf16.msra.mxu1 %v2452_v12  ;;  %1622 = vmatprep.subr.bf16.mxu0 %v2496_v43  ;;  %v2511_v12 = vld [vmem:[%s3183_s3 + $0x274] ss:$8 sps:$4 sm:$0xff]   ;;  %v382_v9 = vld [vmem:[%s2891_s21 + $0x128] sm:$0xff] }
  0x5a   : > { %1711 = vmatprep.subr.bf16.mxu1 %v2457_v14  ;;  %v2524_v14 = vld [vmem:[%s3183_s3 + $0xa0] ss:$8 sps:$4 sm:$0xff]   ;;  %v2556_v43 = vld [vmem:[%s3183_s3 + $0xf4] ss:$8 sps:$4 sm:$0xff]  }
  0x5c   : > { %1623 = vmatpush1.bf16.msra.mxu0 %v2494_v46  ;;  %v2554_v46 = vld [vmem:[%s3183_s3 + $0xf0] ss:$8 sps:$4 sm:$0xff]  }
  0x5d   : > { %1712 = vmatpush1.bf16.msra.mxu1 %v2455_v15  ;;  %1624 = vmatprep.subr.bf16.mxu0 %v2502_v47  ;;  %v2509_v15 = vld [vmem:[%s3183_s3 + $0x270] ss:$8 sps:$4 sm:$0xff]   ;;  %v345_v47 = vld [vmem:[%s2891_s21] sm:$0xff] }
  0x5e   : > { %1713 = vmatprep.subr.bf16.mxu1 %v2460_v23  ;;  %v389_v23 = vld [vmem:[%s2891_s21 + $0x160] sm:$0xff] }
  0x5f   : > { %988 = vmatmul.mubr.bf16.gmra.mrb[28].mxu0 %v343_v27  ;;  %v413_v27 = vpack.c.bf16 %v389_v23, %v383_v21  ;;  %v373_v23 = vld [vmem:[%s2891_s21 + $0xe0] sm:$0xff] }
  0x60   : > { %1625 = vmatpush1.bf16.msra.mxu0 %v2500_v50  ;;  %v364_v50 = vld [vmem:[%s2891_s21 + $0x98] sm:$0xff] }
  0x61   : > { %1714 = vmatpush1.bf16.msra.mxu1 %v2458_v28  ;;  %1626 = vmatprep.subr.bf16.mxu0 %v2508_v51  ;;  %v346_v28 = vld [vmem:[%s2891_s21 + $0x8] sm:$0xff] }
  0x62   : > { %1715 = vmatprep.subr.bf16.mxu1 %v2463_v29  ;;  %v352_v29 = vld [vmem:[%s2891_s21 + $0x38] sm:$0xff]  ;;  %v2539_v51 = vld [vmem:[%s3183_s3 + $0x2c0] ss:$8 sps:$4 sm:$0xff]  }
  0x63   : > { %v394_v31 = vpack.c.bf16 %v352_v29, %v346_v28  ;;  %v385_v29 = vld [vmem:[%s2891_s21 + $0x140] sm:$0xff] }
  0x64   : > { %1627 = vmatpush1.bf16.msra.mxu0 %v2506_v54 }
  0x65   : > { %1716 = vmatpush1.bf16.msra.mxu1 %v2461_v32  ;;  %1628 = vmatprep.subr.bf16.mxu0 %v2514_v56  ;;  %v2544_v32 = vld [vmem:[%s3183_s3 + $0xd4] ss:$8 sps:$4 sm:$0xff]   ;;  %v2553_v56 = vld [vmem:[%s3183_s3 + $0x2e4] ss:$8 sps:$4 sm:$0xff]  }
  0x66   : > { %1758 = vmatprep.subr.bf16.mxu1 %v2469_v36  ;;  %1644 = vmatprep.mubr.bf16.mxu0 %v394_v31  ;;  %v2529_v36 = vld [vmem:[%s3183_s3 + $0x2a4] ss:$8 sps:$4 sm:$0xff]  }
  0x68   : > { %1718 = vmatmul.mubr.bf16.vlgmr.msra.gmra.mrb[16].mxu1 %v395_v38  ;;  %1629 = vmatpush1.bf16.msra.mxu0 %v2512_v0  ;;  %v2542_v38 = vld [vmem:[%s3183_s3 + $0xd0] ss:$8 sps:$4 sm:$0xff]   ;;  %v406_v0 = vpack.c.bf16 %v376_v60, %v370_v59 }
  0x69   : > { %1759 = vmatpush1.bf16.msra.mxu1 %v2467_v40  ;;  %1727 = vmatprep.mubr.bf16.mxu1 %v402_v62  ;;  %v2527_v40 = vld [vmem:[%s3183_s3 + $0x2a0] ss:$8 sps:$4 sm:$0xff]   ;;  %v2559_v62 = vld [vmem:[%s3183_s3 + $0x2f4] ss:$8 sps:$4 sm:$0xff]  }
  0x6a   : > { %1760 = vmatprep.subr.bf16.mxu1 %v2475_v41  ;;  %1630 = vmatprep.subr.bf16.mxu0 %v2520_v1  ;;  %v2535_v41 = vld [vmem:[%s3183_s3 + $0x2b4] ss:$8 sps:$4 sm:$0xff]   ;;  %v2557_v1 = vld [vmem:[%s3183_s3 + $0x2f0] ss:$8 sps:$4 sm:$0xff]  }
  0x6c   : > { %1631 = vmatpush1.bf16.msra.mxu0 %v2518_v4  ;;  %v362_v4 = vld [vmem:[%s2891_s21 + $0x88] sm:$0xff] }
  0x6d   : > { %1761 = vmatpush1.bf16.msra.mxu1 %v2473_v44  ;;  %1632 = vmatprep.subr.bf16.mxu0 %v2526_v5  ;;  %v2533_v44 = vld [vmem:[%s3183_s3 + $0x2b0] ss:$8 sps:$4 sm:$0xff]  }
  0x6e   : > { %1762 = vmatprep.subr.bf16.mxu1 %v2481_v45  ;;  %v2541_v45 = vld [vmem:[%s3183_s3 + $0x2c4] ss:$8 sps:$4 sm:$0xff]   ;;  %v368_v5 = vld [vmem:[%s2891_s21 + $0xb8] sm:$0xff] }
  0x70   : > { %1728 = vmatmul.mubr.bf16.gmra.mrb[20].mxu1 %v401_v63  ;;  %1633 = vmatpush1.bf16.msra.mxu0 %v2524_v14  ;;  %v399_v63 = vpack.c.bf16 %v363_v58, %v357_v57  ;;  %v361_v14 = vld [vmem:[%s2891_s21 + $0x80] sm:$0xff] }
  0x71   : > { %1763 = vmatpush1.bf16.msra.mxu1 %v2479_v48  ;;  %1737 = vmatprep.mubr.bf16.mxu1 %v408_v8  ;;  %v351_v48 = vld [vmem:[%s2891_s21 + $0x30] sm:$0xff] }
  0x72   : > { %1764 = vmatprep.subr.bf16.mxu1 %v2487_v49  ;;  %1634 = vmatprep.subr.bf16.mxu0 %v2532_v16  ;;  %v358_v49 = vld [vmem:[%s2891_s21 + $0x68] sm:$0xff] }
  0x73   : > { %v400_v54 = vpack.c.bf16 %v364_v50, %v358_v49  ;;  %v374_v16 = vld [vmem:[%s2891_s21 + $0xe8] sm:$0xff] }
  0x74   : > { %1635 = vmatpush1.bf16.msra.mxu0 %v2530_v18  ;;  %v381_v18 = vld [vmem:[%s2891_s21 + $0x120] sm:$0xff] }
  0x75   : > { %1765 = vmatpush1.bf16.msra.mxu1 %v2485_v52  ;;  %1636 = vmatprep.subr.bf16.mxu0 %v2538_v24  ;;  %v2547_v52 = vld [vmem:[%s3183_s3 + $0x2d4] ss:$8 sps:$4 sm:$0xff]  }
  0x76   : > { %1766 = vmatprep.subr.bf16.mxu1 %v2493_v53  ;;  %v393_v53 = vpack.c.bf16 %v351_v48, %v345_v47  ;;  %v379_v24 = vld [vmem:[%s2891_s21 + $0x110] sm:$0xff] }
  0x78   : > { %1738 = vmatmul.mubr.bf16.gmra.mrb[24].mxu1 %v407_v13  ;;  %1637 = vmatpush1.bf16.msra.mxu0 %v2536_v30  ;;  %v412_v13 = vpack.c.bf16 %v388_v10, %v382_v9  ;;  %v391_v30 = vld [vmem:[%s2891_s21 + $0x170] sm:$0xff] }
  0x79   : > { %1767 = vmatpush1.bf16.msra.mxu1 %v2491_v55  ;;  %1747 = vmatprep.mubr.bf16.mxu1 %v414_v22  ;;  %v2545_v55 = vld [vmem:[%s3183_s3 + $0x2d0] ss:$8 sps:$4 sm:$0xff]   ;;  %v411_v22 = vpack.c.bf16 %v387_v19, %v381_v18  ;;  %v415_v31 = vpack.c.bf16 %v391_v30, %v385_v29 }
  0x7a   : > { %1768 = vmatprep.subr.bf16.mxu1 %v2499_v61  ;;  %1638 = vmatprep.subr.bf16.mxu0 %v2544_v32  ;;  %v2551_v61 = vld [vmem:[%s3183_s3 + $0x2e0] ss:$8 sps:$4 sm:$0xff]  }
  0x7c   : > { %1639 = vmatpush1.bf16.msra.mxu0 %v2542_v38 }
  0x7d   : > { %1769 = vmatpush1.bf16.msra.mxu1 %v2497_v2  ;;  %1640 = vmatprep.subr.bf16.mxu0 %v2550_v39  ;;  %v349_v2 = vld [vmem:[%s2891_s21 + $0x20] sm:$0xff] }
  0x7e   : > { %1770 = vmatprep.subr.bf16.mxu1 %v2505_v3  ;;  %v355_v3 = vld [vmem:[%s2891_s21 + $0x50] sm:$0xff] }
  0x7f   : > { %v397_v8 = vpack.c.bf16 %v355_v3, %v349_v2 }
  0x80   : > { %1748 = vmatmul.mubr.bf16.gmra.mrb[28].mxu1 %v413_v27  ;;  %1641 = vmatpush1.bf16.msra.mxu0 %v2548_v42  ;;  %v409_v27 = vpack.c.bf16 %v379_v24, %v373_v23 }
  0x81   : > { %1771 = vmatpush1.bf16.msra.mxu1 %v2503_v11  ;;  %1790 = vmatprep.mubr.bf16.mxu1 %v398_v37  ;;  %v404_v11 = vpack.c.bf16 %v368_v5, %v362_v4 }
  0x82   : > { %1772 = vmatprep.subr.bf16.mxu1 %v2511_v12  ;;  %1642 = vmatprep.subr.bf16.mxu0 %v2556_v43  ;;  %v405_v12 = vpack.c.bf16 %v375_v7, %v369_v6 }
  0x84   : > { %1643 = vmatpush1.bf16.msra.mxu0 %v2554_v46 }
  0x85   : > { %1773 = vmatpush1.bf16.msra.mxu1 %v2509_v15  ;;  %v367_v15 = vld [vmem:[%s2891_s21 + $0xb0] sm:$0xff] }
  0x86   : > { %1774 = vmatprep.subr.bf16.mxu1 %v2517_v17  ;;  %v380_v17 = vld [vmem:[%s2891_s21 + $0x118] sm:$0xff]  ;;  %v403_v20 = vpack.c.bf16 %v367_v15, %v361_v14 }
  0x87   : > { %1645 = vmatmul.mubr.bf16.vlgmr.msra.gmra.mrb[32].mxu0 %v393_v53  ;;  %v410_v21 = vpack.c.bf16 %v380_v17, %v374_v16 }
  0x88   : > { %1654 = vmatprep.mubr.bf16.mxu0 %v400_v54 }
  0x89   : > { %1775 = vmatpush1.bf16.msra.mxu1 %v2515_v25  ;;  %v386_v25 = vld [vmem:[%s2891_s21 + $0x148] sm:$0xff] }
  0x8a   : > { %1776 = vmatprep.subr.bf16.mxu1 %v2523_v26  ;;  %v392_v26 = vld [vmem:[%s2891_s21 + $0x178] sm:$0xff]  ;;  %s2001_s21 = sshll.u32 %s3187_s27, 2 }
  0x8b   : > { %v416_v28 = vpack.c.bf16 %v392_v26, %v386_v25  ;;  %s3157_s12 = scalar_lea.vmem %s3184_s4, %s2001_s21 }
  0x8d   : > { %1777 = vmatpush1.bf16.msra.mxu1 %v2521_v34 }
  0x8e   : > { %1778 = vmatprep.subr.bf16.mxu1 %v2529_v36 }
  0x8f   : > { %1655 = vmatmul.mubr.bf16.gmra.mrb[36].mxu0 %v399_v63 }
  0x90   : > { %1664 = vmatprep.mubr.bf16.mxu0 %v406_v0 }
  0x91   : > { %1779 = vmatpush1.bf16.msra.mxu1 %v2527_v40 }
  0x92   : > { %1780 = vmatprep.subr.bf16.mxu1 %v2535_v41 }
  0x95   : > { %1781 = vmatpush1.bf16.msra.mxu1 %v2533_v44 }
  0x96   : > { %1782 = vmatprep.subr.bf16.mxu1 %v2541_v45 }
  0x97   : > { %1665 = vmatmul.mubr.bf16.gmra.mrb[40].mxu0 %v405_v12 }
  0x98   : > { %1674 = vmatprep.mubr.bf16.mxu0 %v412_v13 }
  0x99   : > { %1783 = vmatpush1.bf16.msra.mxu1 %v2539_v51 }
  0x9a   : > { %1784 = vmatprep.subr.bf16.mxu1 %v2547_v52 }
  0x9d   : > { %1785 = vmatpush1.bf16.msra.mxu1 %v2545_v55 }
  0x9e   : > { %1786 = vmatprep.subr.bf16.mxu1 %v2553_v56 }
  0x9f   : > { %1675 = vmatmul.mubr.bf16.gmra.mrb[44].mxu0 %v411_v22 }
  0xa1   : > { %1787 = vmatpush1.bf16.msra.mxu1 %v2551_v61 }
  0xa2   : > { %1788 = vmatprep.subr.bf16.mxu1 %v2559_v62 }
  0xa5   : > { %1789 = vmatpush1.bf16.msra.mxu1 %v2557_v1 }
  0xa8   : > { %1791 = vmatmul.mubr.bf16.vlgmr.msra.gmra.mrb[16].mxu1 %v397_v8 }
  0xa9   : > { %1800 = vmatprep.mubr.bf16.mxu1 %v404_v11 }
  0xb0   : > { %1801 = vmatmul.mubr.bf16.gmra.mrb[20].mxu1 %v403_v20 }
  0xb1   : > { %1810 = vmatprep.mubr.bf16.mxu1 %v410_v21 }
  0xb8   : > { %1811 = vmatmul.mubr.bf16.gmra.mrb[24].mxu1 %v409_v27 }
  0xb9   : > { %1820 = vmatprep.mubr.bf16.mxu1 %v416_v28 }
  0xc0   : > { %1821 = vmatmul.mubr.bf16.gmra.mrb[28].mxu1 %v415_v31 }
  0xfa   : > { %v2223_v32 = vpop.f32.mrb[0].mxu0 }
  0xfb   : > { %v2263_v33 = vpop.f32.mrb[0].mxu1  ;;  %v2224_v34 = vpop.f32.mrb[1].mxu0 }
  0xfc   : > { %v2225_v35 = vadd.f32 %v2224_v34, %v2223_v32  ;;  %v2264_v36 = vpop.f32.mrb[1].mxu1  ;;  %v2226_v37 = vpop.f32.mrb[2].mxu0 }
  0xfd   : > { %v2265_v38 = vadd.f32 %v2264_v36, %v2263_v33  ;;  %v2266_v39 = vpop.f32.mrb[2].mxu1  ;;  %v2227_v40 = vpop.f32.mrb[3].mxu0 }
  0xfe   : > { %v2228_v41 = vadd.f32 %v2227_v40, %v2226_v37  ;;  %v2267_v42 = vpop.f32.mrb[3].mxu1 }
  0xff   : > { %v901_v43 = vadd.f32 %v2265_v38, %v2225_v35  ;;  %v2268_v44 = vadd.f32 %v2267_v42, %v2266_v39 }
 0x101   : > { %v904_v45 = vadd.f32 %v2268_v44, %v2228_v41 }
 0x102   : > { %v2229_v46 = vpop.f32.mrb[4].mxu0 }
 0x103   : > { %v2230_v47 = vpop.f32.mrb[5].mxu0 }
 0x104   : > { %v2231_v48 = vadd.f32 %v2230_v47, %v2229_v46  ;;  %v2232_v49 = vpop.f32.mrb[6].mxu0 }
 0x105   : > { %v2233_v50 = vpop.f32.mrb[7].mxu0  ;;  %v2269_v5 = vpop.f32.mrb[4].mxu1 }
 0x106   : > { %v2234_v51 = vadd.f32 %v2233_v50, %v2232_v49  ;;  %v2270_v8 = vpop.f32.mrb[5].mxu1 }
 0x107   : > { %v2271_v9 = vadd.f32 %v2270_v8, %v2269_v5  ;;  %v2272_v10 = vpop.f32.mrb[6].mxu1 }
 0x108   : > { %v2273_v12 = vpop.f32.mrb[7].mxu1 }
 0x109   : > { %v909_v13 = vadd.f32 %v2271_v9, %v2231_v48  ;;  %v2274_v14 = vadd.f32 %v2273_v12, %v2272_v10 }
 0x10a   : > { %v2235_v52 = vpop.f32.mrb[8].mxu0 }
 0x10b   : > { %v2236_v53 = vpop.f32.mrb[9].mxu0  ;;  %v912_v17 = vadd.f32 %v2274_v14, %v2234_v51 }
 0x10c   : > { %v2237_v54 = vadd.f32 %v2236_v53, %v2235_v52  ;;  %v2238_v55 = vpop.f32.mrb[10].mxu0 }
 0x10d   : > { %v2239_v56 = vpop.f32.mrb[11].mxu0  ;;  %v2275_v22 = vpop.f32.mrb[8].mxu1 }
 0x10e   : > { %v2240_v57 = vadd.f32 %v2239_v56, %v2238_v55  ;;  %v2276_v25 = vpop.f32.mrb[9].mxu1 }
 0x10f   : > { %v2277_v26 = vadd.f32 %v2276_v25, %v2275_v22  ;;  %v2278_v27 = vpop.f32.mrb[10].mxu1 }
 0x110   : > { %v2279_v29 = vpop.f32.mrb[11].mxu1 }
 0x111   : > { %v917_v30 = vadd.f32 %v2277_v26, %v2237_v54  ;;  %v2280_v31 = vadd.f32 %v2279_v29, %v2278_v27 }
 0x112   : > { %v2241_v58 = vpop.f32.mrb[12].mxu0 }
 0x113   : > { %v2242_v59 = vpop.f32.mrb[13].mxu0  ;;  %v920_v34 = vadd.f32 %v2280_v31, %v2240_v57 }
 0x114   : > { %v2243_v60 = vadd.f32 %v2242_v59, %v2241_v58  ;;  %v2244_v61 = vpop.f32.mrb[14].mxu0 }
 0x115   : > { %v2245_v62 = vpop.f32.mrb[15].mxu0  ;;  %v2281_v39 = vpop.f32.mrb[12].mxu1 }
 0x116   : > { %v2246_v63 = vadd.f32 %v2245_v62, %v2244_v61  ;;  %v2282_v42 = vpop.f32.mrb[13].mxu1 }
 0x117   : > { %v2284_v44 = vpop.f32.mrb[14].mxu1 }
 0x118   : > { %v2285_v46 = vpop.f32.mrb[15].mxu1 }
 0x119   : > { %v2286_v48 = vadd.f32 %v2285_v46, %v2284_v44 }
 0x11a   : > { %v2303_v0 = vpop.f32.mrb[16].mxu0 }
 0x11b   : > { %v2304_v1 = vpop.f32.mrb[17].mxu0  ;;  %v928_v51 = vadd.f32 %v2286_v48, %v2246_v63 }
 0x11c   : > { %v2305_v2 = vadd.f32 %v2304_v1, %v2303_v0  ;;  %v2306_v3 = vpop.f32.mrb[18].mxu0 }
 0x11d   : > { %v2307_v4 = vpop.f32.mrb[19].mxu0 }
 0x11e   : > { %v966_v6 = vadd.f32 %v2305_v2, %v901_v43  ;;  %v2308_v7 = vadd.f32 %v2307_v4, %v2306_v3  ;;  %v2283_v43 = vadd.f32 %v2282_v42, %v2281_v39 }
 0x120   : > { %v969_v11 = vadd.f32 %v2308_v7, %v904_v45  ;;  %v925_v47 = vadd.f32 %v2283_v43, %v2243_v60 }
 0x122   : > { %v2187_v15 = vpack.c.bf16 %v969_v11, %v966_v6  ;;  %v2309_v16 = vpop.f32.mrb[20].mxu0 }
 0x123   : > { %v2310_v18 = vpop.f32.mrb[21].mxu0 }
 0x124   : > { %2188 = vst [vmem:[%s3157_s12] sm:$0xff] %v2187_v15   ;;  %v2311_v19 = vadd.f32 %v2310_v18, %v2309_v16  ;;  %v2312_v20 = vpop.f32.mrb[22].mxu0 }
 0x125   : > { %v2313_v21 = vpop.f32.mrb[23].mxu0 }
 0x126   : > { %v974_v23 = vadd.f32 %v2311_v19, %v909_v13  ;;  %v2314_v24 = vadd.f32 %v2313_v21, %v2312_v20 }
 0x128   : > { %v977_v28 = vadd.f32 %v2314_v24, %v912_v17 }
 0x12a   : > { %v2192_v32 = vpack.c.bf16 %v977_v28, %v974_v23  ;;  %v2315_v33 = vpop.f32.mrb[24].mxu0 }
 0x12b   : > { %v2316_v35 = vpop.f32.mrb[25].mxu0 }
 0x12c   : > { %2204 = vst [vmem:[%s3157_s12 + $0x8] sm:$0xff] %v2192_v32   ;;  %v2317_v36 = vadd.f32 %v2316_v35, %v2315_v33  ;;  %v2318_v37 = vpop.f32.mrb[26].mxu0 }
 0x12d   : > { %v2319_v38 = vpop.f32.mrb[27].mxu0 }
 0x12e   : > { %v982_v40 = vadd.f32 %v2317_v36, %v917_v30  ;;  %v2320_v41 = vadd.f32 %v2319_v38, %v2318_v37 }
 0x130   : > { %v985_v45 = vadd.f32 %v2320_v41, %v920_v34 }
 0x132   : > { %v2197_v49 = vpack.c.bf16 %v985_v45, %v982_v40  ;;  %v2321_v50 = vpop.f32.mrb[28].mxu0 }
 0x133   : > { %v2322_v52 = vpop.f32.mrb[29].mxu0 }
 0x134   : > { %2205 = vst [vmem:[%s3157_s12 + $0x10] sm:$0xff] %v2197_v49   ;;  %v2323_v53 = vadd.f32 %v2322_v52, %v2321_v50  ;;  %v2324_v54 = vpop.f32.mrb[30].mxu0 }
 0x135   : > { %v2325_v55 = vpop.f32.mrb[31].mxu0 }
 0x136   : > { %v990_v56 = vadd.f32 %v2323_v53, %v925_v47  ;;  %v2326_v57 = vadd.f32 %v2325_v55, %v2324_v54 }
 0x138   : > { %v993_v58 = vadd.f32 %v2326_v57, %v928_v51 }
 0x13a   : > { %v2202_v59 = vpack.c.bf16 %v993_v58, %v990_v56 }
 0x13c   : > { %2206 = vst [vmem:[%s3157_s12 + $0x18] sm:$0xff] %v2202_v59  }
 0x15a   : > { %v1646_v61 = vpop.f32.mrb[32].mxu0 }
 0x15b   : > { %v1648_v62 = vpop.f32.mrb[33].mxu0 }
 0x15c   : > { %v1650_v0 = vpop.f32.mrb[34].mxu0 }
 0x15d   : > { %v1652_v1 = vpop.f32.mrb[35].mxu0 }
 0x162   : > { %v1656_v60 = vpop.f32.mrb[36].mxu0 }
 0x163   : > { %v1658_v2 = vpop.f32.mrb[37].mxu0 }
 0x164   : > { %v1660_v3 = vpop.f32.mrb[38].mxu0 }
 0x165   : > { %v1662_v4 = vpop.f32.mrb[39].mxu0 }
 0x16a   : > { %v1666_v9 = vpop.f32.mrb[40].mxu0 }
 0x16b   : > { %v1668_v12 = vpop.f32.mrb[41].mxu0 }
 0x16c   : > { %v1670_v15 = vpop.f32.mrb[42].mxu0 }
 0x16d   : > { %v1672_v16 = vpop.f32.mrb[43].mxu0 }
 0x172   : > { %v1676_v23 = vpop.f32.mrb[44].mxu0 }
 0x173   : > { %v1678_v26 = vpop.f32.mrb[45].mxu0 }
 0x174   : > { %v1680_v29 = vpop.f32.mrb[46].mxu0 }
 0x175   : > { %v1682_v30 = vpop.f32.mrb[47].mxu0 }
 0x17b   : > { %v1792_v63 = vpop.f32.mrb[16].mxu1 }
 0x17c   : > { %v2327_v5 = vadd.f32 %v1792_v63, %v1646_v61  ;;  %v1794_v6 = vpop.f32.mrb[17].mxu1 }
 0x17d   : > { %v2328_v7 = vadd.f32 %v1794_v6, %v1648_v62  ;;  %v1796_v8 = vpop.f32.mrb[18].mxu1 }
 0x17e   : > { %v2329_v10 = vadd.f32 %v1796_v8, %v1650_v0  ;;  %v1798_v11 = vpop.f32.mrb[19].mxu1 }
 0x17f   : > { %v2176_v13 = vpack.c.bf16 %v2328_v7, %v2327_v5  ;;  %v2330_v14 = vadd.f32 %v1798_v11, %v1652_v1 }
 0x181   : > { %1879 = vst [vmem:[%s3167_s19] sm:$0xff] %v2176_v13  ;;  %v2177_v17 = vpack.c.bf16 %v2330_v14, %v2329_v10 }
 0x183   : > { %1880 = vst [vmem:[%s3167_s19 + $0x8] sm:$0xff] %v2177_v17  ;;  %v1802_v18 = vpop.f32.mrb[20].mxu1 }
 0x184   : > { %v2331_v19 = vadd.f32 %v1802_v18, %v1656_v60  ;;  %v1804_v20 = vpop.f32.mrb[21].mxu1 }
 0x185   : > { %v2332_v21 = vadd.f32 %v1804_v20, %v1658_v2  ;;  %v1806_v22 = vpop.f32.mrb[22].mxu1 }
 0x186   : > { %v2333_v24 = vadd.f32 %v1806_v22, %v1660_v3  ;;  %v1808_v25 = vpop.f32.mrb[23].mxu1 }
 0x187   : > { %v2178_v27 = vpack.c.bf16 %v2332_v21, %v2331_v19  ;;  %v2334_v28 = vadd.f32 %v1808_v25, %v1662_v4 }
 0x189   : > { %1881 = vst [vmem:[%s3167_s19 + $0x10] sm:$0xff] %v2178_v27  ;;  %v2179_v31 = vpack.c.bf16 %v2334_v28, %v2333_v24 }
 0x18b   : > { %1882 = vst [vmem:[%s3167_s19 + $0x18] sm:$0xff] %v2179_v31  ;;  %v1812_v32 = vpop.f32.mrb[24].mxu1 }
 0x18c   : > { %v2335_v33 = vadd.f32 %v1812_v32, %v1666_v9  ;;  %v1814_v34 = vpop.f32.mrb[25].mxu1 }
 0x18d   : > { %v2336_v35 = vadd.f32 %v1814_v34, %v1668_v12  ;;  %v1816_v36 = vpop.f32.mrb[26].mxu1 }
 0x18e   : > { %v2337_v37 = vadd.f32 %v1816_v36, %v1670_v15  ;;  %v1818_v38 = vpop.f32.mrb[27].mxu1 }
 0x18f   : > { %v2180_v39 = vpack.c.bf16 %v2336_v35, %v2335_v33  ;;  %v2338_v40 = vadd.f32 %v1818_v38, %v1672_v16 }
 0x191   : > { %1883 = vst [vmem:[%s3167_s19 + $0x20] sm:$0xff] %v2180_v39  ;;  %v2181_v41 = vpack.c.bf16 %v2338_v40, %v2337_v37 }
 0x193   : > { %1884 = vst [vmem:[%s3167_s19 + $0x28] sm:$0xff] %v2181_v41  ;;  %v1822_v42 = vpop.f32.mrb[28].mxu1 }
 0x194   : > { %v2339_v43 = vadd.f32 %v1822_v42, %v1676_v23  ;;  %v1824_v44 = vpop.f32.mrb[29].mxu1 }
 0x195   : > { %v2340_v45 = vadd.f32 %v1824_v44, %v1678_v26  ;;  %v1826_v46 = vpop.f32.mrb[30].mxu1 }
 0x196   : > { %v2341_v47 = vadd.f32 %v1826_v46, %v1680_v29  ;;  %v1828_v48 = vpop.f32.mrb[31].mxu1 }
 0x197   : > { %v2182_v49 = vpack.c.bf16 %v2340_v45, %v2339_v43  ;;  %v2342_v50 = vadd.f32 %v1828_v48, %v1682_v30 }
 0x199   : > { %1885 = vst [vmem:[%s3167_s19 + $0x30] sm:$0xff] %v2182_v49  ;;  %v2183_v51 = vpack.c.bf16 %v2342_v50, %v2341_v47 }
 0x19b   : > { %1886 = vst [vmem:[%s3167_s19 + $0x38] sm:$0xff] %v2183_v51 }
 0x19c PF: > { %s16_s18 = sadd.s32 1, %s2566_s18  }
 0x19d   : > { %p13_p4 = scmp.ge.s32.totalorder %s16_s18, 4  }
 0x19f   :  { %15 = sbr.rel (!%p13_p4) target bundleno = 1 (0x1), region = 81 }

</bundles_post_ra>
